<compile_context>
chip_gen: v7x
topology: tpu7x:2x2x1
jax: 0.10.0
libtpu: 0.0.40
codegen_flags: <defaults>
</compile_context>

<pallas_src>
import functools

import numpy as np
import jax
import jax.numpy as jnp
from jax import lax
from jax.experimental import pallas as pl
from jax.experimental.pallas import tpu as pltpu

BN_EPS = 1e-5
_LANE = 128


def _round_up(x, m):
    return (x + m - 1) // m * m


def _cdiv(a, b):
    return (a + b - 1) // b


def _vmem_capacity_bytes():
    """Generation-aware VMEM capacity (v5e/v6e: 128 MiB, v7x: 64 MiB per TensorCore)."""
    try:
        cap = int(getattr(pltpu.get_tpu_info(), "vmem_capacity_bytes", 0))
        if cap > 0:
            return cap
    except Exception:
        pass
    return 64 * 1024 * 1024  # conservative fallback (v7x per-core VMEM)


def _conv_tile_bytes(th, H, W, c_in, c_out_p):
    """VMEM working set of one conv grid step (double-buffered blocks + f32 acc)."""
    h_pad = _cdiv(H, th) * th
    return (2 * (h_pad + 2) * (W + 2) * c_in * 2   # resident padded image, bf16, 2 bufs
            + 2 * th * W * c_out_p * 2             # y output block, bf16, 2 bufs
            + 2 * 2 * c_out_p * 4                  # stats block, f32, 2 bufs
            + 2 * 9 * c_in * c_out_p * 2           # weights, bf16, 2 bufs
            + th * W * c_out_p * 4)                # f32 register accumulator (may spill)


def _pick_th(H, W, c_in, c_out_p, budget):
    """Row-tile height: biggest divisor of H that fits; masked tail tile as fallback."""
    best_div = 0
    for th in range(1, H + 1):
        if H % th == 0 and _conv_tile_bytes(th, H, W, c_in, c_out_p) <= budget:
            best_div = th
    if best_div * 8 >= H:          # divisor tiling with at most 8 tiles: good enough
        return best_div
    for th in range(H, 0, -1):     # guard the th=1 cliff: allow a masked short last tile
        if _conv_tile_bytes(th, H, W, c_in, c_out_p) <= budget:
            return max(th, best_div, 1)
    return max(best_div, 1)


def _pick_bn_rows(n_tiles, rows_per_tile, c_out_p, budget):
    """Row block for kernel 2: a multiple of the conv tile rows, sized to the budget."""
    max_rows = max(rows_per_tile, budget // (12 * c_out_p))  # bf16 in + f32 out, 2 bufs
    best_m = 1
    for m in range(1, n_tiles + 1):
        if n_tiles % m == 0 and m * rows_per_tile <= max_rows:
            best_m = m
    return best_m * rows_per_tile


# ---------------------------------------------------------------------------
# Kernel 1: 3x3 conv as 9 shifted MXU matmuls (register accumulation) + per-tile
#           BN partial statistics.  Input image resident in VMEM, bf16 output.
# ---------------------------------------------------------------------------
def _conv3x3_kernel(x_ref, w_ref, y_ref, stats_ref, *, th, H, W, c_in, c_out_p):
    base = pl.program_id(1) * th  # first output row of this H tile

    # 3x3 conv = 9 shifted matmuls, accumulated in f32 registers (bf16 MXU inputs).
    acc = None
    for kh in range(3):
        rows = x_ref[pl.ds(base + kh, th)]                    # (th, W+2, c_in)
        for kw in range(3):
            patch = rows[:, kw:kw + W, :].reshape(th * W, c_in)
            tap = jnp.dot(patch, w_ref[kh, kw],
                          preferred_element_type=jnp.float32)
            acc = tap if acc is None else acc + tap

    # Single lane-dense store of the bf16 conv-output tile.
    y_ref[...] = acc.astype(jnp.bfloat16)

    # Per-tile BN partial statistics (tile-centered -> numerically stable combine).
    if H % th == 0:
        inv_n = 1.0 / float(th * W)
        tile_sum = jnp.sum(acc, axis=0, keepdims=True)        # (1, c_out_p)
        centered = acc - tile_sum * inv_n
        tile_css = jnp.sum(centered * centered, axis=0, keepdims=True)
    else:
        n_valid = jnp.minimum(th, H - base) * W               # valid rows in this tile
        row_ids = lax.broadcasted_iota(jnp.int32, (th * W, 1), 0)
        valid = row_ids < n_valid
        acc_m = jnp.where(valid, acc, 0.0)
        tile_sum = jnp.sum(acc_m, axis=0, keepdims=True)
        centered = jnp.where(
            valid, acc - tile_sum / n_valid.astype(jnp.float32), 0.0)
        tile_css = jnp.sum(centered * centered, axis=0, keepdims=True)

    stats_ref[0:1, :] = tile_sum
    stats_ref[1:2, :] = tile_css


def _conv3x3_nhwc(x_pad, w_hwio, *, H, th, n_th, c_out_p, vmem_limit):
    N, hpp2, wp2, c_in = x_pad.shape
    W = wp2 - 2
    kernel = functools.partial(_conv3x3_kernel, th=th, H=H, W=W,
                               c_in=c_in, c_out_p=c_out_p)
    grid_spec = pltpu.PrefetchScalarGridSpec(
        num_scalar_prefetch=0,
        grid=(N, n_th),
        in_specs=[
            # Whole padded image: block index is constant along the H-tile axis, so the
            # image stays resident in VMEM and is DMA'd only once per batch element.
            pl.BlockSpec((None, hpp2, wp2, c_in), lambda n, i: (n, 0, 0, 0)),
            # Full HWIO weight (lane-padded C_out), resident across the grid.
            pl.BlockSpec((3, 3, c_in, c_out_p), lambda n, i: (0, 0, 0, 0)),
        ],
        out_specs=[
            pl.BlockSpec((None, th * W, c_out_p), lambda n, i: (n * n_th + i, 0, 0)),
            pl.BlockSpec((None, 2, c_out_p), lambda n, i: (n * n_th + i, 0, 0)),
        ],
    )
    return pl.pallas_call(
        kernel,
        out_shape=(
            jax.ShapeDtypeStruct((N * n_th, th * W, c_out_p), jnp.bfloat16),
            jax.ShapeDtypeStruct((N * n_th, 2, c_out_p), jnp.float32),
        ),
        grid_spec=grid_spec,
        compiler_params=pltpu.CompilerParams(
            dimension_semantics=("parallel", "parallel"),
            vmem_limit_bytes=vmem_limit),
    )(x_pad, w_hwio)


# ---------------------------------------------------------------------------
# Kernel 2: folded BatchNorm affine + ReLU on large lane-dense 2-D row blocks.
# ---------------------------------------------------------------------------
def _bn_relu_kernel(y_ref, scale_ref, shift_ref, o_ref):
    y = y_ref[...].astype(jnp.float32)
    o_ref[...] = jnp.maximum(y * scale_ref[...] + shift_ref[...], 0.0)


def _bn_relu(y2d, scale_row, shift_row, *, rb, vmem_limit):
    R, c_out_p = y2d.shape
    grid_spec = pltpu.PrefetchScalarGridSpec(
        num_scalar_prefetch=0,
        grid=(R // rb,),
        in_specs=[
            pl.BlockSpec((rb, c_out_p), lambda i: (i, 0)),
            pl.BlockSpec((1, c_out_p), lambda i: (0, 0)),
            pl.BlockSpec((1, c_out_p), lambda i: (0, 0)),
        ],
        out_specs=pl.BlockSpec((rb, c_out_p), lambda i: (i, 0)),
    )
    return pl.pallas_call(
        _bn_relu_kernel,
        out_shape=jax.ShapeDtypeStruct((R, c_out_p), jnp.float32),
        grid_spec=grid_spec,
        compiler_params=pltpu.CompilerParams(
            dimension_semantics=("parallel",),
            vmem_limit_bytes=vmem_limit),
    )(y2d, scale_row, shift_row)


# ---------------------------------------------------------------------------
# Forward pass (NCHW in / NCHW out, matching the PyTorch module).
# ---------------------------------------------------------------------------
def single_conv_r2u_forward(x, params):
    """x: (N, C_in, H, W) f32; params = (w OIHW, b, gamma, beta) -> (N, C_out, H, W)."""
    w, b, gamma, beta = params
    del b  # a bias applied before training-mode BatchNorm cancels exactly in the output
    N, c_in, H, W = x.shape
    c_out = w.shape[0]
    c_out_p = _round_up(c_out, _LANE)

    cap = _vmem_capacity_bytes()
    budget = int(cap * 0.45)
    vmem_limit = min(int(cap * 0.75), 100 * 1024 * 1024)

    th = _pick_th(H, W, c_in, c_out_p, budget)
    n_th = _cdiv(H, th)
    h_pad = n_th * th

    # NCHW -> NHWC, zero pad (top halo 1, bottom halo + tile tail, 1 each side of W),
    # cast to bf16 for the MXU: a single fused XLA transpose/pad/convert.
    x_nhwc = jnp.transpose(x, (0, 2, 3, 1))
    x_padded = jnp.pad(x_nhwc, ((0, 0), (1, 1 + h_pad - H), (1, 1), (0, 0)))
    x_padded = x_padded.astype(jnp.bfloat16)

    # OIHW -> HWIO; zero-pad C_out to a lane-dense multiple of 128; bf16.
    w_hwio = jnp.transpose(w, (2, 3, 1, 0))
    w_hwio = jnp.pad(w_hwio, ((0, 0), (0, 0), (0, 0), (0, c_out_p - c_out)))
    w_hwio = w_hwio.astype(jnp.bfloat16)

    y, stats = _conv3x3_nhwc(x_padded, w_hwio, H=H, th=th, n_th=n_th,
                             c_out_p=c_out_p, vmem_limit=vmem_limit)

    # Chan parallel-variance combine of the per-tile (masked) partial sums.
    counts_np = np.array([min(th, H - i * th) * W for i in range(n_th)], np.float32)
    counts = jnp.asarray(np.tile(counts_np, N))[:, None]        # (N*n_th, 1)
    m_total = float(N * H * W)
    tile_sum = stats[:, 0, :]                                   # (N*n_th, c_out_p)
    tile_css = stats[:, 1, :]
    mean = jnp.sum(tile_sum, axis=0) / m_total
    tile_mean = tile_sum / counts
    m2 = jnp.sum(tile_css, axis=0) + jnp.sum(
        counts * (tile_mean - mean[None, :]) ** 2, axis=0)
    var = m2 / m_total
    inv = lax.rsqrt(var + BN_EPS)

    gamma_p = jnp.pad(gamma, (0, c_out_p - c_out))
    beta_p = jnp.pad(beta, (0, c_out_p - c_out))
    scale = (gamma_p * inv).reshape(1, c_out_p).astype(jnp.float32)
    shift = (beta_p - mean * gamma_p * inv).reshape(1, c_out_p).astype(jnp.float32)

    # Folded BN + ReLU over large, lane-dense 2-D row blocks (bf16 in, f32 out).
    y2d = y.reshape(N * h_pad * W, c_out_p)
    rb = _pick_bn_rows(N * n_th, th * W, c_out_p, budget)
    out2d = _bn_relu(y2d, scale, shift, rb=rb, vmem_limit=vmem_limit)

    # Drop tail rows and lane padding; back to NCHW once at block exit.
    out = out2d.reshape(N, h_pad, W, c_out_p)[:, :H, :, :c_out]
    return jnp.transpose(out, (0, 3, 1, 2))


# ---------------------------------------------------------------------------
# Params + pure-JAX reference for a correctness sanity check.
# ---------------------------------------------------------------------------
def init_params(key, ch_in, ch_out):
    k1, k2 = jax.random.split(key)
    bound = 1.0 / (ch_in * 9.0) ** 0.5
    w = jax.random.uniform(k1, (ch_out, ch_in, 3, 3), jnp.float32, -bound, bound)
    b = jax.random.uniform(k2, (ch_out,), jnp.float32, -bound, bound)
    gamma = jnp.ones((ch_out,), jnp.float32)
    beta = jnp.zeros((ch_out,), jnp.float32)
    return (w, b, gamma, beta)


def _ref_forward(x, params):
    w, b, g, be = params
    y = lax.conv_general_dilated(
        x.astype(jnp.bfloat16), w.astype(jnp.bfloat16),
        window_strides=(1, 1), padding=((1, 1), (1, 1)),
        dimension_numbers=("NCHW", "OIHW", "NCHW"),
        preferred_element_type=jnp.float32)
    y = y + b.reshape(1, -1, 1, 1)
    mean = jnp.mean(y, axis=(0, 2, 3), keepdims=True)
    var = jnp.mean((y - mean) ** 2, axis=(0, 2, 3), keepdims=True)
    y = (y - mean) * lax.rsqrt(var + BN_EPS)
    y = y * g.reshape(1, -1, 1, 1) + be.reshape(1, -1, 1, 1)
    return jnp.maximum(y, 0.0)


if __name__ == "__main__":
    N, C_in, C_out, H, W = 2, 4, 8, 16, 16

    key = jax.random.PRNGKey(0)
    kx, kp = jax.random.split(key)
    x = jax.random.normal(kx, (N, C_in, H, W), jnp.float32)
    params = init_params(kp, C_in, C_out)

    fwd = jax.jit(single_conv_r2u_forward)
    out = jax.block_until_ready(fwd(x, params))
    assert out.shape == (N, C_out, H, W), out.shape

    ref = jax.block_until_ready(_ref_forward(x, params))
    # Tolerance covers the bf16 conv inputs and the bf16 y handoff between kernels.
    err = float(jnp.max(jnp.abs(out - ref)))
    assert err < 2e-2, err

    print("KERNEL_OK")
</pallas_src>

<mosaic_0001>
module attributes {stable_mosaic.version = 11 : i64} {
  func.func @_conv3x3_kernel(%arg0: i32, %arg1: i32, %arg2: memref<1x18x18x4xbf16, #tpu.memory_space<vmem>>, %arg3: memref<3x3x4x128xbf16, #tpu.memory_space<vmem>>, %arg4: memref<1x256x128xbf16, #tpu.memory_space<vmem>>, %arg5: memref<1x2x128xf32, #tpu.memory_space<vmem>>) attributes {dimension_semantics = [#tpu.dimension_semantics<parallel>, #tpu.dimension_semantics<parallel>], iteration_bounds = array<i64: 2, 1>, scalar_prefetch = 0 : i64, scratch_operands = 0 : i64, tpu.core_type = #tpu.core_type<tc>, window_params = [{transform_indices = @transform_0, window_bounds = array<i64: 1, 18, 18, 4>}, {pipeline_mode = #tpu.pipeline_mode<synchronous>, transform_indices = @transform_1, window_bounds = array<i64: 3, 3, 4, 128>}, {transform_indices = @transform_2, window_bounds = array<i64: 1, 256, 128>}, {transform_indices = @transform_3, window_bounds = array<i64: 1, 2, 128>}]} {
    %c16_i32 = arith.constant 16 : i32
    %0 = arith.muli %arg1, %c16_i32 : i32
    %c0_i32 = arith.constant 0 : i32
    %1 = arith.addi %0, %c0_i32 : i32
    %c0 = arith.constant 0 : index
    %2 = arith.index_cast %1 : i32 to index
    %c0_0 = arith.constant 0 : index
    %c0_1 = arith.constant 0 : index
    %3 = vector.load %arg2[%c0, %2, %c0_0, %c0_1] : memref<1x18x18x4xbf16, #tpu.memory_space<vmem>>, vector<1x16x18x4xbf16>
    %4 = vector.shape_cast %3 : vector<1x16x18x4xbf16> to vector<16x18x4xbf16>
    %5 = vector.extract_strided_slice %4 {offsets = [0, 0, 0], sizes = [16, 16, 4], strides = [1, 1, 1]} : vector<16x18x4xbf16> to vector<16x16x4xbf16>
    %6 = vector.shape_cast %5 : vector<16x16x4xbf16> to vector<256x4xbf16>
    %c0_2 = arith.constant 0 : index
    %c0_3 = arith.constant 0 : index
    %c0_4 = arith.constant 0 : index
    %c0_5 = arith.constant 0 : index
    %7 = vector.load %arg3[%c0_2, %c0_3, %c0_4, %c0_5] : memref<3x3x4x128xbf16, #tpu.memory_space<vmem>>, vector<1x1x4x128xbf16>
    %8 = vector.shape_cast %7 : vector<1x1x4x128xbf16> to vector<4x128xbf16>
    %cst = arith.constant dense<0.000000e+00> : vector<256x128xf32>
    %9 = tpu.matmul %6, %8, %cst {dimension_numbers = #tpu.dot_dimension_numbers<[1], [0], [0], [1], [0, 0, 1, 1], [], []>} : vector<256x4xbf16>, vector<4x128xbf16>, vector<256x128xf32> -> vector<256x128xf32>
    %10 = vector.extract_strided_slice %4 {offsets = [0, 1, 0], sizes = [16, 16, 4], strides = [1, 1, 1]} : vector<16x18x4xbf16> to vector<16x16x4xbf16>
    %11 = vector.shape_cast %10 : vector<16x16x4xbf16> to vector<256x4xbf16>
    %c0_6 = arith.constant 0 : index
    %c1 = arith.constant 1 : index
    %c0_7 = arith.constant 0 : index
    %c0_8 = arith.constant 0 : index
    %12 = vector.load %arg3[%c0_6, %c1, %c0_7, %c0_8] : memref<3x3x4x128xbf16, #tpu.memory_space<vmem>>, vector<1x1x4x128xbf16>
    %13 = vector.shape_cast %12 : vector<1x1x4x128xbf16> to vector<4x128xbf16>
    %cst_9 = arith.constant dense<0.000000e+00> : vector<256x128xf32>
    %14 = tpu.matmul %11, %13, %cst_9 {dimension_numbers = #tpu.dot_dimension_numbers<[1], [0], [0], [1], [0, 0, 1, 1], [], []>} : vector<256x4xbf16>, vector<4x128xbf16>, vector<256x128xf32> -> vector<256x128xf32>
    %15 = arith.addf %9, %14 : vector<256x128xf32>
    %16 = vector.extract_strided_slice %4 {offsets = [0, 2, 0], sizes = [16, 16, 4], strides = [1, 1, 1]} : vector<16x18x4xbf16> to vector<16x16x4xbf16>
    %17 = vector.shape_cast %16 : vector<16x16x4xbf16> to vector<256x4xbf16>
    %c0_10 = arith.constant 0 : index
    %c2 = arith.constant 2 : index
    %c0_11 = arith.constant 0 : index
    %c0_12 = arith.constant 0 : index
    %18 = vector.load %arg3[%c0_10, %c2, %c0_11, %c0_12] : memref<3x3x4x128xbf16, #tpu.memory_space<vmem>>, vector<1x1x4x128xbf16>
    %19 = vector.shape_cast %18 : vector<1x1x4x128xbf16> to vector<4x128xbf16>
    %cst_13 = arith.constant dense<0.000000e+00> : vector<256x128xf32>
    %20 = tpu.matmul %17, %19, %cst_13 {dimension_numbers = #tpu.dot_dimension_numbers<[1], [0], [0], [1], [0, 0, 1, 1], [], []>} : vector<256x4xbf16>, vector<4x128xbf16>, vector<256x128xf32> -> vector<256x128xf32>
    %21 = arith.addf %15, %20 : vector<256x128xf32>
    %c1_i32 = arith.constant 1 : i32
    %22 = arith.addi %0, %c1_i32 : i32
    %c0_14 = arith.constant 0 : index
    %23 = arith.index_cast %22 : i32 to index
    %c0_15 = arith.constant 0 : index
    %c0_16 = arith.constant 0 : index
    %24 = vector.load %arg2[%c0_14, %23, %c0_15, %c0_16] : memref<1x18x18x4xbf16, #tpu.memory_space<vmem>>, vector<1x16x18x4xbf16>
    %25 = vector.shape_cast %24 : vector<1x16x18x4xbf16> to vector<16x18x4xbf16>
    %26 = vector.extract_strided_slice %25 {offsets = [0, 0, 0], sizes = [16, 16, 4], strides = [1, 1, 1]} : vector<16x18x4xbf16> to vector<16x16x4xbf16>
    %27 = vector.shape_cast %26 : vector<16x16x4xbf16> to vector<256x4xbf16>
    %c1_17 = arith.constant 1 : index
    %c0_18 = arith.constant 0 : index
    %c0_19 = arith.constant 0 : index
    %c0_20 = arith.constant 0 : index
    %28 = vector.load %arg3[%c1_17, %c0_18, %c0_19, %c0_20] : memref<3x3x4x128xbf16, #tpu.memory_space<vmem>>, vector<1x1x4x128xbf16>
    %29 = vector.shape_cast %28 : vector<1x1x4x128xbf16> to vector<4x128xbf16>
    %cst_21 = arith.constant dense<0.000000e+00> : vector<256x128xf32>
    %30 = tpu.matmul %27, %29, %cst_21 {dimension_numbers = #tpu.dot_dimension_numbers<[1], [0], [0], [1], [0, 0, 1, 1], [], []>} : vector<256x4xbf16>, vector<4x128xbf16>, vector<256x128xf32> -> vector<256x128xf32>
    %31 = arith.addf %21, %30 : vector<256x128xf32>
    %32 = vector.extract_strided_slice %25 {offsets = [0, 1, 0], sizes = [16, 16, 4], strides = [1, 1, 1]} : vector<16x18x4xbf16> to vector<16x16x4xbf16>
    %33 = vector.shape_cast %32 : vector<16x16x4xbf16> to vector<256x4xbf16>
    %c1_22 = arith.constant 1 : index
    %c1_23 = arith.constant 1 : index
    %c0_24 = arith.constant 0 : index
    %c0_25 = arith.constant 0 : index
    %34 = vector.load %arg3[%c1_22, %c1_23, %c0_24, %c0_25] : memref<3x3x4x128xbf16, #tpu.memory_space<vmem>>, vector<1x1x4x128xbf16>
    %35 = vector.shape_cast %34 : vector<1x1x4x128xbf16> to vector<4x128xbf16>
    %cst_26 = arith.constant dense<0.000000e+00> : vector<256x128xf32>
    %36 = tpu.matmul %33, %35, %cst_26 {dimension_numbers = #tpu.dot_dimension_numbers<[1], [0], [0], [1], [0, 0, 1, 1], [], []>} : vector<256x4xbf16>, vector<4x128xbf16>, vector<256x128xf32> -> vector<256x128xf32>
    %37 = arith.addf %31, %36 : vector<256x128xf32>
    %38 = vector.extract_strided_slice %25 {offsets = [0, 2, 0], sizes = [16, 16, 4], strides = [1, 1, 1]} : vector<16x18x4xbf16> to vector<16x16x4xbf16>
    %39 = vector.shape_cast %38 : vector<16x16x4xbf16> to vector<256x4xbf16>
    %c1_27 = arith.constant 1 : index
    %c2_28 = arith.constant 2 : index
    %c0_29 = arith.constant 0 : index
    %c0_30 = arith.constant 0 : index
    %40 = vector.load %arg3[%c1_27, %c2_28, %c0_29, %c0_30] : memref<3x3x4x128xbf16, #tpu.memory_space<vmem>>, vector<1x1x4x128xbf16>
    %41 = vector.shape_cast %40 : vector<1x1x4x128xbf16> to vector<4x128xbf16>
    %cst_31 = arith.constant dense<0.000000e+00> : vector<256x128xf32>
    %42 = tpu.matmul %39, %41, %cst_31 {dimension_numbers = #tpu.dot_dimension_numbers<[1], [0], [0], [1], [0, 0, 1, 1], [], []>} : vector<256x4xbf16>, vector<4x128xbf16>, vector<256x128xf32> -> vector<256x128xf32>
    %43 = arith.addf %37, %42 : vector<256x128xf32>
    %c2_i32 = arith.constant 2 : i32
    %44 = arith.addi %0, %c2_i32 : i32
    %c0_32 = arith.constant 0 : index
    %45 = arith.index_cast %44 : i32 to index
    %c0_33 = arith.constant 0 : index
    %c0_34 = arith.constant 0 : index
    %46 = vector.load %arg2[%c0_32, %45, %c0_33, %c0_34] : memref<1x18x18x4xbf16, #tpu.memory_space<vmem>>, vector<1x16x18x4xbf16>
    %47 = vector.shape_cast %46 : vector<1x16x18x4xbf16> to vector<16x18x4xbf16>
    %48 = vector.extract_strided_slice %47 {offsets = [0, 0, 0], sizes = [16, 16, 4], strides = [1, 1, 1]} : vector<16x18x4xbf16> to vector<16x16x4xbf16>
    %49 = vector.shape_cast %48 : vector<16x16x4xbf16> to vector<256x4xbf16>
    %c2_35 = arith.constant 2 : index
    %c0_36 = arith.constant 0 : index
    %c0_37 = arith.constant 0 : index
    %c0_38 = arith.constant 0 : index
    %50 = vector.load %arg3[%c2_35, %c0_36, %c0_37, %c0_38] : memref<3x3x4x128xbf16, #tpu.memory_space<vmem>>, vector<1x1x4x128xbf16>
    %51 = vector.shape_cast %50 : vector<1x1x4x128xbf16> to vector<4x128xbf16>
    %cst_39 = arith.constant dense<0.000000e+00> : vector<256x128xf32>
    %52 = tpu.matmul %49, %51, %cst_39 {dimension_numbers = #tpu.dot_dimension_numbers<[1], [0], [0], [1], [0, 0, 1, 1], [], []>} : vector<256x4xbf16>, vector<4x128xbf16>, vector<256x128xf32> -> vector<256x128xf32>
    %53 = arith.addf %43, %52 : vector<256x128xf32>
    %54 = vector.extract_strided_slice %47 {offsets = [0, 1, 0], sizes = [16, 16, 4], strides = [1, 1, 1]} : vector<16x18x4xbf16> to vector<16x16x4xbf16>
    %55 = vector.shape_cast %54 : vector<16x16x4xbf16> to vector<256x4xbf16>
    %c2_40 = arith.constant 2 : index
    %c1_41 = arith.constant 1 : index
    %c0_42 = arith.constant 0 : index
    %c0_43 = arith.constant 0 : index
    %56 = vector.load %arg3[%c2_40, %c1_41, %c0_42, %c0_43] : memref<3x3x4x128xbf16, #tpu.memory_space<vmem>>, vector<1x1x4x128xbf16>
    %57 = vector.shape_cast %56 : vector<1x1x4x128xbf16> to vector<4x128xbf16>
    %cst_44 = arith.constant dense<0.000000e+00> : vector<256x128xf32>
    %58 = tpu.matmul %55, %57, %cst_44 {dimension_numbers = #tpu.dot_dimension_numbers<[1], [0], [0], [1], [0, 0, 1, 1], [], []>} : vector<256x4xbf16>, vector<4x128xbf16>, vector<256x128xf32> -> vector<256x128xf32>
    %59 = arith.addf %53, %58 : vector<256x128xf32>
    %60 = vector.extract_strided_slice %47 {offsets = [0, 2, 0], sizes = [16, 16, 4], strides = [1, 1, 1]} : vector<16x18x4xbf16> to vector<16x16x4xbf16>
    %61 = vector.shape_cast %60 : vector<16x16x4xbf16> to vector<256x4xbf16>
    %c2_45 = arith.constant 2 : index
    %c2_46 = arith.constant 2 : index
    %c0_47 = arith.constant 0 : index
    %c0_48 = arith.constant 0 : index
    %62 = vector.load %arg3[%c2_45, %c2_46, %c0_47, %c0_48] : memref<3x3x4x128xbf16, #tpu.memory_space<vmem>>, vector<1x1x4x128xbf16>
    %63 = vector.shape_cast %62 : vector<1x1x4x128xbf16> to vector<4x128xbf16>
    %cst_49 = arith.constant dense<0.000000e+00> : vector<256x128xf32>
    %64 = tpu.matmul %61, %63, %cst_49 {dimension_numbers = #tpu.dot_dimension_numbers<[1], [0], [0], [1], [0, 0, 1, 1], [], []>} : vector<256x4xbf16>, vector<4x128xbf16>, vector<256x128xf32> -> vector<256x128xf32>
    %65 = arith.addf %59, %64 : vector<256x128xf32>
    %66 = arith.truncf %65 : vector<256x128xf32> to vector<256x128xbf16>
    %c0_50 = arith.constant 0 : index
    %c0_51 = arith.constant 0 : index
    %c0_52 = arith.constant 0 : index
    %67 = vector.load %arg4[%c0_50, %c0_51, %c0_52] : memref<1x256x128xbf16, #tpu.memory_space<vmem>>, vector<1x256x128xbf16>
    %68 = vector.shape_cast %67 : vector<1x256x128xbf16> to vector<256x128xbf16>
    %69 = vector.shape_cast %66 : vector<256x128xbf16> to vector<1x256x128xbf16>
    tpu.vector_store %arg4[%c0_50, %c0_51, %c0_52], %69 {strides = array<i32>} : memref<1x256x128xbf16, #tpu.memory_space<vmem>>, vector<1x256x128xbf16>,
    %cst_53 = arith.constant dense<0.000000e+00> : vector<128xf32>
    %70 = vector.multi_reduction <add>, %65, %cst_53 [0] : vector<256x128xf32> to vector<128xf32>
    %71 = vector.shape_cast %70 : vector<128xf32> to vector<1x128xf32>
    %cst_54 = arith.constant 3.906250e-03 : f32
    %72 = vector.broadcast %cst_54 : f32 to vector<1x128xf32>
    %73 = arith.mulf %71, %72 : vector<1x128xf32>
    %74 = vector.broadcast %73 : vector<1x128xf32> to vector<256x128xf32>
    %75 = arith.subf %65, %74 : vector<256x128xf32>
    %76 = arith.mulf %75, %75 : vector<256x128xf32>
    %cst_55 = arith.constant dense<0.000000e+00> : vector<128xf32>
    %77 = vector.multi_reduction <add>, %76, %cst_55 [0] : vector<256x128xf32> to vector<128xf32>
    %78 = vector.shape_cast %77 : vector<128xf32> to vector<1x128xf32>
    %c0_56 = arith.constant 0 : index
    %c0_57 = arith.constant 0 : index
    %c0_58 = arith.constant 0 : index
    %79 = vector.load %arg5[%c0_56, %c0_57, %c0_58] : memref<1x2x128xf32, #tpu.memory_space<vmem>>, vector<1x1x128xf32>
    %80 = vector.shape_cast %79 : vector<1x1x128xf32> to vector<1x128xf32>
    %81 = vector.shape_cast %71 : vector<1x128xf32> to vector<1x1x128xf32>
    tpu.vector_store %arg5[%c0_56, %c0_57, %c0_58], %81 {strides = array<i32>} : memref<1x2x128xf32, #tpu.memory_space<vmem>>, vector<1x1x128xf32>,
    %c0_59 = arith.constant 0 : index
    %c1_60 = arith.constant 1 : index
    %c0_61 = arith.constant 0 : index
    %82 = vector.load %arg5[%c0_59, %c1_60, %c0_61] : memref<1x2x128xf32, #tpu.memory_space<vmem>>, vector<1x1x128xf32>
    %83 = vector.shape_cast %82 : vector<1x1x128xf32> to vector<1x128xf32>
    %84 = vector.shape_cast %78 : vector<1x128xf32> to vector<1x1x128xf32>
    tpu.vector_store %arg5[%c0_59, %c1_60, %c0_61], %84 {strides = array<i32>} : memref<1x2x128xf32, #tpu.memory_space<vmem>>, vector<1x1x128xf32>,
    return
  }
  func.func @transform_0(%arg0: i32, %arg1: i32) -> (i32, i32, i32, i32) {
    %c0_i32 = arith.constant 0 : i32
    %c0_i32_0 = arith.constant 0 : i32
    %c0_i32_1 = arith.constant 0 : i32
    %c0_i32_2 = arith.constant 0 : i32
    return %arg0, %c0_i32, %c0_i32_0, %c0_i32_1 : i32, i32, i32, i32
  }
  func.func @transform_1(%arg0: i32, %arg1: i32) -> (i32, i32, i32, i32) {
    %c0_i32 = arith.constant 0 : i32
    %c0_i32_0 = arith.constant 0 : i32
    %c0_i32_1 = arith.constant 0 : i32
    %c0_i32_2 = arith.constant 0 : i32
    %c0_i32_3 = arith.constant 0 : i32
    return %c0_i32, %c0_i32_0, %c0_i32_1, %c0_i32_2 : i32, i32, i32, i32
  }
  func.func @transform_2(%arg0: i32, %arg1: i32) -> (i32, i32, i32) {
    %c1_i32 = arith.constant 1 : i32
    %0 = arith.muli %arg0, %c1_i32 : i32
    %1 = arith.addi %0, %arg1 : i32
    %c0_i32 = arith.constant 0 : i32
    %c0_i32_0 = arith.constant 0 : i32
    %c0_i32_1 = arith.constant 0 : i32
    return %1, %c0_i32, %c0_i32_0 : i32, i32, i32
  }
  func.func @transform_3(%arg0: i32, %arg1: i32) -> (i32, i32, i32) {
    %c1_i32 = arith.constant 1 : i32
    %0 = arith.muli %arg0, %c1_i32 : i32
    %1 = arith.addi %0, %arg1 : i32
    %c0_i32 = arith.constant 0 : i32
    %c0_i32_0 = arith.constant 0 : i32
    %c0_i32_1 = arith.constant 0 : i32
    return %1, %c0_i32, %c0_i32_0 : i32, i32, i32
  }
}

module attributes {stable_mosaic.version = 11 : i64} {
  func.func @_bn_relu_kernel(%arg0: i32, %arg1: memref<512x128xbf16, #tpu.memory_space<vmem>>, %arg2: memref<1x128xf32, #tpu.memory_space<vmem>>, %arg3: memref<1x128xf32, #tpu.memory_space<vmem>>, %arg4: memref<512x128xf32, #tpu.memory_space<vmem>>) attributes {dimension_semantics = [#tpu.dimension_semantics<parallel>], iteration_bounds = array<i64: 1>, scalar_prefetch = 0 : i64, scratch_operands = 0 : i64, tpu.core_type = #tpu.core_type<tc>, window_params = [{transform_indices = @transform_0, window_bounds = array<i64: 512, 128>}, {pipeline_mode = #tpu.pipeline_mode<synchronous>, transform_indices = @transform_1, window_bounds = array<i64: 1, 128>}, {pipeline_mode = #tpu.pipeline_mode<synchronous>, transform_indices = @transform_2, window_bounds = array<i64: 1, 128>}, {transform_indices = @transform_3, window_bounds = array<i64: 512, 128>}]} {
    %c0 = arith.constant 0 : index
    %c0_0 = arith.constant 0 : index
    %0 = vector.load %arg1[%c0, %c0_0] : memref<512x128xbf16, #tpu.memory_space<vmem>>, vector<512x128xbf16>
    %1 = arith.extf %0 : vector<512x128xbf16> to vector<512x128xf32>
    %c0_1 = arith.constant 0 : index
    %c0_2 = arith.constant 0 : index
    %2 = vector.load %arg2[%c0_1, %c0_2] : memref<1x128xf32, #tpu.memory_space<vmem>>, vector<1x128xf32>
    %3 = vector.broadcast %2 : vector<1x128xf32> to vector<512x128xf32>
    %4 = arith.mulf %1, %3 : vector<512x128xf32>
    %c0_3 = arith.constant 0 : index
    %c0_4 = arith.constant 0 : index
    %5 = vector.load %arg3[%c0_3, %c0_4] : memref<1x128xf32, #tpu.memory_space<vmem>>, vector<1x128xf32>
    %6 = vector.broadcast %5 : vector<1x128xf32> to vector<512x128xf32>
    %7 = arith.addf %4, %6 : vector<512x128xf32>
    %cst = arith.constant 0.000000e+00 : f32
    %8 = vector.broadcast %cst : f32 to vector<512x128xf32>
    %9 = arith.maximumf %7, %8 : vector<512x128xf32>
    %c0_5 = arith.constant 0 : index
    %c0_6 = arith.constant 0 : index
    %10 = vector.load %arg4[%c0_5, %c0_6] : memref<512x128xf32, #tpu.memory_space<vmem>>, vector<512x128xf32>
    tpu.vector_store %arg4[%c0_5, %c0_6], %9 {strides = array<i32>} : memref<512x128xf32, #tpu.memory_space<vmem>>, vector<512x128xf32>,
    return
  }
  func.func @transform_0(%arg0: i32) -> (i32, i32) {
    %c0_i32 = arith.constant 0 : i32
    %c0_i32_0 = arith.constant 0 : i32
    return %arg0, %c0_i32 : i32, i32
  }
  func.func @transform_1(%arg0: i32) -> (i32, i32) {
    %c0_i32 = arith.constant 0 : i32
    %c0_i32_0 = arith.constant 0 : i32
    %c0_i32_1 = arith.constant 0 : i32
    return %c0_i32, %c0_i32_0 : i32, i32
  }
  func.func @transform_2(%arg0: i32) -> (i32, i32) {
    %c0_i32 = arith.constant 0 : i32
    %c0_i32_0 = arith.constant 0 : i32
    %c0_i32_1 = arith.constant 0 : i32
    return %c0_i32, %c0_i32_0 : i32, i32
  }
  func.func @transform_3(%arg0: i32) -> (i32, i32) {
    %c0_i32 = arith.constant 0 : i32
    %c0_i32_0 = arith.constant 0 : i32
    return %arg0, %c0_i32 : i32, i32
  }
}

</mosaic_0001>

<bundles_post_ra>
// kernel: single_conv_r2u_forward.3
= control target key start
LH: loop header
LB: loop body
LE: loop exit
PB: predicated region body
PF: predicated region fallthrough
CT: control target
= control target key end

     0   :  { %s1023_s0 = inlined_call_operand.vmem [shape: bf16[512,128], index: 0, kind: input, shape index: {}]   ;;  %s1024_s1 = inlined_call_operand.vmem [shape: f32[1,128], index: 1, kind: input, shape index: {}]   ;;  %s1025_s2 = inlined_call_operand.vmem [shape: f32[1,128], index: 2, kind: input, shape index: {}]   ;;  %s1026_s3 = inlined_call_operand.vmem [shape: f32[512,128], index: 3, kind: output, shape index: {}]  }
   0x1   :  { %v419_v0 = vld [vmem:[%s1023_s0] sm:$0xff]   ;;  %v546_v4 = vld [vmem:[%s1023_s0 + $0x8] sm:$0xff]   ;;  %v547_v5 = vld [vmem:[%s1023_s0 + $0x10] sm:$0xff]  }
   0x2   :  { %v603_v1 = vld [vmem:[%s1024_s1] ss:$0 sm:$0xff]  ;;  %v420_v2 = vunpack.c.l.bf16 %v419_v0  ;;  %v421_v3 = vunpack.c.h.bf16 %v419_v0  ;;  %v548_v6 = vld [vmem:[%s1023_s0 + $0x18] sm:$0xff]   ;;  %v424_v8 = vunpack.c.l.bf16 %v546_v4  ;;  %v425_v9 = vunpack.c.h.bf16 %v546_v4  ;;  %v550_v33 = vld [vmem:[%s1023_s0 + $0x28] sm:$0xff]  }
   0x3   :  { %v617_v7 = vld [vmem:[%s1025_s2] ss:$0 sm:$0xff]  ;;  %v428_v10 = vunpack.c.l.bf16 %v547_v5  ;;  %v429_v11 = vunpack.c.h.bf16 %v547_v5  ;;  %v432_v14 = vunpack.c.l.bf16 %v548_v6  ;;  %v433_v15 = vunpack.c.h.bf16 %v548_v6  ;;  %v551_v34 = vld [vmem:[%s1023_s0 + $0x30] sm:$0xff]   ;;  %v552_v39 = vld [vmem:[%s1023_s0 + $0x38] sm:$0xff]  }
   0x4   :  { %v149_v12 = vmul.f32 %v420_v2, %v603_v1  ;;  %v150_v13 = vmul.f32 %v421_v3, %v603_v1  ;;  %v151_v16 = vmul.f32 %v424_v8, %v603_v1  ;;  %v152_v17 = vmul.f32 %v425_v9, %v603_v1  ;;  %v549_v28 = vld [vmem:[%s1023_s0 + $0x20] sm:$0xff]   ;;  %v554_v6 = vld [vmem:[%s1023_s0 + $0x48] sm:$0xff]   ;;  %v555_v8 = vld [vmem:[%s1023_s0 + $0x50] sm:$0xff]  }
   0x5   :  { %v153_v18 = vmul.f32 %v428_v10, %v603_v1  ;;  %v154_v19 = vmul.f32 %v429_v11, %v603_v1  ;;  %v155_v22 = vmul.f32 %v432_v14, %v603_v1  ;;  %v156_v23 = vmul.f32 %v433_v15, %v603_v1  ;;  %v553_v0 = vld [vmem:[%s1023_s0 + $0x40] sm:$0xff]  }
   0x6   :  { %v220_v20 = vadd.f32 %v617_v7, %v149_v12  ;;  %v221_v21 = vadd.f32 %v617_v7, %v150_v13  ;;  %v222_v24 = vadd.f32 %v617_v7, %v151_v16  ;;  %v223_v25 = vadd.f32 %v617_v7, %v152_v17  ;;  %v556_v13 = vld [vmem:[%s1023_s0 + $0x58] sm:$0xff]  }
   0x7   :  { %v224_v26 = vadd.f32 %v617_v7, %v153_v18  ;;  %v225_v27 = vadd.f32 %v617_v7, %v154_v19  ;;  %v226_v31 = vadd.f32 %v617_v7, %v155_v22  ;;  %v227_v32 = vadd.f32 %v617_v7, %v156_v23 }
   0x8   :  { %v284_v29 = vmax.f32 %v220_v20, 0.0  ;;  %v285_v30 = vmax.f32 %v221_v21, 0.0  ;;  %v286_v35 = vmax.f32 %v222_v24, 0.0  ;;  %v287_v36 = vmax.f32 %v223_v25, 0.0 }
   0x9   :  { %v288_v37 = vmax.f32 %v224_v26, 0.0  ;;  %v289_v38 = vmax.f32 %v225_v27, 0.0  ;;  %v290_v40 = vmax.f32 %v226_v31, 0.0  ;;  %v291_v41 = vmax.f32 %v227_v32, 0.0 }
   0xa   :  { %348 = vst [vmem:[%s1026_s3] sm:$0xff] %v284_v29  ;;  %349 = vst [vmem:[%s1026_s3 + $0x8] sm:$0xff] %v285_v30  ;;  %v436_v42 = vunpack.c.l.bf16 %v549_v28  ;;  %v437_v43 = vunpack.c.h.bf16 %v549_v28  ;;  %v440_v44 = vunpack.c.l.bf16 %v550_v33  ;;  %v441_v45 = vunpack.c.h.bf16 %v550_v33 }
   0xb   :  { %350 = vst [vmem:[%s1026_s3 + $0x10] sm:$0xff] %v286_v35  ;;  %351 = vst [vmem:[%s1026_s3 + $0x18] sm:$0xff] %v287_v36  ;;  %v444_v46 = vunpack.c.l.bf16 %v551_v34  ;;  %v445_v47 = vunpack.c.h.bf16 %v551_v34  ;;  %v448_v50 = vunpack.c.l.bf16 %v552_v39  ;;  %v449_v51 = vunpack.c.h.bf16 %v552_v39 }
   0xc   :  { %352 = vst [vmem:[%s1026_s3 + $0x20] sm:$0xff] %v288_v37  ;;  %353 = vst [vmem:[%s1026_s3 + $0x28] sm:$0xff] %v289_v38  ;;  %v157_v48 = vmul.f32 %v436_v42, %v603_v1  ;;  %v158_v49 = vmul.f32 %v437_v43, %v603_v1  ;;  %v159_v52 = vmul.f32 %v440_v44, %v603_v1  ;;  %v452_v16 = vunpack.c.l.bf16 %v553_v0  ;;  %v557_v38 = vld [vmem:[%s1023_s0 + $0x60] sm:$0xff]   ;;  %v558_v43 = vld [vmem:[%s1023_s0 + $0x68] sm:$0xff]  }
   0xd   :  { %354 = vst [vmem:[%s1026_s3 + $0x30] sm:$0xff] %v290_v40  ;;  %355 = vst [vmem:[%s1026_s3 + $0x38] sm:$0xff] %v291_v41  ;;  %v160_v53 = vmul.f32 %v441_v45, %v603_v1  ;;  %v161_v54 = vmul.f32 %v444_v46, %v603_v1  ;;  %v162_v55 = vmul.f32 %v445_v47, %v603_v1  ;;  %v453_v17 = vunpack.c.h.bf16 %v553_v0  ;;  %v559_v44 = vld [vmem:[%s1023_s0 + $0x70] sm:$0xff]  }
   0xe   :  { %v228_v56 = vadd.f32 %v617_v7, %v157_v48  ;;  %v229_v57 = vadd.f32 %v617_v7, %v158_v49  ;;  %v163_v58 = vmul.f32 %v448_v50, %v603_v1  ;;  %v164_v59 = vmul.f32 %v449_v51, %v603_v1  ;;  %v560_v49 = vld [vmem:[%s1023_s0 + $0x78] sm:$0xff]  }
   0xf   :  { %v230_v60 = vadd.f32 %v617_v7, %v159_v52  ;;  %v231_v61 = vadd.f32 %v617_v7, %v160_v53  ;;  %v232_v62 = vadd.f32 %v617_v7, %v161_v54  ;;  %v233_v63 = vadd.f32 %v617_v7, %v162_v55 }
  0x10   :  { %v292_v2 = vmax.f32 %v228_v56, 0.0  ;;  %v293_v3 = vmax.f32 %v229_v57, 0.0  ;;  %v234_v4 = vadd.f32 %v617_v7, %v163_v58  ;;  %v235_v5 = vadd.f32 %v617_v7, %v164_v59 }
  0x11   :  { %v294_v9 = vmax.f32 %v230_v60, 0.0  ;;  %v295_v10 = vmax.f32 %v231_v61, 0.0  ;;  %v296_v11 = vmax.f32 %v232_v62, 0.0  ;;  %v297_v12 = vmax.f32 %v233_v63, 0.0 }
  0x12   :  { %356 = vst [vmem:[%s1026_s3 + $0x40] sm:$0xff] %v292_v2  ;;  %357 = vst [vmem:[%s1026_s3 + $0x48] sm:$0xff] %v293_v3  ;;  %v298_v14 = vmax.f32 %v234_v4, 0.0  ;;  %v299_v15 = vmax.f32 %v235_v5, 0.0  ;;  %v456_v18 = vunpack.c.l.bf16 %v554_v6  ;;  %v457_v19 = vunpack.c.h.bf16 %v554_v6 }
  0x13   :  { %358 = vst [vmem:[%s1026_s3 + $0x50] sm:$0xff] %v294_v9  ;;  %359 = vst [vmem:[%s1026_s3 + $0x58] sm:$0xff] %v295_v10  ;;  %v460_v20 = vunpack.c.l.bf16 %v555_v8  ;;  %v461_v21 = vunpack.c.h.bf16 %v555_v8  ;;  %v165_v22 = vmul.f32 %v452_v16, %v603_v1  ;;  %v166_v23 = vmul.f32 %v453_v17, %v603_v1  ;;  %v562_v17 = vld [vmem:[%s1023_s0 + $0x88] sm:$0xff]  }
  0x14   :  { %360 = vst [vmem:[%s1026_s3 + $0x60] sm:$0xff] %v296_v11  ;;  %361 = vst [vmem:[%s1026_s3 + $0x68] sm:$0xff] %v297_v12  ;;  %v464_v24 = vunpack.c.l.bf16 %v556_v13  ;;  %v465_v25 = vunpack.c.h.bf16 %v556_v13  ;;  %v167_v26 = vmul.f32 %v456_v18, %v603_v1  ;;  %v168_v27 = vmul.f32 %v457_v19, %v603_v1  ;;  %v561_v12 = vld [vmem:[%s1023_s0 + $0x80] sm:$0xff]   ;;  %v563_v18 = vld [vmem:[%s1023_s0 + $0x90] sm:$0xff]  }
  0x15   :  { %362 = vst [vmem:[%s1026_s3 + $0x70] sm:$0xff] %v298_v14  ;;  %363 = vst [vmem:[%s1026_s3 + $0x78] sm:$0xff] %v299_v15  ;;  %v169_v28 = vmul.f32 %v460_v20, %v603_v1  ;;  %v170_v29 = vmul.f32 %v461_v21, %v603_v1  ;;  %v236_v30 = vadd.f32 %v617_v7, %v165_v22  ;;  %v468_v52 = vunpack.c.l.bf16 %v557_v38 }
  0x16   :  { %v237_v31 = vadd.f32 %v617_v7, %v166_v23  ;;  %v171_v32 = vmul.f32 %v464_v24, %v603_v1  ;;  %v172_v33 = vmul.f32 %v465_v25, %v603_v1  ;;  %v238_v34 = vadd.f32 %v617_v7, %v167_v26  ;;  %v564_v23 = vld [vmem:[%s1023_s0 + $0x98] sm:$0xff]  }
  0x17   :  { %v239_v35 = vadd.f32 %v617_v7, %v168_v27  ;;  %v240_v36 = vadd.f32 %v617_v7, %v169_v28  ;;  %v241_v37 = vadd.f32 %v617_v7, %v170_v29  ;;  %v300_v39 = vmax.f32 %v236_v30, 0.0 }
  0x18   :  { %v301_v40 = vmax.f32 %v237_v31, 0.0  ;;  %v242_v41 = vadd.f32 %v617_v7, %v171_v32  ;;  %v243_v42 = vadd.f32 %v617_v7, %v172_v33  ;;  %v302_v45 = vmax.f32 %v238_v34, 0.0 }
  0x19   :  { %v303_v46 = vmax.f32 %v239_v35, 0.0  ;;  %v304_v47 = vmax.f32 %v240_v36, 0.0  ;;  %v305_v48 = vmax.f32 %v241_v37, 0.0  ;;  %364 = vst [vmem:[%s1026_s3 + $0x80] sm:$0xff] %v300_v39  ;;  %v469_v53 = vunpack.c.h.bf16 %v557_v38 }
  0x1a   :  { %365 = vst [vmem:[%s1026_s3 + $0x88] sm:$0xff] %v301_v40  ;;  %v306_v50 = vmax.f32 %v242_v41, 0.0  ;;  %v307_v51 = vmax.f32 %v243_v42, 0.0  ;;  %366 = vst [vmem:[%s1026_s3 + $0x90] sm:$0xff] %v302_v45  ;;  %v472_v54 = vunpack.c.l.bf16 %v558_v43  ;;  %v473_v55 = vunpack.c.h.bf16 %v558_v43 }
  0x1b   :  { %367 = vst [vmem:[%s1026_s3 + $0x98] sm:$0xff] %v303_v46  ;;  %368 = vst [vmem:[%s1026_s3 + $0xa0] sm:$0xff] %v304_v47  ;;  %v476_v56 = vunpack.c.l.bf16 %v559_v44  ;;  %v477_v57 = vunpack.c.h.bf16 %v559_v44  ;;  %v173_v58 = vmul.f32 %v468_v52, %v603_v1  ;;  %v174_v59 = vmul.f32 %v469_v53, %v603_v1  ;;  %v566_v53 = vld [vmem:[%s1023_s0 + $0xa8] sm:$0xff]  }
  0x1c   :  { %369 = vst [vmem:[%s1026_s3 + $0xa8] sm:$0xff] %v305_v48  ;;  %370 = vst [vmem:[%s1026_s3 + $0xb0] sm:$0xff] %v306_v50  ;;  %v480_v60 = vunpack.c.l.bf16 %v560_v49  ;;  %v481_v61 = vunpack.c.h.bf16 %v560_v49  ;;  %v175_v62 = vmul.f32 %v472_v54, %v603_v1  ;;  %v176_v63 = vmul.f32 %v473_v55, %v603_v1  ;;  %v565_v48 = vld [vmem:[%s1023_s0 + $0xa0] sm:$0xff]   ;;  %v567_v54 = vld [vmem:[%s1023_s0 + $0xb0] sm:$0xff]  }
  0x1d   :  { %371 = vst [vmem:[%s1026_s3 + $0xb8] sm:$0xff] %v307_v51  ;;  %v177_v0 = vmul.f32 %v476_v56, %v603_v1  ;;  %v178_v2 = vmul.f32 %v477_v57, %v603_v1  ;;  %v244_v3 = vadd.f32 %v617_v7, %v173_v58  ;;  %v245_v4 = vadd.f32 %v617_v7, %v174_v59  ;;  %v568_v59 = vld [vmem:[%s1023_s0 + $0xb8] sm:$0xff]  }
  0x1e   :  { %v179_v5 = vmul.f32 %v480_v60, %v603_v1  ;;  %v180_v6 = vmul.f32 %v481_v61, %v603_v1  ;;  %v246_v8 = vadd.f32 %v617_v7, %v175_v62  ;;  %v247_v9 = vadd.f32 %v617_v7, %v176_v63 }
  0x1f   :  { %v248_v10 = vadd.f32 %v617_v7, %v177_v0  ;;  %v249_v11 = vadd.f32 %v617_v7, %v178_v2  ;;  %v308_v13 = vmax.f32 %v244_v3, 0.0  ;;  %v309_v14 = vmax.f32 %v245_v4, 0.0 }
  0x20   :  { %v250_v15 = vadd.f32 %v617_v7, %v179_v5  ;;  %v251_v16 = vadd.f32 %v617_v7, %v180_v6  ;;  %v310_v19 = vmax.f32 %v246_v8, 0.0  ;;  %v311_v20 = vmax.f32 %v247_v9, 0.0 }
  0x21   :  { %v312_v21 = vmax.f32 %v248_v10, 0.0  ;;  %v313_v22 = vmax.f32 %v249_v11, 0.0  ;;  %372 = vst [vmem:[%s1026_s3 + $0xc0] sm:$0xff] %v308_v13  ;;  %373 = vst [vmem:[%s1026_s3 + $0xc8] sm:$0xff] %v309_v14  ;;  %v484_v26 = vunpack.c.l.bf16 %v561_v12  ;;  %v485_v27 = vunpack.c.h.bf16 %v561_v12 }
  0x22   :  { %v314_v24 = vmax.f32 %v250_v15, 0.0  ;;  %v315_v25 = vmax.f32 %v251_v16, 0.0  ;;  %374 = vst [vmem:[%s1026_s3 + $0xd0] sm:$0xff] %v310_v19  ;;  %375 = vst [vmem:[%s1026_s3 + $0xd8] sm:$0xff] %v311_v20  ;;  %v488_v28 = vunpack.c.l.bf16 %v562_v17  ;;  %v489_v29 = vunpack.c.h.bf16 %v562_v17 }
  0x23   :  { %376 = vst [vmem:[%s1026_s3 + $0xe0] sm:$0xff] %v312_v21  ;;  %377 = vst [vmem:[%s1026_s3 + $0xe8] sm:$0xff] %v313_v22  ;;  %v492_v30 = vunpack.c.l.bf16 %v563_v18  ;;  %v493_v31 = vunpack.c.h.bf16 %v563_v18  ;;  %v181_v32 = vmul.f32 %v484_v26, %v603_v1  ;;  %v182_v33 = vmul.f32 %v485_v27, %v603_v1  ;;  %v569_v22 = vld [vmem:[%s1023_s0 + $0xc0] sm:$0xff]   ;;  %v570_v27 = vld [vmem:[%s1023_s0 + $0xc8] sm:$0xff]  }
  0x24   :  { %378 = vst [vmem:[%s1026_s3 + $0xf0] sm:$0xff] %v314_v24  ;;  %379 = vst [vmem:[%s1026_s3 + $0xf8] sm:$0xff] %v315_v25  ;;  %v496_v34 = vunpack.c.l.bf16 %v564_v23  ;;  %v497_v35 = vunpack.c.h.bf16 %v564_v23  ;;  %v183_v36 = vmul.f32 %v488_v28, %v603_v1  ;;  %v184_v37 = vmul.f32 %v489_v29, %v603_v1  ;;  %v571_v28 = vld [vmem:[%s1023_s0 + $0xd0] sm:$0xff]  }
  0x25   :  { %v185_v38 = vmul.f32 %v492_v30, %v603_v1  ;;  %v186_v39 = vmul.f32 %v493_v31, %v603_v1  ;;  %v252_v40 = vadd.f32 %v617_v7, %v181_v32  ;;  %v253_v41 = vadd.f32 %v617_v7, %v182_v33  ;;  %v572_v33 = vld [vmem:[%s1023_s0 + $0xd8] sm:$0xff]  }
  0x26   :  { %v187_v42 = vmul.f32 %v496_v34, %v603_v1  ;;  %v188_v43 = vmul.f32 %v497_v35, %v603_v1  ;;  %v254_v44 = vadd.f32 %v617_v7, %v183_v36  ;;  %v255_v45 = vadd.f32 %v617_v7, %v184_v37 }
  0x27   :  { %v256_v46 = vadd.f32 %v617_v7, %v185_v38  ;;  %v257_v47 = vadd.f32 %v617_v7, %v186_v39  ;;  %v316_v49 = vmax.f32 %v252_v40, 0.0  ;;  %v317_v50 = vmax.f32 %v253_v41, 0.0 }
  0x28   :  { %v258_v51 = vadd.f32 %v617_v7, %v187_v42  ;;  %v259_v52 = vadd.f32 %v617_v7, %v188_v43  ;;  %v318_v55 = vmax.f32 %v254_v44, 0.0  ;;  %v319_v56 = vmax.f32 %v255_v45, 0.0 }
  0x29   :  { %v320_v57 = vmax.f32 %v256_v46, 0.0  ;;  %v321_v58 = vmax.f32 %v257_v47, 0.0  ;;  %380 = vst [vmem:[%s1026_s3 + $0x100] sm:$0xff] %v316_v49  ;;  %381 = vst [vmem:[%s1026_s3 + $0x108] sm:$0xff] %v317_v50  ;;  %v500_v62 = vunpack.c.l.bf16 %v565_v48  ;;  %v501_v63 = vunpack.c.h.bf16 %v565_v48 }
  0x2a   :  { %v322_v60 = vmax.f32 %v258_v51, 0.0  ;;  %v323_v61 = vmax.f32 %v259_v52, 0.0  ;;  %382 = vst [vmem:[%s1026_s3 + $0x110] sm:$0xff] %v318_v55  ;;  %383 = vst [vmem:[%s1026_s3 + $0x118] sm:$0xff] %v319_v56  ;;  %v504_v0 = vunpack.c.l.bf16 %v566_v53  ;;  %v505_v2 = vunpack.c.h.bf16 %v566_v53 }
  0x2b   :  { %384 = vst [vmem:[%s1026_s3 + $0x120] sm:$0xff] %v320_v57  ;;  %385 = vst [vmem:[%s1026_s3 + $0x128] sm:$0xff] %v321_v58  ;;  %v508_v3 = vunpack.c.l.bf16 %v567_v54  ;;  %v509_v4 = vunpack.c.h.bf16 %v567_v54  ;;  %v189_v5 = vmul.f32 %v500_v62, %v603_v1  ;;  %v190_v6 = vmul.f32 %v501_v63, %v603_v1  ;;  %v573_v58 = vld [vmem:[%s1023_s0 + $0xe0] sm:$0xff]   ;;  %v574_v63 = vld [vmem:[%s1023_s0 + $0xe8] sm:$0xff]  }
  0x2c   :  { %386 = vst [vmem:[%s1026_s3 + $0x130] sm:$0xff] %v322_v60  ;;  %387 = vst [vmem:[%s1026_s3 + $0x138] sm:$0xff] %v323_v61  ;;  %v512_v8 = vunpack.c.l.bf16 %v568_v59  ;;  %v513_v9 = vunpack.c.h.bf16 %v568_v59  ;;  %v191_v10 = vmul.f32 %v504_v0, %v603_v1  ;;  %v192_v11 = vmul.f32 %v505_v2, %v603_v1  ;;  %v575_v0 = vld [vmem:[%s1023_s0 + $0xf0] sm:$0xff]  }
  0x2d   :  { %v193_v12 = vmul.f32 %v508_v3, %v603_v1  ;;  %v194_v13 = vmul.f32 %v509_v4, %v603_v1  ;;  %v260_v14 = vadd.f32 %v617_v7, %v189_v5  ;;  %v261_v15 = vadd.f32 %v617_v7, %v190_v6  ;;  %v576_v6 = vld [vmem:[%s1023_s0 + $0xf8] sm:$0xff]  }
  0x2e   :  { %v195_v16 = vmul.f32 %v512_v8, %v603_v1  ;;  %v196_v17 = vmul.f32 %v513_v9, %v603_v1  ;;  %v262_v18 = vadd.f32 %v617_v7, %v191_v10  ;;  %v263_v19 = vadd.f32 %v617_v7, %v192_v11 }
  0x2f   :  { %v264_v20 = vadd.f32 %v617_v7, %v193_v12  ;;  %v265_v21 = vadd.f32 %v617_v7, %v194_v13  ;;  %v324_v23 = vmax.f32 %v260_v14, 0.0  ;;  %v325_v24 = vmax.f32 %v261_v15, 0.0 }
  0x30   :  { %v266_v25 = vadd.f32 %v617_v7, %v195_v16  ;;  %v267_v26 = vadd.f32 %v617_v7, %v196_v17  ;;  %v326_v29 = vmax.f32 %v262_v18, 0.0  ;;  %v327_v30 = vmax.f32 %v263_v19, 0.0 }
  0x31   :  { %v328_v31 = vmax.f32 %v264_v20, 0.0  ;;  %v329_v32 = vmax.f32 %v265_v21, 0.0  ;;  %388 = vst [vmem:[%s1026_s3 + $0x140] sm:$0xff] %v324_v23  ;;  %389 = vst [vmem:[%s1026_s3 + $0x148] sm:$0xff] %v325_v24  ;;  %v516_v36 = vunpack.c.l.bf16 %v569_v22  ;;  %v517_v37 = vunpack.c.h.bf16 %v569_v22 }
  0x32   :  { %v330_v34 = vmax.f32 %v266_v25, 0.0  ;;  %v331_v35 = vmax.f32 %v267_v26, 0.0  ;;  %390 = vst [vmem:[%s1026_s3 + $0x150] sm:$0xff] %v326_v29  ;;  %391 = vst [vmem:[%s1026_s3 + $0x158] sm:$0xff] %v327_v30  ;;  %v520_v38 = vunpack.c.l.bf16 %v570_v27  ;;  %v521_v39 = vunpack.c.h.bf16 %v570_v27 }
  0x33   :  { %392 = vst [vmem:[%s1026_s3 + $0x160] sm:$0xff] %v328_v31  ;;  %393 = vst [vmem:[%s1026_s3 + $0x168] sm:$0xff] %v329_v32  ;;  %v524_v40 = vunpack.c.l.bf16 %v571_v28  ;;  %v525_v41 = vunpack.c.h.bf16 %v571_v28  ;;  %v197_v42 = vmul.f32 %v516_v36, %v603_v1  ;;  %v198_v43 = vmul.f32 %v517_v37, %v603_v1 }
  0x34   :  { %394 = vst [vmem:[%s1026_s3 + $0x170] sm:$0xff] %v330_v34  ;;  %395 = vst [vmem:[%s1026_s3 + $0x178] sm:$0xff] %v331_v35  ;;  %v528_v44 = vunpack.c.l.bf16 %v572_v33  ;;  %v529_v45 = vunpack.c.h.bf16 %v572_v33  ;;  %v199_v46 = vmul.f32 %v520_v38, %v603_v1  ;;  %v200_v47 = vmul.f32 %v521_v39, %v603_v1 }
  0x35   :  { %v201_v48 = vmul.f32 %v524_v40, %v603_v1  ;;  %v202_v49 = vmul.f32 %v525_v41, %v603_v1  ;;  %v268_v50 = vadd.f32 %v617_v7, %v197_v42  ;;  %v269_v51 = vadd.f32 %v617_v7, %v198_v43 }
  0x36   :  { %v203_v52 = vmul.f32 %v528_v44, %v603_v1  ;;  %v204_v53 = vmul.f32 %v529_v45, %v603_v1  ;;  %v270_v54 = vadd.f32 %v617_v7, %v199_v46  ;;  %v271_v55 = vadd.f32 %v617_v7, %v200_v47 }
  0x37   :  { %v272_v56 = vadd.f32 %v617_v7, %v201_v48  ;;  %v273_v57 = vadd.f32 %v617_v7, %v202_v49  ;;  %v332_v59 = vmax.f32 %v268_v50, 0.0  ;;  %v333_v60 = vmax.f32 %v269_v51, 0.0 }
  0x38   :  { %v274_v61 = vadd.f32 %v617_v7, %v203_v52  ;;  %v275_v62 = vadd.f32 %v617_v7, %v204_v53  ;;  %v334_v2 = vmax.f32 %v270_v54, 0.0  ;;  %v335_v3 = vmax.f32 %v271_v55, 0.0 }
  0x39   :  { %v336_v4 = vmax.f32 %v272_v56, 0.0  ;;  %v337_v5 = vmax.f32 %v273_v57, 0.0  ;;  %396 = vst [vmem:[%s1026_s3 + $0x180] sm:$0xff] %v332_v59  ;;  %397 = vst [vmem:[%s1026_s3 + $0x188] sm:$0xff] %v333_v60  ;;  %v532_v10 = vunpack.c.l.bf16 %v573_v58  ;;  %v533_v11 = vunpack.c.h.bf16 %v573_v58 }
  0x3a   :  { %v338_v8 = vmax.f32 %v274_v61, 0.0  ;;  %v339_v9 = vmax.f32 %v275_v62, 0.0  ;;  %398 = vst [vmem:[%s1026_s3 + $0x190] sm:$0xff] %v334_v2  ;;  %399 = vst [vmem:[%s1026_s3 + $0x198] sm:$0xff] %v335_v3  ;;  %v536_v12 = vunpack.c.l.bf16 %v574_v63  ;;  %v537_v13 = vunpack.c.h.bf16 %v574_v63 }
  0x3b   :  { %400 = vst [vmem:[%s1026_s3 + $0x1a0] sm:$0xff] %v336_v4  ;;  %401 = vst [vmem:[%s1026_s3 + $0x1a8] sm:$0xff] %v337_v5  ;;  %v540_v14 = vunpack.c.l.bf16 %v575_v0  ;;  %v541_v15 = vunpack.c.h.bf16 %v575_v0  ;;  %v205_v16 = vmul.f32 %v532_v10, %v603_v1  ;;  %v206_v17 = vmul.f32 %v533_v11, %v603_v1 }
  0x3c   :  { %402 = vst [vmem:[%s1026_s3 + $0x1b0] sm:$0xff] %v338_v8  ;;  %403 = vst [vmem:[%s1026_s3 + $0x1b8] sm:$0xff] %v339_v9  ;;  %v544_v18 = vunpack.c.l.bf16 %v576_v6  ;;  %v545_v19 = vunpack.c.h.bf16 %v576_v6  ;;  %v207_v20 = vmul.f32 %v536_v12, %v603_v1  ;;  %v208_v21 = vmul.f32 %v537_v13, %v603_v1 }
  0x3d   :  { %v209_v22 = vmul.f32 %v540_v14, %v603_v1  ;;  %v210_v23 = vmul.f32 %v541_v15, %v603_v1  ;;  %v276_v24 = vadd.f32 %v617_v7, %v205_v16  ;;  %v277_v25 = vadd.f32 %v617_v7, %v206_v17 }
  0x3e   :  { %v211_v26 = vmul.f32 %v544_v18, %v603_v1  ;;  %v212_v27 = vmul.f32 %v545_v19, %v603_v1  ;;  %v278_v28 = vadd.f32 %v617_v7, %v207_v20  ;;  %v279_v29 = vadd.f32 %v617_v7, %v208_v21 }
  0x3f   :  { %v280_v30 = vadd.f32 %v617_v7, %v209_v22  ;;  %v281_v31 = vadd.f32 %v617_v7, %v210_v23  ;;  %v340_v32 = vmax.f32 %v276_v24, 0.0  ;;  %v341_v33 = vmax.f32 %v277_v25, 0.0 }
  0x40   :  { %v282_v34 = vadd.f32 %v617_v7, %v211_v26  ;;  %v283_v35 = vadd.f32 %v617_v7, %v212_v27  ;;  %v342_v36 = vmax.f32 %v278_v28, 0.0  ;;  %v343_v37 = vmax.f32 %v279_v29, 0.0 }
  0x41   :  { %v344_v38 = vmax.f32 %v280_v30, 0.0  ;;  %v345_v39 = vmax.f32 %v281_v31, 0.0  ;;  %404 = vst [vmem:[%s1026_s3 + $0x1c0] sm:$0xff] %v340_v32  ;;  %405 = vst [vmem:[%s1026_s3 + $0x1c8] sm:$0xff] %v341_v33 }
  0x42   :  { %v346_v1 = vmax.f32 %v282_v34, 0.0  ;;  %v347_v40 = vmax.f32 %v283_v35, 0.0  ;;  %406 = vst [vmem:[%s1026_s3 + $0x1d0] sm:$0xff] %v342_v36  ;;  %407 = vst [vmem:[%s1026_s3 + $0x1d8] sm:$0xff] %v343_v37 }
  0x43   :  { %408 = vst [vmem:[%s1026_s3 + $0x1e0] sm:$0xff] %v344_v38  ;;  %409 = vst [vmem:[%s1026_s3 + $0x1e8] sm:$0xff] %v345_v39 }
  0x44   :  { %410 = vst [vmem:[%s1026_s3 + $0x1f0] sm:$0xff] %v346_v1  ;;  %411 = vst [vmem:[%s1026_s3 + $0x1f8] sm:$0xff] %v347_v40 }

// kernel: single_conv_r2u_forward.2
= control target key start
LH: loop header
LB: loop body
LE: loop exit
PB: predicated region body
PF: predicated region fallthrough
CT: control target
= control target key end

     0   :  { %s6561_s12 = smov 0   ;;  %s6563_s13 = smov 0   ;;  %s8729_s0 = inlined_call_operand.vmem [shape: bf16[2,18,18,4], index: 0, kind: input, shape index: {}]   ;;  %s8730_s1 = inlined_call_operand.vmem [shape: bf16[3,3,4,128], index: 1, kind: input, shape index: {}]   ;;  %s8731_s2 = inlined_call_operand.vmem [shape: bf16[2,256,128], index: 2, kind: output, shape index: {0}]   ;;  %s8732_s3 = inlined_call_operand.vmem [shape: f32[2,2,128], index: 3, kind: output, shape index: {1}]  }
   0x1   :  { %s6565_s14 = smov 0  }
   0x2 LB: > { %s26_s15 = sadd.s32 1, %s6535_s13  ;;  %p4998_p0 = scmp.ge.s32.totalorder %s6539_s14, 1  ;;  %s6539_s14 = sphi %s6565_s14, %s14_s14   ;;  %s6535_s13 = sphi %s6563_s13, %s8846_s13   ;;  %s6531_s12 = sphi %s6561_s12, %s8845_s12  }
   0x3   : > { %p28_p1 = scmp.ge.s32.totalorder %s26_s15, 2  ;;  %p156_p2 = scmp.lt.s32.totalorder %s6539_s14, 3 }
   0x5   : > { %s8848_s15 = smov (%p28_p1, %s26_s15), 0  ;;  %p157_p3 = pnand %p4998_p0, %p156_p2 }
   0x7   : > { %160 = sbr.rel (%p157_p3) target bundleno = 692 (0x2b4), region = 28 }
   0xe   : > { %v5003_v0 = vld [vmem:[%s8730_s1 + $0x2] sm:$0x3]  ;;  %vm744_vm0 = vcmask 1041408   ;;  %v5198_v1 = vld [vmem:[%s8730_s1 + $0x8] sm:$0x3]  ;;  %p186_p4 = scmp.lt.s32.totalorder %s6531_s12, 1 }
   0xf   : > { %6322 = vmatprep.subr.msk.bf16.mxu1 %vm744_vm0, %v5003_v0  ;;  %6326 = vmatprep.subr.msk.bf16.mxu0 %vm744_vm0, %v5198_v1  ;;  %v746_v2 = vsel %vm744_vm0, %v5003_v0, 0  ;;  %v6589_v3 = vsel %vm744_vm0, %v5198_v1, 0  ;;  %v257_v4 = vld [vmem:[%s8730_s1] sm:$0x3]  ;;  %v5247_v5 = vld [vmem:[%s8730_s1 + $0xa] sm:$0x3] }
  0x10   : > { %8755 = vst [vmem:[#allocation2_spill] sm:$0xff] %v6589_v3  ;;  %5759 = vmatpush3.bf16.msra.mxu1 %v746_v2  ;;  %5895 = vmatpush3.bf16.msra.mxu0 %v6589_v3  ;;  %s8850_s12 = smov (!%p186_p4, %s6531_s12), 1  ;;  %vm258_vm1 = vsmask.f32 3328  ;;  %vm259_vm2 = vsmask.f32 7440 }
  0x11   : > { %6323 = vmatprep.subr.msk.bf16.mxu1 %vm744_vm0, %v257_v4  ;;  %6328 = vmatprep.subr.msk.bf16.mxu0 %vm744_vm0, %v5247_v5  ;;  %s6332_s24 = smul.u32 216, %s8850_s12  ;;  %vm695_vm3 = vcmask 31744   ;;  %v6621_v17 = vsel %vm744_vm0, %v257_v4, 0  ;;  %vm6632_vm4 = vmor %vm258_vm1, %vm259_vm2  ;;  %v6637_v36 = vsel %vm744_vm0, %v5247_v5, 0  ;;  %v6647_v50 = vld [vmem:[%s8730_s1 + $0xc] sm:$0x3] }
  0x12   : > { %v6664_v1 = vsel %vm744_vm0, %v6647_v50, 0  ;;  %vm1217_vm5 = vcmask 1042432   ;;  %vm1218_vm6 = vcmask 1046532   ;;  %s5477_s19 = sshll.u32 %s8850_s12, 7  ;;  %s5002_s23 = sshll.u32 %s8850_s12, 1 }
  0x13   : > { %s6606_s27 = scalar_lea.vmem %s8729_s0, %s6332_s24  ;;  %vm6898_vm7 = vmor %vm1217_vm5, %vm1218_vm6  ;;  %s8547_s22 = scalar_lea.vmem %s8731_s2, %s5477_s19 }
  0x14   : > { %v209_v6 = vld [vmem:[%s6606_s27] sm:$0xf]  ;;  %v210_v7 = vld [vmem:[%s6606_s27 + $0x4] sm:$0xf]  ;;  %v211_v8 = vld [vmem:[%s6606_s27 + $0x8] sm:$0x1]  ;;  %s8663_s26 = scalar_lea.vmem %s8732_s3, %s5002_s23 }
  0x15   : > { %v262_v9 = vshrl.u32 %v209_v6, 16  ;;  %v265_v10 = vshll.u32 %v209_v6, 16  ;;  %v271_v11 = vshll.u32 %v210_v7, 16  ;;  %v275_v12 = vshrl.u32 %v210_v7, 16  ;;  %v6612_v13 = vld [vmem:[%s6606_s27 + $0xc] sm:$0xf] }
  0x16   : > { %v281_v14 = vshll.u32 %v211_v8, 16  ;;  %v6615_v15 = vld [vmem:[%s6606_s27 + $0x10] sm:$0xf]  ;;  %v6618_v16 = vld [vmem:[%s6606_s27 + $0x14] sm:$0x1]  ;;  %v2005_v23 = vshrl.u32 %v6612_v13, 16 }
  0x17   : > { %v264_v18 = vrot.slane %v262_v9, 4  ;;  %v267_v19 = vrot.slane %v265_v10, 5  ;;  %v273_v20 = vrot.slane %v271_v11, 5  ;;  %v277_v21 = vrot.slane %v275_v12, 4  ;;  %v212_v30 = vld [vmem:[%s6606_s27 + $0xc] sm:$0xf] }
  0x18   : > { %v283_v22 = vrot.slane %v281_v14, 5  ;;  %v2008_v24 = vshll.u32 %v6612_v13, 16  ;;  %v2014_v25 = vshll.u32 %v6615_v15, 16  ;;  %v2018_v28 = vshrl.u32 %v6615_v15, 16  ;;  %v213_v31 = vld [vmem:[%s6606_s27 + $0x10] sm:$0xf] }
  0x19   : > { %v268_v26 = vor.u32 %v267_v19, %v264_v18  ;;  %v278_v27 = vor.u32 %v277_v21, %v273_v20  ;;  %v2024_v29 = vshll.u32 %v6618_v16, 16  ;;  %v2007_v33 = vrot.slane %v2005_v23, 4  ;;  %v214_v42 = vld [vmem:[%s6606_s27 + $0x14] sm:$0x1]  ;;  %v6650_v55 = vld [vmem:[%s6606_s27 + $0x18] sm:$0xf] }
  0x1a   : > { %v2010_v34 = vrot.slane %v2008_v24, 5  ;;  %v2016_v35 = vrot.slane %v2014_v25, 5  ;;  %v2020_v39 = vrot.slane %v2018_v28, 4  ;;  %v286_v43 = vshrl.u32 %v212_v30, 16  ;;  %v6653_v60 = vld [vmem:[%s6606_s27 + $0x1c] sm:$0xf] }
  0x1b   : > { %v269_v37 = vrot.slane %v268_v26, 4  ;;  %v279_v38 = vrot.slane %v278_v27, 4  ;;  %v2026_v40 = vrot.slane %v2024_v29, 5  ;;  %v289_v44 = vshll.u32 %v212_v30, 16  ;;  %v6660_v0 = vld [vmem:[%s6606_s27 + $0x20] sm:$0x1] }
  0x1c   : > { %v2011_v41 = vor.u32 %v2010_v34, %v2007_v33  ;;  %v295_v45 = vshll.u32 %v213_v31, 16  ;;  %v2021_v48 = vor.u32 %v2020_v39, %v2016_v35  ;;  %v299_v49 = vshrl.u32 %v213_v31, 16  ;;  %v215_v11 = vld [vmem:[%s6606_s27 + $0x18] sm:$0xf]  ;;  %v217_v25 = vld [vmem:[%s6606_s27 + $0x20] sm:$0x1] }
  0x1d   : > { %v274_v46 = vsel %vm6632_vm4, %v269_v37, %v273_v20  ;;  %v284_v47 = vsel %vm6632_vm4, %v279_v38, %v283_v22  ;;  %v288_v53 = vrot.slane %v286_v43, 4  ;;  %v291_v54 = vrot.slane %v289_v44, 5  ;;  %v216_v20 = vld [vmem:[%s6606_s27 + $0x1c] sm:$0xf]  ;;  %v6684_v30 = vld [vmem:[%s6606_s27 + $0x24] sm:$0xf] }
  0x1e   : > { %v5004_v51 = vcombine.low %v274_v46, %v284_v47  ;;  %v2012_v52 = vrot.slane %v2011_v41, 4  ;;  %v2022_v56 = vrot.slane %v2021_v48, 4  ;;  %v297_v57 = vrot.slane %v295_v45, 5  ;;  %v5084_v41 = vld [vmem:[%s8730_s1 + $0x4] sm:$0x3] }
  0x1f   : > { %v301_v58 = vrot.slane %v299_v49, 4  ;;  %v305_v59 = vshll.u32 %v214_v42, 16  ;;  %v2703_v62 = vrot.slane %v6618_v16, 5  ;;  %v292_v63 = vor.u32 %v291_v54, %v288_v53  ;;  %v6691_v45 = vld [vmem:[%s6606_s27 + $0x28] sm:$0xf] }
  0x20   : > { %5760 = vmatprep.mubr.msk.bf16.mxu1 %vm695_vm3, %v5004_v51  ;;  %v2017_v61 = vsel %vm6632_vm4, %v2012_v52, %v2016_v35  ;;  %v2027_v2 = vsel %vm6632_vm4, %v2022_v56, %v2026_v40  ;;  %v2029_v6 = vshrl.u32 %v6650_v55, 16  ;;  %v2032_v9 = vshll.u32 %v6650_v55, 16  ;;  %v6696_v52 = vld [vmem:[%s6606_s27 + $0x2c] sm:$0x1]  ;;  %v7480_v3 = vld [vmem:[%s6606_s27 + $0xb8] sm:$0xf] }
  0x21   : > { %v302_v4 = vor.u32 %v301_v58, %v297_v57  ;;  %v307_v5 = vrot.slane %v305_v59, 5  ;;  %v5199_v7 = vcombine.low %v2017_v61, %v2027_v2  ;;  %v293_v8 = vrot.slane %v292_v63, 4  ;;  %v218_v58 = vld [vmem:[%s6606_s27 + $0x24] sm:$0xf] }
  0x22   : > { %v2038_v10 = vshll.u32 %v6653_v60, 16  ;;  %v2031_v14 = vrot.slane %v2029_v6, 4  ;;  %v2042_v18 = vshrl.u32 %v6653_v60, 16  ;;  %v2048_v19 = vshll.u32 %v6660_v0, 16 }
  0x23   : > { %v303_v12 = vrot.slane %v302_v4, 4  ;;  %5896 = vmatprep.mubr.msk.bf16.mxu0 %vm695_vm3, %v5199_v7  ;;  %v298_v21 = vsel %vm6632_vm4, %v293_v8, %v297_v57  ;;  %v2034_v22 = vrot.slane %v2032_v9, 5  ;;  %v2707_v24 = vrot.slane %v6653_v60, 5  ;;  %v219_v7 = vld [vmem:[%s6606_s27 + $0x28] sm:$0xf] }
  0x24   : > { %v2040_v23 = vrot.slane %v2038_v10, 5  ;;  %v2044_v27 = vrot.slane %v2042_v18, 4  ;;  %v2050_v28 = vrot.slane %v2048_v19, 5  ;;  %v2710_v29 = vrot.slane %v6660_v0, 5  ;;  %v220_v19 = vld [vmem:[%s6606_s27 + $0x2c] sm:$0x1] }
  0x25   : > { %v308_v26 = vsel %vm6632_vm4, %v303_v12, %v307_v5  ;;  %v2035_v33 = vor.u32 %v2034_v22, %v2031_v14  ;;  %v310_v34 = vshrl.u32 %v215_v11, 16  ;;  %v313_v35 = vshll.u32 %v215_v11, 16 }
  0x26   : > { %v5005_v31 = vcombine.low %v298_v21, %v308_v26  ;;  %v2045_v37 = vor.u32 %v2044_v27, %v2040_v23  ;;  %v319_v38 = vshll.u32 %v216_v20, 16  ;;  %v323_v39 = vshrl.u32 %v216_v20, 16  ;;  %v6714_v21 = vld [vmem:[%s6606_s27 + $0x30] sm:$0xf] }
  0x27   : > { %v329_v40 = vshll.u32 %v217_v25, 16  ;;  %v2036_v42 = vrot.slane %v2035_v33, 4  ;;  %v312_v43 = vrot.slane %v310_v34, 4  ;;  %v315_v44 = vrot.slane %v313_v35, 5  ;;  %v6720_v34 = vld [vmem:[%s6606_s27 + $0x34] sm:$0xf] }
  0x28   : > { %5761 = vmatmul.mubr.msk.bf16.vlgmr.msra.gmra.mrb[0].mxu1 %vm695_vm3, %v5005_v31  ;;  %v2053_v46 = vshrl.u32 %v6684_v30, 16  ;;  %v2046_v47 = vrot.slane %v2045_v37, 4  ;;  %v321_v48 = vrot.slane %v319_v38, 5  ;;  %v325_v49 = vrot.slane %v323_v39, 4 }
  0x29   : > { %5793 = vmatpush3.bf16.msra.mxu1 %v6621_v17  ;;  %v331_v51 = vrot.slane %v329_v40, 5  ;;  %v2041_v53 = vsel %vm6632_vm4, %v2036_v42, %v2040_v23  ;;  %v316_v54 = vor.u32 %v315_v44, %v312_v43  ;;  %v2056_v57 = vshll.u32 %v6684_v30, 16  ;;  %v6729_v42 = vld [vmem:[%s6606_s27 + $0x38] sm:$0x1]  ;;  %v6733_v44 = vld [vmem:[%s6606_s27 + $0x30] sm:$0xf] }
  0x2a   : > { %v2055_v56 = vrot.slane %v2053_v46, 4  ;;  %6324 = vmatprep.subr.msk.bf16.mxu1 %vm744_vm0, %v5084_v41  ;;  %v2051_v17 = vsel %vm6632_vm4, %v2046_v47, %v2050_v28  ;;  %v326_v59 = vor.u32 %v325_v49, %v321_v48  ;;  %v2062_v61 = vshll.u32 %v6691_v45, 16 }
  0x2b   : > { %v2066_v63 = vshrl.u32 %v6691_v45, 16  ;;  %v5200_v2 = vcombine.low %v2041_v53, %v2051_v17  ;;  %v317_v4 = vrot.slane %v316_v54, 4  ;;  %v2058_v5 = vrot.slane %v2056_v57, 5 }
  0x2c   : > { %v2072_v6 = vshll.u32 %v6696_v52, 16  ;;  %v327_v8 = vrot.slane %v326_v59, 4  ;;  %v2064_v9 = vrot.slane %v2062_v61, 5  ;;  %v334_v11 = vshrl.u32 %v218_v58, 16 }
  0x2d   : > { %v2068_v10 = vrot.slane %v2066_v63, 4  ;;  %5897 = vmatmul.mubr.msk.bf16.vlgmr.msra.gmra.mrb[0].mxu0 %vm695_vm3, %v5200_v2  ;;  %v322_v12 = vsel %vm6632_vm4, %v317_v4, %v321_v48  ;;  %v2059_v14 = vor.u32 %v2058_v5, %v2055_v56  ;;  %v337_v20 = vshll.u32 %v218_v58, 16  ;;  %v6739_v56 = vld [vmem:[%s6606_s27 + $0x34] sm:$0xf]  ;;  %v223_v4 = vld [vmem:[%s6606_s27 + $0x38] sm:$0x1] }
  0x2e   : > { %v2074_v18 = vrot.slane %v2072_v6, 5  ;;  %5929 = vmatpush3.bf16.msra.mxu0 %v6637_v36  ;;  %v332_v22 = vsel %vm6632_vm4, %v327_v8, %v331_v51  ;;  %v336_v25 = vrot.slane %v334_v11, 4  ;;  %v343_v26 = vshll.u32 %v219_v7, 16 }
  0x2f   : > { %v2069_v23 = vor.u32 %v2068_v10, %v2064_v9  ;;  %v5006_v27 = vcombine.low %v322_v12, %v332_v22  ;;  %v2060_v28 = vrot.slane %v2059_v14, 4  ;;  %v339_v31 = vrot.slane %v337_v20, 5  ;;  %6329 = vmatprep.subr.msk.bf16.mxu0 %vm744_vm0, %v6647_v50  ;;  %v6751_v10 = vld [vmem:[%s6606_s27 + $0x3c] sm:$0xf] }
  0x30   : > { %v347_v33 = vshrl.u32 %v219_v7, 16  ;;  %v345_v37 = vrot.slane %v343_v26, 5  ;;  %v353_v36 = vshll.u32 %v220_v19, 16  ;;  %v2077_v38 = vshrl.u32 %v6714_v21, 16  ;;  %v6757_v19 = vld [vmem:[%s6606_s27 + $0x40] sm:$0xf] }
  0x31   : > { %v2070_v35 = vrot.slane %v2069_v23, 4  ;;  %5764 = vmatprep.mubr.msk.bf16.mxu1 %vm695_vm3, %v5006_v27  ;;  %v2065_v39 = vsel %vm6632_vm4, %v2060_v28, %v2064_v9  ;;  %v340_v40 = vor.u32 %v339_v31, %v336_v25  ;;  %v2080_v43 = vshll.u32 %v6714_v21, 16  ;;  %v6762_v31 = vld [vmem:[%s6606_s27 + $0x44] sm:$0x1] }
  0x32   : > { %v349_v41 = vrot.slane %v347_v33, 4  ;;  %v355_v46 = vrot.slane %v353_v36, 5  ;;  %v2079_v47 = vrot.slane %v2077_v38, 4  ;;  %v2086_v48 = vshll.u32 %v6720_v34, 16 }
  0x33   : > { %v2075_v50 = vsel %vm6632_vm4, %v2070_v35, %v2074_v18  ;;  %v341_v51 = vrot.slane %v340_v40, 4  ;;  %v2082_v54 = vrot.slane %v2080_v43, 5  ;;  %v2090_v58 = vshrl.u32 %v6720_v34, 16 }
  0x34   : > { %v5201_v49 = vcombine.low %v2065_v39, %v2075_v50  ;;  %v350_v53 = vor.u32 %v349_v41, %v345_v37  ;;  %v2088_v57 = vrot.slane %v2086_v48, 5  ;;  %v2096_v17 = vshll.u32 %v6729_v42, 16  ;;  %v6770_v50 = vld [vmem:[%s6606_s27 + $0x3c] sm:$0xf] }
  0x35   : > { %v358_v59 = vshrl.u32 %v6733_v44, 16  ;;  %v346_v61 = vsel %vm6632_vm4, %v341_v51, %v345_v37  ;;  %v2083_v2 = vor.u32 %v2082_v54, %v2079_v47  ;;  %v361_v5 = vshll.u32 %v6733_v44, 16  ;;  %v6776_v51 = vld [vmem:[%s6606_s27 + $0x40] sm:$0xf] }
  0x36   : > { %5900 = vmatprep.mubr.msk.bf16.mxu0 %vm695_vm3, %v5201_v49  ;;  %v351_v63 = vrot.slane %v350_v53, 4  ;;  %v2092_v6 = vrot.slane %v2090_v58, 4  ;;  %v2098_v7 = vrot.slane %v2096_v17, 5  ;;  %v367_v9 = vshll.u32 %v6739_v56, 16 }
  0x37   : > { %v360_v8 = vrot.slane %v358_v59, 4  ;;  %v2084_v12 = vrot.slane %v2083_v2, 4  ;;  %v363_v14 = vrot.slane %v361_v5, 5  ;;  %v371_v18 = vshrl.u32 %v6739_v56, 16 }
  0x38   : > { %v356_v11 = vsel %vm6632_vm4, %v351_v63, %v355_v46  ;;  %v2093_v22 = vor.u32 %v2092_v6, %v2088_v57  ;;  %v369_v23 = vrot.slane %v367_v9, 5  ;;  %v377_v25 = vshll.u32 %v223_v4, 16 }
  0x39   : > { %v5007_v20 = vcombine.low %v346_v61, %v356_v11  ;;  %v2089_v26 = vsel %vm6632_vm4, %v2084_v12, %v2088_v57  ;;  %v364_v27 = vor.u32 %v363_v14, %v360_v8  ;;  %v373_v28 = vrot.slane %v371_v18, 4  ;;  %v226_v61 = vld [vmem:[%s6606_s27 + $0x44] sm:$0x1]  ;;  %v6789_v8 = vld [vmem:[%s6606_s27 + $0x48] sm:$0xf] }
  0x3a   : > { %v2101_v33 = vshrl.u32 %v6751_v10, 16  ;;  %v2094_v35 = vrot.slane %v2093_v22, 4  ;;  %v379_v37 = vrot.slane %v377_v25, 5  ;;  %v2104_v36 = vshll.u32 %v6751_v10, 16  ;;  %v6792_v18 = vld [vmem:[%s6606_s27 + $0x4c] sm:$0xf] }
  0x3b   : > { %5765 = vmatmul.mubr.msk.bf16.gmra.mrb[4].mxu1 %vm695_vm3, %v5007_v20  ;;  %v2110_v38 = vshll.u32 %v6757_v19, 16  ;;  %v365_v39 = vrot.slane %v364_v27, 4  ;;  %v374_v40 = vor.u32 %v373_v28, %v369_v23  ;;  %v2114_v43 = vshrl.u32 %v6757_v19, 16  ;;  %v6798_v28 = vld [vmem:[%s6606_s27 + $0x50] sm:$0x1] }
  0x3c   : > { %v2103_v41 = vrot.slane %v2101_v33, 4  ;;  %v2099_v46 = vsel %vm6632_vm4, %v2094_v35, %v2098_v7  ;;  %v2106_v47 = vrot.slane %v2104_v36, 5  ;;  %v2120_v49 = vshll.u32 %v6762_v31, 16 }
  0x3d   : > { %v2112_v48 = vrot.slane %v2110_v38, 5  ;;  %v5202_v53 = vcombine.low %v2089_v26, %v2099_v46  ;;  %v370_v54 = vsel %vm6632_vm4, %v365_v39, %v369_v23  ;;  %v375_v57 = vrot.slane %v374_v40, 4  ;;  %v6806_v40 = vld [vmem:[%s6606_s27 + $0x48] sm:$0xf] }
  0x3e   : > { %v2116_v58 = vrot.slane %v2114_v43, 4  ;;  %v2107_v17 = vor.u32 %v2106_v47, %v2103_v41  ;;  %v2122_v59 = vrot.slane %v2120_v49, 5  ;;  %v382_v63 = vshrl.u32 %v6770_v50, 16 }
  0x3f   : > { %v385_v2 = vshll.u32 %v6770_v50, 16  ;;  %5901 = vmatmul.mubr.msk.bf16.gmra.mrb[4].mxu0 %vm695_vm3, %v5202_v53  ;;  %v380_v4 = vsel %vm6632_vm4, %v375_v57, %v379_v37  ;;  %v391_v6 = vshll.u32 %v6776_v51, 16  ;;  %v395_v7 = vshrl.u32 %v6776_v51, 16 }
  0x40   : > { %v2117_v5 = vor.u32 %v2116_v58, %v2112_v48  ;;  %v5008_v9 = vcombine.low %v370_v54, %v380_v4  ;;  %v2108_v11 = vrot.slane %v2107_v17, 4  ;;  %v384_v12 = vrot.slane %v382_v63, 4 }
  0x41   : > { %v387_v14 = vrot.slane %v385_v2, 5  ;;  %v393_v22 = vrot.slane %v391_v6, 5  ;;  %v397_v23 = vrot.slane %v395_v7, 4  ;;  %v401_v25 = vshll.u32 %v226_v61, 16  ;;  %v6823_v7 = vld [vmem:[%s6606_s27 + $0x54] sm:$0xf] }
  0x42   : > { %v2118_v20 = vrot.slane %v2117_v5, 4  ;;  %5768 = vmatprep.mubr.msk.bf16.mxu1 %vm695_vm3, %v5008_v9  ;;  %v2113_v26 = vsel %vm6632_vm4, %v2108_v11, %v2112_v48  ;;  %v2125_v33 = vshrl.u32 %v6789_v8, 16  ;;  %v2128_v35 = vshll.u32 %v6789_v8, 16  ;;  %v6809_v48 = vld [vmem:[%s6606_s27 + $0x4c] sm:$0xf] }
  0x43   : > { %v388_v27 = vor.u32 %v387_v14, %v384_v12  ;;  %v398_v36 = vor.u32 %v397_v23, %v393_v22  ;;  %v403_v38 = vrot.slane %v401_v25, 5  ;;  %v2134_v39 = vshll.u32 %v6792_v18, 16 }
  0x44   : > { %v2123_v37 = vsel %vm6632_vm4, %v2118_v20, %v2122_v59  ;;  %v2127_v46 = vrot.slane %v2125_v33, 4  ;;  %v2130_v47 = vrot.slane %v2128_v35, 5  ;;  %v2138_v54 = vshrl.u32 %v6792_v18, 16  ;;  %v229_v59 = vld [vmem:[%s6606_s27 + $0x50] sm:$0x1] }
  0x45   : > { %v5203_v41 = vcombine.low %v2113_v26, %v2123_v37  ;;  %v389_v43 = vrot.slane %v388_v27, 4  ;;  %v399_v49 = vrot.slane %v398_v36, 4  ;;  %v2136_v53 = vrot.slane %v2134_v39, 5  ;;  %v6826_v20 = vld [vmem:[%s6606_s27 + $0x58] sm:$0xf] }
  0x46   : > { %v2144_v57 = vshll.u32 %v6798_v28, 16  ;;  %v2131_v17 = vor.u32 %v2130_v47, %v2127_v46  ;;  %v406_v61 = vshrl.u32 %v6806_v40, 16  ;;  %v409_v63 = vshll.u32 %v6806_v40, 16  ;;  %v6833_v35 = vld [vmem:[%s6606_s27 + $0x5c] sm:$0x1] }
  0x47   : > { %5904 = vmatprep.mubr.msk.bf16.mxu0 %vm695_vm3, %v5203_v41  ;;  %v394_v58 = vsel %vm6632_vm4, %v389_v43, %v393_v22  ;;  %v404_v2 = vsel %vm6632_vm4, %v399_v49, %v403_v38  ;;  %v2140_v4 = vrot.slane %v2138_v54, 4  ;;  %v415_v6 = vshll.u32 %v6809_v48, 16 }
  0x48   : > { %v2146_v5 = vrot.slane %v2144_v57, 5  ;;  %v5009_v9 = vcombine.low %v394_v58, %v404_v2  ;;  %v2132_v11 = vrot.slane %v2131_v17, 4  ;;  %v408_v12 = vrot.slane %v406_v61, 4  ;;  %v6846_v61 = vld [vmem:[%s6606_s27 + $0x58] sm:$0xf] }
  0x49   : > { %v411_v14 = vrot.slane %v409_v63, 5  ;;  %v2141_v22 = vor.u32 %v2140_v4, %v2136_v53  ;;  %v417_v23 = vrot.slane %v415_v6, 5  ;;  %v419_v25 = vshrl.u32 %v6809_v48, 16 }
  0x4a   : > { %v425_v26 = vshll.u32 %v229_v59, 16  ;;  %5769 = vmatmul.mubr.msk.bf16.gmra.mrb[8].mxu1 %vm695_vm3, %v5009_v9  ;;  %v2137_v27 = vsel %vm6632_vm4, %v2132_v11, %v2136_v53  ;;  %v2149_v37 = vshrl.u32 %v6823_v7, 16  ;;  %v2152_v36 = vshll.u32 %v6823_v7, 16  ;;  %v6840_v53 = vld [vmem:[%s6606_s27 + $0x54] sm:$0xf] }
  0x4b   : > { %v412_v33 = vor.u32 %v411_v14, %v408_v12  ;;  %v2142_v38 = vrot.slane %v2141_v22, 4  ;;  %v421_v39 = vrot.slane %v419_v25, 4  ;;  %v2158_v43 = vshll.u32 %v6826_v20, 16  ;;  %v232_v9 = vld [vmem:[%s6606_s27 + $0x5c] sm:$0x1] }
  0x4c   : > { %v427_v41 = vrot.slane %v425_v26, 5  ;;  %v2151_v47 = vrot.slane %v2149_v37, 4  ;;  %v2154_v49 = vrot.slane %v2152_v36, 5  ;;  %v2162_v54 = vshrl.u32 %v6826_v20, 16 }
  0x4d   : > { %v413_v46 = vrot.slane %v412_v33, 4  ;;  %v2147_v57 = vsel %vm6632_vm4, %v2142_v38, %v2146_v5  ;;  %v422_v58 = vor.u32 %v421_v39, %v417_v23  ;;  %v2160_v17 = vrot.slane %v2158_v43, 5  ;;  %v6862_v39 = vld [vmem:[%s6606_s27 + $0x64] sm:$0xf] }
  0x4e   : > { %v2168_v59 = vshll.u32 %v6833_v35, 16  ;;  %v5204_v63 = vcombine.low %v2137_v27, %v2147_v57  ;;  %v2155_v4 = vor.u32 %v2154_v49, %v2151_v47  ;;  %v2164_v6 = vrot.slane %v2162_v54, 4 }
  0x4f   : > { %v418_v2 = vsel %vm6632_vm4, %v413_v46, %v417_v23  ;;  %v423_v11 = vrot.slane %v422_v58, 4  ;;  %v430_v14 = vshrl.u32 %v6840_v53, 16  ;;  %v433_v5 = vshll.u32 %v6840_v53, 16  ;;  %v6857_v23 = vld [vmem:[%s6606_s27 + $0x60] sm:$0xf] }
  0x50   : > { %v2170_v12 = vrot.slane %v2168_v59, 5  ;;  %5905 = vmatmul.mubr.msk.bf16.gmra.mrb[8].mxu0 %vm695_vm3, %v5204_v63  ;;  %v2156_v22 = vrot.slane %v2155_v4, 4  ;;  %v2165_v25 = vor.u32 %v2164_v6, %v2160_v17  ;;  %v439_v26 = vshll.u32 %v6846_v61, 16  ;;  %v6867_v59 = vld [vmem:[%s6606_s27 + $0x68] sm:$0x1] }
  0x51   : > { %v443_v27 = vshrl.u32 %v6846_v61, 16  ;;  %v428_v33 = vsel %vm6632_vm4, %v423_v11, %v427_v41  ;;  %v432_v37 = vrot.slane %v430_v14, 4  ;;  %v435_v36 = vrot.slane %v433_v5, 5  ;;  %v6877_v6 = vld [vmem:[%s6606_s27 + $0x60] sm:$0xf] }
  0x52   : > { %v449_v38 = vshll.u32 %v232_v9, 16  ;;  %v5010_v43 = vcombine.low %v418_v2, %v428_v33  ;;  %v2161_v46 = vsel %vm6632_vm4, %v2156_v22, %v2160_v17  ;;  %v2166_v47 = vrot.slane %v2165_v25, 4  ;;  %v6880_v22 = vld [vmem:[%s6606_s27 + $0x64] sm:$0xf] }
  0x53   : > { %v441_v49 = vrot.slane %v439_v26, 5  ;;  %v436_v54 = vor.u32 %v435_v36, %v432_v37  ;;  %v445_v57 = vrot.slane %v443_v27, 4  ;;  %v2173_v41 = vshrl.u32 %v6857_v23, 16 }
  0x54   : > { %v451_v58 = vrot.slane %v449_v38, 5  ;;  %5772 = vmatprep.mubr.msk.bf16.mxu1 %vm695_vm3, %v5010_v43  ;;  %v2171_v63 = vsel %vm6632_vm4, %v2166_v47, %v2170_v12  ;;  %v2176_v2 = vshll.u32 %v6857_v23, 16  ;;  %v2182_v4 = vshll.u32 %v6862_v39, 16 }
  0x55   : > { %v2186_v17 = vshrl.u32 %v6862_v39, 16  ;;  %v5205_v9 = vcombine.low %v2161_v46, %v2171_v63  ;;  %v437_v11 = vrot.slane %v436_v54, 4  ;;  %v446_v14 = vor.u32 %v445_v57, %v441_v49  ;;  %v235_v54 = vld [vmem:[%s6606_s27 + $0x68] sm:$0x1] }
  0x56   : > { %v2175_v5 = vrot.slane %v2173_v41, 4  ;;  %v2178_v25 = vrot.slane %v2176_v2, 5  ;;  %v2184_v26 = vrot.slane %v2182_v4, 5  ;;  %v2192_v12 = vshll.u32 %v6867_v59, 16 }
  0x57   : > { %v2188_v27 = vrot.slane %v2186_v17, 4  ;;  %5908 = vmatprep.mubr.msk.bf16.mxu0 %vm695_vm3, %v5205_v9  ;;  %v442_v33 = vsel %vm6632_vm4, %v437_v11, %v441_v49  ;;  %v447_v37 = vrot.slane %v446_v14, 4  ;;  %v454_v36 = vshrl.u32 %v6877_v6, 16  ;;  %v6894_v49 = vld [vmem:[%s6606_s27 + $0x6c] sm:$0xf] }
  0x58   : > { %v457_v38 = vshll.u32 %v6877_v6, 16  ;;  %v2179_v43 = vor.u32 %v2178_v25, %v2175_v5  ;;  %v2194_v47 = vrot.slane %v2192_v12, 5  ;;  %v463_v57 = vshll.u32 %v6880_v22, 16 }
  0x59   : > { %v2189_v46 = vor.u32 %v2188_v27, %v2184_v26  ;;  %v452_v41 = vsel %vm6632_vm4, %v447_v37, %v451_v58  ;;  %v456_v63 = vrot.slane %v454_v36, 4  ;;  %v467_v4 = vshrl.u32 %v6880_v22, 16 }
  0x5a   : > { %v459_v2 = vrot.slane %v457_v38, 5  ;;  %v5011_v17 = vcombine.low %v442_v33, %v452_v41  ;;  %v2180_v9 = vrot.slane %v2179_v43, 4  ;;  %v465_v14 = vrot.slane %v463_v57, 5  ;;  %v6910_v38 = vld [vmem:[%s6606_s27 + $0x70] sm:$0xf] }
  0x5b   : > { %v2190_v11 = vrot.slane %v2189_v46, 4  ;;  %v469_v25 = vrot.slane %v467_v4, 4  ;;  %v473_v27 = vshll.u32 %v235_v54, 16  ;;  %v5231_v58 = vrot.slane %v6612_v13, 9  ;;  %v238_v13 = vld [vmem:[%s6606_s27 + $0x74] sm:$0x1] }
  0x5c   : > { %v460_v5 = vor.u32 %v459_v2, %v456_v63  ;;  %5773 = vmatmul.mubr.msk.bf16.gmra.mrb[12].mxu1 %vm695_vm3, %v5011_v17  ;;  %v2185_v33 = vsel %vm6632_vm4, %v2180_v9, %v2184_v26  ;;  %v2700_v36 = vrot.slane %v6615_v15, 5  ;;  %v478_v43 = vshrl.u32 %v6894_v49, 16 }
  0x5d   : > { %v2195_v37 = vsel %vm6632_vm4, %v2190_v11, %v2194_v47  ;;  %v470_v57 = vor.u32 %v469_v25, %v465_v14  ;;  %v475_v41 = vrot.slane %v473_v27, 5  ;;  %v481_v47 = vshll.u32 %v6894_v49, 16 }
  0x5e   : > { %v5206_v46 = vcombine.low %v2185_v33, %v2195_v37  ;;  %v461_v54 = vrot.slane %v460_v5, 4  ;;  %v2701_v63 = vsel %vm6898_vm7, %v5231_v58, %v2700_v36  ;;  %v2702_v2 = vrot.slane %v2700_v36, 4  ;;  %v6928_v58 = vld [vmem:[%s6606_s27 + $0x78] sm:$0xf] }
  0x5f   : > { %v480_v26 = vrot.slane %v478_v43, 4  ;;  %v471_v4 = vrot.slane %v470_v57, 4  ;;  %v487_v17 = vshll.u32 %v6910_v38, 16  ;;  %v491_v9 = vshrl.u32 %v6910_v38, 16  ;;  %v6933_v43 = vld [vmem:[%s6606_s27 + $0x7c] sm:$0xf] }
  0x60   : > { %5909 = vmatmul.mubr.msk.bf16.gmra.mrb[12].mxu0 %vm695_vm3, %v5206_v46  ;;  %v466_v15 = vsel %vm6632_vm4, %v461_v54, %v465_v14  ;;  %v2704_v11 = vsel %vm6898_vm7, %v2702_v2, %v2703_v62  ;;  %v483_v5 = vrot.slane %v481_v47, 5  ;;  %v497_v25 = vshll.u32 %v238_v13, 16  ;;  %v241_v46 = vld [vmem:[%s6606_s27 + $0x80] sm:$0x1] }
  0x61   : > { %v5232_v27 = vrot.slane %v6650_v55, 9  ;;  %v476_v33 = vsel %vm6632_vm4, %v471_v4, %v475_v41  ;;  %v5248_v14 = vcombine.low %v2701_v63, %v2704_v11  ;;  %v489_v37 = vrot.slane %v487_v17, 5 }
  0x62   : > { %v493_v36 = vrot.slane %v491_v9, 4  ;;  %v5012_v54 = vcombine.low %v466_v15, %v476_v33  ;;  %v484_v16 = vor.u32 %v483_v5, %v480_v26  ;;  %v499_v57 = vrot.slane %v497_v25, 5  ;;  %v6958_v33 = vld [vmem:[%s6606_s27 + $0x88] sm:$0xf] }
  0x63   : > { %v2708_v62 = vsel %vm6898_vm7, %v5232_v27, %v2707_v24  ;;  %5930 = vmatprep.mubr.msk.bf16.mxu0 %vm695_vm3, %v5248_v14  ;;  %v2709_v41 = vrot.slane %v2707_v24, 4  ;;  %v502_v13 = vshrl.u32 %v6928_v58, 16  ;;  %v505_v63 = vshll.u32 %v6928_v58, 16  ;;  %v6955_v27 = vld [vmem:[%s6606_s27 + $0x84] sm:$0xf] }
  0x64   : > { %v494_v55 = vor.u32 %v493_v36, %v489_v37  ;;  %5776 = vmatprep.mubr.msk.bf16.mxu1 %vm695_vm3, %v5012_v54  ;;  %v485_v2 = vrot.slane %v484_v16, 4  ;;  %v511_v26 = vshll.u32 %v6933_v43, 16  ;;  %v515_v47 = vshrl.u32 %v6933_v43, 16 }
  0x65   : > { %v521_v15 = vshll.u32 %v241_v46, 16  ;;  %v2711_v60 = vsel %vm6898_vm7, %v2709_v41, %v2710_v29  ;;  %v504_v24 = vrot.slane %v502_v13, 4  ;;  %v507_v17 = vrot.slane %v505_v63, 5  ;;  %v6966_v46 = vld [vmem:[%s8730_s1 + $0xe] sm:$0x3] }
  0x66   : > { %v495_v4 = vrot.slane %v494_v55, 4  ;;  %v490_v9 = vsel %vm6632_vm4, %v485_v2, %v489_v37  ;;  %v5249_v11 = vcombine.low %v2708_v62, %v2711_v60  ;;  %v513_v5 = vrot.slane %v511_v26, 5  ;;  %v244_v55 = vld [vmem:[%s6606_s27 + $0x8c] sm:$0x1] }
  0x67   : > { %v517_v25 = vrot.slane %v515_v47, 4  ;;  %v508_v0 = vor.u32 %v507_v17, %v504_v24  ;;  %v523_v36 = vrot.slane %v521_v15, 5  ;;  %v5233_v29 = vrot.slane %v6684_v30, 9 }
  0x68   : > { %v500_v14 = vsel %vm6632_vm4, %v495_v4, %v499_v57  ;;  %5931 = vmatmul.mubr.msk.bf16.vlgmr.msra.gmra.mrb[0].mxu0 %vm695_vm3, %v5249_v11  ;;  %v2714_v16 = vrot.slane %v6691_v45, 5  ;;  %v2717_v62 = vrot.slane %v6696_v52, 5  ;;  %v526_v41 = vshrl.u32 %v6955_v27, 16  ;;  %v6992_v11 = vld [vmem:[%s6606_s27 + $0x94] sm:$0xf] }
  0x69   : > { %v5013_v37 = vcombine.low %v490_v9, %v500_v14  ;;  %v518_v54 = vor.u32 %v517_v25, %v513_v5  ;;  %5963 = vmatpush3.bf16.msra.mxu0 %v6664_v1  ;;  %v509_v57 = vrot.slane %v508_v0, 4  ;;  %v529_v30 = vshll.u32 %v6955_v27, 16  ;;  %v6989_v9 = vld [vmem:[%s6606_s27 + $0x90] sm:$0xf] }
  0x6a   : > { %v535_v13 = vshll.u32 %v6958_v33, 16  ;;  %v2715_v45 = vsel %vm6898_vm7, %v5233_v29, %v2714_v16  ;;  %v2716_v2 = vrot.slane %v2714_v16, 4  ;;  %v539_v52 = vshrl.u32 %v6958_v33, 16  ;;  %6330 = vmatprep.subr.msk.bf16.mxu0 %vm744_vm0, %v6966_v46 }
  0x6b   : > { %5777 = vmatmul.mubr.msk.bf16.gmra.mrb[16].mxu1 %vm695_vm3, %v5013_v37  ;;  %v519_v63 = vrot.slane %v518_v54, 4  ;;  %v514_v1 = vsel %vm6632_vm4, %v509_v57, %v513_v5  ;;  %v528_v26 = vrot.slane %v526_v41, 4  ;;  %v531_v47 = vrot.slane %v529_v30, 5 }
  0x6c   : > { %v537_v15 = vrot.slane %v535_v13, 5  ;;  %v2718_v60 = vsel %vm6898_vm7, %v2716_v2, %v2717_v62  ;;  %v541_v24 = vrot.slane %v539_v52, 4  ;;  %v545_v17 = vshll.u32 %v244_v55, 16  ;;  %v7000_v62 = vld [vmem:[%s6606_s27 + $0x98] sm:$0x1] }
  0x6d   : > { %v524_v4 = vsel %vm6632_vm4, %v519_v63, %v523_v36  ;;  %v5250_v14 = vcombine.low %v2715_v45, %v2718_v60  ;;  %v532_v0 = vor.u32 %v531_v47, %v528_v26  ;;  %v5234_v5 = vrot.slane %v6714_v21, 9  ;;  %v7019_v60 = vld [vmem:[%s6606_s27 + $0xa0] sm:$0xf] }
  0x6e   : > { %v5014_v25 = vcombine.low %v514_v1, %v524_v4  ;;  %v542_v29 = vor.u32 %v541_v24, %v537_v15  ;;  %v547_v37 = vrot.slane %v545_v17, 5  ;;  %v2721_v54 = vrot.slane %v6720_v34, 5  ;;  %v7016_v4 = vld [vmem:[%s6606_s27 + $0x9c] sm:$0xf] }
  0x6f   : > { %v2724_v36 = vrot.slane %v6729_v42, 5  ;;  %5934 = vmatprep.mubr.msk.bf16.mxu0 %vm695_vm3, %v5250_v14  ;;  %v533_v16 = vrot.slane %v532_v0, 4  ;;  %v550_v57 = vshrl.u32 %v6989_v9, 16  ;;  %v553_v55 = vshll.u32 %v6989_v9, 16 }
  0x70   : > { %5780 = vmatprep.mubr.msk.bf16.mxu1 %vm695_vm3, %v5014_v25  ;;  %v559_v21 = vshll.u32 %v6992_v11, 16  ;;  %v543_v41 = vrot.slane %v542_v29, 4  ;;  %v2722_v34 = vsel %vm6898_vm7, %v5234_v5, %v2721_v54  ;;  %v2723_v42 = vrot.slane %v2721_v54, 4  ;;  %v250_v54 = vld [vmem:[%s6606_s27 + $0xa4] sm:$0x1] }
  0x71   : > { %v563_v30 = vshrl.u32 %v6992_v11, 16  ;;  %v538_v13 = vsel %vm6632_vm4, %v533_v16, %v537_v15  ;;  %v552_v63 = vrot.slane %v550_v57, 4  ;;  %v555_v45 = vrot.slane %v553_v55, 5 }
  0x72   : > { %v561_v2 = vrot.slane %v559_v21, 5  ;;  %v548_v52 = vsel %vm6632_vm4, %v543_v41, %v547_v37  ;;  %v2725_v1 = vsel %vm6898_vm7, %v2723_v42, %v2724_v36  ;;  %v569_v47 = vshll.u32 %v7000_v62, 16 }
  0x73   : > { %v565_v26 = vrot.slane %v563_v30, 4  ;;  %v5015_v24 = vcombine.low %v538_v13, %v548_v52  ;;  %v5251_v17 = vcombine.low %v2722_v34, %v2725_v1  ;;  %v556_v15 = vor.u32 %v555_v45, %v552_v63  ;;  %v7040_v52 = vld [vmem:[%s6606_s27 + $0xa8] sm:$0xf]  ;;  %v7043_v1 = vld [vmem:[%s6606_s27 + $0xac] sm:$0xf] }
  0x74   : > { %v5235_v25 = vrot.slane %v6751_v10, 9  ;;  %v571_v0 = vrot.slane %v569_v47, 5  ;;  %v2728_v5 = vrot.slane %v6757_v19, 5  ;;  %v2731_v29 = vrot.slane %v6762_v31, 5  ;;  %8760 = vst [vmem:[#allocation3_spill] sm:$0xff] %v7040_v52 }
  0x75   : > { %v566_v14 = vor.u32 %v565_v26, %v561_v2  ;;  %5781 = vmatmul.mubr.msk.bf16.gmra.mrb[20].mxu1 %vm695_vm3, %v5015_v24  ;;  %5935 = vmatmul.mubr.msk.bf16.gmra.mrb[4].mxu0 %vm695_vm3, %v5251_v17  ;;  %v557_v37 = vrot.slane %v556_v15, 4  ;;  %v574_v36 = vshrl.u32 %v7016_v4, 16  ;;  %v577_v16 = vshll.u32 %v7016_v4, 16 }
  0x76   : > { %v583_v10 = vshll.u32 %v7019_v60, 16  ;;  %v2729_v19 = vsel %vm6898_vm7, %v5235_v25, %v2728_v5  ;;  %v2730_v55 = vrot.slane %v2728_v5, 4  ;;  %v587_v31 = vshrl.u32 %v7019_v60, 16  ;;  %v7051_v5 = vld [vmem:[%s6606_s27 + $0xb0] sm:$0x1] }
  0x77   : > { %v567_v57 = vrot.slane %v566_v14, 4  ;;  %v562_v21 = vsel %vm6632_vm4, %v557_v37, %v561_v2  ;;  %v576_v41 = vrot.slane %v574_v36, 4  ;;  %v579_v34 = vrot.slane %v577_v16, 5  ;;  %8761 = vst [vmem:[#allocation4_spill] sm:$0xff] %v7051_v5 }
  0x78   : > { %v585_v42 = vrot.slane %v583_v10, 5  ;;  %v2732_v13 = vsel %vm6898_vm7, %v2730_v55, %v2731_v29  ;;  %v589_v63 = vrot.slane %v587_v31, 4  ;;  %v593_v45 = vshll.u32 %v250_v54, 16 }
  0x79   : > { %v572_v30 = vsel %vm6632_vm4, %v567_v57, %v571_v0  ;;  %v5252_v47 = vcombine.low %v2729_v19, %v2732_v13  ;;  %v580_v24 = vor.u32 %v579_v34, %v576_v41  ;;  %v5236_v2 = vrot.slane %v6789_v8, 9  ;;  %v7067_v34 = vld [vmem:[%s6606_s27 + $0xb4] sm:$0xf] }
  0x7a   : > { %v5016_v26 = vcombine.low %v562_v21, %v572_v30  ;;  %v590_v17 = vor.u32 %v589_v63, %v585_v42  ;;  %v595_v15 = vrot.slane %v593_v45, 5  ;;  %v2735_v25 = vrot.slane %v6792_v18, 5  ;;  %8762 = vst [vmem:[#allocation5_spill] sm:$0xff] %v7067_v34  ;;  %v7070_v30 = vld [vmem:[%s6606_s27 + $0xb8] sm:$0xf] }
  0x7b   : > { %v2738_v14 = vrot.slane %v6798_v28, 5  ;;  %5938 = vmatprep.mubr.msk.bf16.mxu0 %vm695_vm3, %v5252_v47  ;;  %v581_v0 = vrot.slane %v580_v24, 4  ;;  %v598_v29 = vshrl.u32 %v7040_v52, 16  ;;  %v601_v37 = vshll.u32 %v7040_v52, 16  ;;  %8763 = vst [vmem:[#allocation6_spill] sm:$0xff] %v7070_v30 }
  0x7c   : > { %5784 = vmatprep.mubr.msk.bf16.mxu1 %vm695_vm3, %v5016_v26  ;;  %v607_v8 = vshll.u32 %v7043_v1, 16  ;;  %v591_v54 = vrot.slane %v590_v17, 4  ;;  %v2736_v18 = vsel %vm6898_vm7, %v5236_v2, %v2735_v25  ;;  %v2737_v28 = vrot.slane %v2735_v25, 4 }
  0x7d   : > { %v611_v36 = vshrl.u32 %v7043_v1, 16  ;;  %v586_v16 = vsel %vm6632_vm4, %v581_v0, %v585_v42  ;;  %v600_v10 = vrot.slane %v598_v29, 4  ;;  %v603_v57 = vrot.slane %v601_v37, 5 }
  0x7e   : > { %v609_v19 = vrot.slane %v607_v8, 5  ;;  %v596_v55 = vsel %vm6632_vm4, %v591_v54, %v595_v15  ;;  %v2739_v31 = vsel %vm6898_vm7, %v2737_v28, %v2738_v14  ;;  %v617_v41 = vshll.u32 %v7051_v5, 16  ;;  %v7078_v15 = vld [vmem:[%s6606_s27 + $0xbc] sm:$0x1]  ;;  %v5141_v28 = vld [vmem:[%s6606_s27 + $0x6c] sm:$0xf] }
  0x7f   : > { %v613_v21 = vrot.slane %v611_v36, 4  ;;  %v5017_v13 = vcombine.low %v586_v16, %v596_v55  ;;  %v5253_v63 = vcombine.low %v2736_v18, %v2739_v31  ;;  %v604_v42 = vor.u32 %v603_v57, %v600_v10  ;;  %8764 = vst [vmem:[#allocation7_spill] sm:$0xff] %v7078_v15  ;;  %v5142_v55 = vld [vmem:[%s6606_s27 + $0x70] sm:$0xf]  ;;  %v5143_v31 = vld [vmem:[%s6606_s27 + $0x74] sm:$0x1] }
  0x80   : > { %v5237_v45 = vrot.slane %v6823_v7, 9  ;;  %v619_v47 = vrot.slane %v617_v41, 5  ;;  %v2742_v24 = vrot.slane %v6826_v20, 5  ;;  %v2745_v2 = vrot.slane %v6833_v35, 5  ;;  %v6430_v5 = vld [vmem:[%s6606_s27 + $0x64] sm:$0xf] }
  0x81   : > { %v614_v26 = vor.u32 %v613_v21, %v609_v19  ;;  %5785 = vmatmul.mubr.msk.bf16.gmra.mrb[24].mxu1 %vm695_vm3, %v5017_v13  ;;  %5939 = vmatmul.mubr.msk.bf16.gmra.mrb[8].mxu0 %vm695_vm3, %v5253_v63  ;;  %v605_v17 = vrot.slane %v604_v42, 4  ;;  %v622_v25 = vshrl.u32 %v7067_v34, 16  ;;  %v625_v14 = vshll.u32 %v7067_v34, 16 }
  0x82   : > { %v631_v7 = vshll.u32 %v7070_v30, 16  ;;  %v2743_v20 = vsel %vm6898_vm7, %v5237_v45, %v2742_v24  ;;  %v2744_v35 = vrot.slane %v2742_v24, 4  ;;  %v635_v29 = vshrl.u32 %v7070_v30, 16 }
  0x83   : > { %v615_v0 = vrot.slane %v614_v26, 4  ;;  %v610_v37 = vsel %vm6632_vm4, %v605_v17, %v609_v19  ;;  %v624_v8 = vrot.slane %v622_v25, 4  ;;  %v627_v54 = vrot.slane %v625_v14, 5 }
  0x84   : > { %v633_v18 = vrot.slane %v631_v7, 5  ;;  %v2746_v16 = vsel %vm6898_vm7, %v2744_v35, %v2745_v2  ;;  %v637_v10 = vrot.slane %v635_v29, 4  ;;  %v641_v57 = vshll.u32 %v7078_v15, 16  ;;  %v7112_v35 = vld [vmem:[%s6606_s27] sm:$0xf] }
  0x85   : > { %v620_v36 = vsel %vm6632_vm4, %v615_v0, %v619_v47  ;;  %v5254_v41 = vcombine.low %v2743_v20, %v2746_v16  ;;  %v628_v13 = vor.u32 %v627_v54, %v624_v8  ;;  %v5238_v19 = vrot.slane %v6857_v23, 9  ;;  %v7115_v29 = vld [vmem:[%s6606_s27 + $0x4] sm:$0xf]  ;;  %v5144_v8 = vld [vmem:[%s6606_s27 + $0x78] sm:$0xf] }
  0x86   : > { %v5018_v21 = vcombine.low %v610_v37, %v620_v36  ;;  %v638_v63 = vor.u32 %v637_v10, %v633_v18  ;;  %v643_v42 = vrot.slane %v641_v57, 5  ;;  %v2749_v45 = vrot.slane %v6862_v39, 5  ;;  %v5145_v54 = vld [vmem:[%s6606_s27 + $0x7c] sm:$0xf]  ;;  %v5146_v16 = vld [vmem:[%s6606_s27 + $0x80] sm:$0x1] }
  0x87   : > { %v2752_v26 = vrot.slane %v6867_v59, 5  ;;  %5942 = vmatprep.mubr.msk.bf16.mxu0 %vm695_vm3, %v5254_v41  ;;  %v629_v47 = vrot.slane %v628_v13, 4  ;;  %v5239_v24 = vrot.slane %v5141_v28, 9  ;;  %v2756_v2 = vrot.slane %v5142_v55, 5  ;;  %v5147_v10 = vld [vmem:[%s6606_s27 + $0x84] sm:$0xf] }
  0x88   : > { %5788 = vmatprep.mubr.msk.bf16.mxu1 %vm695_vm3, %v5018_v21  ;;  %v2759_v17 = vrot.slane %v5143_v31, 5  ;;  %v639_v25 = vrot.slane %v638_v63, 4  ;;  %v2750_v23 = vsel %vm6898_vm7, %v5238_v19, %v2749_v45  ;;  %v2751_v39 = vrot.slane %v2749_v45, 4  ;;  %v5148_v55 = vld [vmem:[%s6606_s27 + $0x88] sm:$0xf] }
  0x89   : > { %v634_v59 = vsel %vm6632_vm4, %v629_v47, %v633_v18  ;;  %v2757_v14 = vsel %vm6898_vm7, %v5239_v24, %v2756_v2  ;;  %v2758_v7 = vrot.slane %v2756_v2, 4  ;;  %v5036_v37 = vcombine.low %v7112_v35, %v7115_v29  ;;  %v5149_v41 = vld [vmem:[%s6606_s27 + $0x8c] sm:$0x1]  ;;  %v5151_v13 = vld [vmem:[%s6606_s27 + $0x94] sm:$0xf] }
  0x8a   : > { %v644_v0 = vsel %vm6632_vm4, %v639_v25, %v643_v42  ;;  %v2753_v20 = vsel %vm6898_vm7, %v2751_v39, %v2752_v26  ;;  %v5240_v31 = vrot.slane %v5144_v8, 9  ;;  %v2763_v21 = vrot.slane %v5145_v54, 5  ;;  %v5150_v42 = vld [vmem:[%s6606_s27 + $0x90] sm:$0xf]  ;;  %v5152_v45 = vld [vmem:[%s6606_s27 + $0x98] sm:$0x1] }
  0x8b   : > { %v5019_v18 = vcombine.low %v634_v59, %v644_v0  ;;  %v5255_v28 = vcombine.low %v2750_v23, %v2753_v20  ;;  %v2760_v36 = vsel %vm6898_vm7, %v2758_v7, %v2759_v17  ;;  %v2766_v19 = vrot.slane %v5146_v16, 5  ;;  %v5153_v2 = vld [vmem:[%s6606_s27 + $0x9c] sm:$0xf]  ;;  %v5154_v17 = vld [vmem:[%s6606_s27 + $0xa0] sm:$0xf] }
  0x8c   : > { %v5256_v57 = vcombine.low %v2757_v14, %v2760_v36  ;;  %v5241_v63 = vrot.slane %v5147_v10, 9  ;;  %v2764_v26 = vsel %vm6898_vm7, %v5240_v31, %v2763_v21  ;;  %v2765_v47 = vrot.slane %v2763_v21, 4  ;;  %v7139_v25 = vld [vmem:[%s6606_s27 + $0xc] sm:$0xf]  ;;  %v7142_v23 = vld [vmem:[%s6606_s27 + $0x10] sm:$0xf] }
  0x8d   : > { %5789 = vmatmul.mubr.msk.bf16.gmra.mrb[28].mxu1 %vm695_vm3, %v5019_v18  ;;  %5943 = vmatmul.mubr.msk.bf16.gmra.mrb[12].mxu0 %vm695_vm3, %v5255_v28  ;;  %v2770_v24 = vrot.slane %v5148_v55, 5  ;;  %v5037_v39 = vcombine.low %v7139_v25, %v7142_v23  ;;  %v6409_v59 = vld [vmem:[%s8730_s1 + $0x4] sm:$0x3]  ;;  %v2773_v7 = vrot.slane %v5149_v41, 5  ;;  %v2777_v0 = vrot.slane %v5151_v13, 5 }
  0x8e   : > { %5794 = vmatprep.mubr.msk.bf16.mxu1 %vm695_vm3, %v5036_v37  ;;  %5946 = vmatprep.mubr.msk.bf16.mxu0 %vm695_vm3, %v5256_v57  ;;  %v1431_v14 = vsel %vm744_vm0, %v6409_v59, 0  ;;  %v5155_v20 = vld [vmem:[%s6606_s27 + $0xa4] sm:$0x1]  ;;  %v2767_v37 = vsel %vm6898_vm7, %v2765_v47, %v2766_v19  ;;  %v7154_v8 = vld [vmem:[%s6606_s27 + $0x18] sm:$0xf]  ;;  %v5242_v10 = vrot.slane %v5150_v42, 9 }
  0x8f   : > { %v7157_v54 = vld [vmem:[%s6606_s27 + $0x1c] sm:$0xf]  ;;  %v2771_v28 = vsel %vm6898_vm7, %v5241_v63, %v2770_v24  ;;  %v2772_v36 = vrot.slane %v2770_v24, 4  ;;  %v5257_v16 = vcombine.low %v2764_v26, %v2767_v37  ;;  %v2779_v57 = vrot.slane %v2777_v0, 4  ;;  %v5157_v19 = vld [vmem:[%s6606_s27 + $0xac] sm:$0xf] }
  0x90   : > { %v5038_v18 = vcombine.low %v7154_v8, %v7157_v54  ;;  %v2780_v55 = vrot.slane %v5152_v45, 5  ;;  %v5243_v21 = vrot.slane %v5153_v2, 9  ;;  %v2784_v41 = vrot.slane %v5154_v17, 5  ;;  %v5160_v59 = vld [vmem:[%s6606_s27 + $0xb8] sm:$0xf] }
  0x91   : > { %v2774_v31 = vsel %vm6898_vm7, %v2772_v36, %v2773_v7  ;;  %v2787_v13 = vrot.slane %v5155_v20, 5  ;;  %v7170_v63 = vld [vmem:[%s8730_s1 + $0x6] sm:$0x3]  ;;  %v2778_v45 = vsel %vm6898_vm7, %v5242_v10, %v2777_v0  ;;  %v2791_v24 = vrot.slane %v5157_v19, 5  ;;  %v5158_v7 = vld [vmem:[%s6606_s27 + $0xb0] sm:$0x1] }
  0x92   : > { %v5258_v47 = vcombine.low %v2771_v28, %v2774_v31  ;;  %v2786_v42 = vrot.slane %v2784_v41, 4  ;;  %v2781_v26 = vsel %vm6898_vm7, %v2779_v57, %v2780_v55  ;;  %v2785_v2 = vsel %vm6898_vm7, %v5243_v21, %v2784_v41  ;;  %v5159_v0 = vld [vmem:[%s6606_s27 + $0xb4] sm:$0xf]  ;;  %v5161_v20 = vld [vmem:[%s6606_s27 + $0xbc] sm:$0x1] }
  0x93   : > { %v7191_v37 = vld [vmem:[%s6606_s27 + $0x24] sm:$0xf]  ;;  %v5259_v36 = vcombine.low %v2778_v45, %v2781_v26  ;;  %v2793_v55 = vrot.slane %v2791_v24, 4  ;;  %v2794_v31 = vrot.slane %v5158_v7, 5  ;;  %v5245_v21 = vrot.slane %v5159_v0, 9 }
  0x94   : > { %v2788_v17 = vsel %vm6898_vm7, %v2786_v42, %v2787_v13  ;;  %v2801_v13 = vrot.slane %v5161_v20, 5  ;;  %v5163_v19 = vld [vmem:[%s6606_s27 + $0xc4] sm:$0xf]  ;;  %v5162_v45 = vld [vmem:[%s6606_s27 + $0xc0] sm:$0xf] }
  0x95   : > { %5795 = vmatmul.mubr.msk.bf16.vlgmr.msra.gmra.mrb[0].mxu1 %vm695_vm3, %v5037_v39  ;;  %5947 = vmatmul.mubr.msk.bf16.gmra.mrb[16].mxu0 %vm695_vm3, %v5257_v16  ;;  %v5156_v39 = vld [vmem:[%s6606_s27 + $0xa8] sm:$0xf]  ;;  %v5040_v16 = vcombine.low %v6733_v44, %v6739_v56  ;;  %v5260_v10 = vcombine.low %v2785_v2, %v2788_v17  ;;  %v2795_v56 = vsel %vm6898_vm7, %v2793_v55, %v2794_v31  ;;  %v5246_v7 = vrot.slane %v5162_v45, 9 }
  0x96   : > { %5827 = vmatpush3.bf16.msra.mxu1 %v1431_v14  ;;  %5798 = vmatprep.mubr.msk.bf16.mxu1 %vm695_vm3, %v5038_v18  ;;  %v2798_v14 = vrot.slane %v5160_v59, 5  ;;  %v7194_v18 = vld [vmem:[%s6606_s27 + $0x28] sm:$0xf]  ;;  %v5244_v57 = vrot.slane %v5156_v39, 9  ;;  %v5041_v2 = vcombine.low %v6770_v50, %v6776_v51  ;;  %v5046_v55 = vcombine.low %v6928_v58, %v6933_v43  ;;  %v7277_v58 = vld [vmem:[%s6606_s27 + $0x40] sm:$0xf] }
  0x97   : > { %5950 = vmatprep.mubr.msk.bf16.mxu0 %vm695_vm3, %v5258_v47  ;;  %6325 = vmatprep.subr.msk.bf16.mxu1 %vm744_vm0, %v7170_v63  ;;  %v5039_v28 = vcombine.low %v7191_v37, %v7194_v18  ;;  %v2805_v47 = vrot.slane %v5163_v19, 5  ;;  %v5164_v26 = vld [vmem:[%s6606_s27 + $0xc8] sm:$0x1]  ;;  %v3965_v31 = vsel %vm744_vm0, %v6966_v46, 0  ;;  %v5047_v45 = vcombine.low %v6955_v27, %v6958_v33 }
  0x98   : > { %v2800_v41 = vrot.slane %v2798_v14, 4  ;;  %v2792_v44 = vsel %vm6898_vm7, %v5244_v57, %v2791_v24  ;;  %v2799_v59 = vsel %vm6898_vm7, %v5245_v21, %v2798_v14  ;;  %v5042_v24 = vcombine.low %v6806_v40, %v6809_v48  ;;  %v7228_v40 = vld [vmem:[%s6606_s27 + $0x18] sm:$0xf]  ;;  %v7231_v48 = vld [vmem:[%s6606_s27 + $0x1c] sm:$0xf] }
  0x99   : > { %v5261_v17 = vcombine.low %v2792_v44, %v2795_v56  ;;  %v2807_v0 = vrot.slane %v2805_v47, 4  ;;  %v2808_v20 = vrot.slane %v5164_v26, 5  ;;  %v2806_v50 = vsel %vm6898_vm7, %v5246_v7, %v2805_v47  ;;  %v7281_v46 = vld [vmem:[%s6606_s27 + $0x48] sm:$0xf]  ;;  %v7294_v47 = vld [vmem:[%s6606_s27 + $0x14] sm:$0x1] }
  0x9a   : > { %v2802_v42 = vsel %vm6898_vm7, %v2800_v41, %v2801_v13  ;;  %v5043_v14 = vcombine.low %v6840_v53, %v6846_v61  ;;  %v7247_v53 = vld [vmem:[%s6606_s27 + $0x28] sm:$0xf]  ;;  %v7250_v61 = vld [vmem:[%s6606_s27 + $0x30] sm:$0xf]  ;;  %v7284_v13 = vld [vmem:[%s6606_s27 + $0x4c] sm:$0xf] }
  0x9b   : > { %v5262_v39 = vcombine.low %v2799_v59, %v2802_v42  ;;  %v2809_v51 = vsel %vm6898_vm7, %v2807_v0, %v2808_v20  ;;  %v7268_v41 = vld [vmem:[%s8730_s1 + $0x10] sm:$0x3]  ;;  %v7289_v19 = vld [vmem:[%s6606_s27 + $0x8] sm:$0x1]  ;;  %v1229_v56 = vrot.slane %v7142_v23, 5  ;;  %v1232_v59 = vrot.slane %v7294_v47, 5 }
  0x9c   : > { %v1225_v44 = vrot.slane %v7289_v19, 5  ;;  %v5048_v23 = vcombine.low %v6989_v9, %v6992_v11  ;;  %v7312_v7 = vld [vmem:[%s6606_s27 + $0x58] sm:$0xf]  ;;  %v1236_v9 = vrot.slane %v7157_v54, 5  ;;  %v7381_v33 = vld [vmem:[%s6606_s27 + $0x88] sm:$0xf] }
  0x9d   : > { %5799 = vmatmul.mubr.msk.bf16.gmra.mrb[4].mxu1 %vm695_vm3, %v5039_v28  ;;  %5951 = vmatmul.mubr.msk.bf16.gmra.mrb[20].mxu0 %vm695_vm3, %v5259_v36  ;;  %v5263_v28 = vcombine.low %v2806_v50, %v2809_v51  ;;  %v5044_v36 = vcombine.low %v6877_v6, %v6880_v22  ;;  %v7253_v6 = vld [vmem:[%s6606_s27 + $0x34] sm:$0xf]  ;;  %v5045_v22 = vcombine.low %v6894_v49, %v6910_v38  ;;  %v7274_v49 = vld [vmem:[%s6606_s27 + $0x3c] sm:$0xf]  ;;  %v7319_v50 = vld [vmem:[%s6606_s27 + $0x60] sm:$0xf] }
  0x9e   : > { %5802 = vmatprep.mubr.msk.bf16.mxu1 %vm695_vm3, %v5040_v16  ;;  %5954 = vmatprep.mubr.msk.bf16.mxu0 %vm695_vm3, %v5260_v10  ;;  %v5329_v16 = vcombine.low %v7228_v40, %v7231_v48  ;;  %v7244_v10 = vld [vmem:[%s6606_s27 + $0x24] sm:$0xf]  ;;  %v5331_v21 = vcombine.low %v7250_v61, %v7253_v6  ;;  %v5332_v26 = vcombine.low %v7274_v49, %v7277_v58  ;;  %v5070_v27 = vrot.slane %v7154_v8, 9  ;;  %v7405_v0 = vld [vmem:[%s6606_s27 + $0x94] sm:$0xf] }
  0x9f   : > { %v5330_v57 = vcombine.low %v7244_v10, %v7247_v53  ;;  %8765 = vst [vmem:[#allocation8_spill] sm:$0xff] %v7319_v50  ;;  %v5051_v51 = vcombine.low %v7067_v34, %v7070_v30  ;;  %v7413_v19 = vsel %vm744_vm0, %v7170_v63, 0  ;;  %v7431_v8 = vld [vmem:[%s6606_s27 + $0x9c] sm:$0xf]  ;;  %v7443_v54 = vld [vmem:[%s6606_s27 + $0xa8] sm:$0xf] }
  0xa0   : > { %v6421_v42 = vld [vmem:[%s6606_s27 + $0x40] sm:$0xf]  ;;  %v7512_v34 = vld [vmem:[%s6606_s27 + $0xc4] sm:$0xf] }
  0xa5   : > { %5803 = vmatmul.mubr.msk.bf16.gmra.mrb[8].mxu1 %vm695_vm3, %v5041_v2  ;;  %5955 = vmatmul.mubr.msk.bf16.gmra.mrb[24].mxu0 %vm695_vm3, %v5261_v17  ;;  %v7395_v17 = vld [vmem:[%s6606_s27 + $0x90] sm:$0xf]  ;;  %v7448_v2 = vld [vmem:[%s6606_s27 + $0xac] sm:$0xf] }
  0xa6   : > { %5806 = vmatprep.mubr.msk.bf16.mxu1 %vm695_vm3, %v5042_v24  ;;  %5958 = vmatprep.mubr.msk.bf16.mxu0 %vm695_vm3, %v5262_v39  ;;  %v5333_v24 = vcombine.low %v7281_v46, %v7284_v13  ;;  %v7309_v39 = vld [vmem:[%s6606_s27 + $0x54] sm:$0xf]  ;;  %8771 = vst [vmem:[#allocation14_spill] sm:$0xff] %v7395_v17 }
  0xa7   : > { %v5334_v47 = vcombine.low %v7309_v39, %v7312_v7 }
  0xad   : > { %5807 = vmatmul.mubr.msk.bf16.gmra.mrb[12].mxu1 %vm695_vm3, %v5043_v14  ;;  %5959 = vmatmul.mubr.msk.bf16.gmra.mrb[28].mxu0 %vm695_vm3, %v5263_v28  ;;  %v1257_v28 = vrot.slane %v6421_v42, 5  ;;  %v6422_v42 = vld [vmem:[%s6606_s27 + $0x4c] sm:$0xf] }
  0xae   : > { %5810 = vmatprep.mubr.msk.bf16.mxu1 %vm695_vm3, %v5044_v36  ;;  %5964 = vmatprep.mubr.msk.bf16.mxu0 %vm695_vm3, %v5329_v16  ;;  %v7326_v36 = vld [vmem:[%s6606_s27 + $0x64] sm:$0xf] }
  0xb5   : > { %5811 = vmatmul.mubr.msk.bf16.gmra.mrb[16].mxu1 %vm695_vm3, %v5045_v22  ;;  %5965 = vmatmul.mubr.msk.bf16.vlgmr.msra.gmra.mrb[0].mxu0 %vm695_vm3, %v5330_v57  ;;  %v7360_v22 = vld [vmem:[%s6606_s27 + $0x7c] sm:$0xf]  ;;  %v1231_v57 = vrot.slane %v1229_v56, 4 }
  0xb6   : > { %5997 = vmatpush3.bf16.msra.mxu0 %v3965_v31  ;;  %5814 = vmatprep.mubr.msk.bf16.mxu1 %vm695_vm3, %v5046_v55  ;;  %v1222_v55 = vrot.slane %v7115_v29, 5  ;;  %v7352_v31 = vld [vmem:[%s6606_s27 + $0x70] sm:$0xf]  ;;  %8769 = vst [vmem:[#allocation12_spill] sm:$0xff] %v7360_v22  ;;  %v5069_v29 = vrot.slane %v7139_v25, 9 }
  0xb7   : > { %5968 = vmatprep.mubr.msk.bf16.mxu0 %vm695_vm3, %v5331_v21  ;;  %6331 = vmatprep.subr.msk.bf16.mxu0 %vm744_vm0, %v7268_v41  ;;  %v5049_v21 = vcombine.low %v7016_v4, %v7019_v60  ;;  %8767 = vst [vmem:[#allocation10_spill] sm:$0xff] %v7352_v31  ;;  %v7355_v4 = vld [vmem:[%s6606_s27 + $0x78] sm:$0xf]  ;;  %v7373_v25 = vld [vmem:[%s6606_s27 + $0x84] sm:$0xf]  ;;  %v7391_v16 = vsel %vm6898_vm7, %v1231_v57, %v1232_v59  ;;  %v1243_v59 = vrot.slane %v7194_v18, 5 }
  0xb8   : > { %8768 = vst [vmem:[#allocation11_spill] sm:$0xff] %v7355_v4  ;;  %v1224_v14 = vrot.slane %v1222_v55, 4  ;;  %8770 = vst [vmem:[#allocation13_spill] sm:$0xff] %v7373_v25  ;;  %v7387_v20 = vsel %vm6898_vm7, %v5069_v29, %v1229_v56  ;;  %v1238_v56 = vrot.slane %v1236_v9, 4  ;;  %v6420_v18 = vld [vmem:[%s6606_s27 + $0x38] sm:$0x1] }
  0xbd   : > { %5815 = vmatmul.mubr.msk.bf16.gmra.mrb[20].mxu1 %vm695_vm3, %v5047_v45  ;;  %5969 = vmatmul.mubr.msk.bf16.gmra.mrb[4].mxu0 %vm695_vm3, %v5332_v26  ;;  %v7343_v26 = vld [vmem:[%s6606_s27 + $0x6c] sm:$0xf]  ;;  %v5068_v45 = vrot.slane %v7112_v35, 9 }
  0xbe   : > { %5818 = vmatprep.mubr.msk.bf16.mxu1 %vm695_vm3, %v5048_v23  ;;  %5972 = vmatprep.mubr.msk.bf16.mxu0 %vm695_vm3, %v5333_v24  ;;  %8766 = vst [vmem:[#allocation9_spill] sm:$0xff] %v7343_v26  ;;  %v5050_v23 = vcombine.low %v7040_v52, %v7043_v1  ;;  %v5335_v24 = vcombine.low %v7319_v50, %v7326_v36  ;;  %v8774_v52 = vshll.u32 %v7228_v40, 16 }
  0xbf   : > { %v5336_v35 = vcombine.low %v7343_v26, %v7352_v31  ;;  %v1223_v60 = vsel %vm6898_vm7, %v5068_v45, %v1222_v55  ;;  %v1226_v55 = vsel %vm6898_vm7, %v1224_v14, %v1225_v44  ;;  %v6416_v45 = vld [vmem:[%s6606_s27 + $0x20] sm:$0x1]  ;;  %v6417_v14 = vld [vmem:[%s6606_s27 + $0x34] sm:$0xf]  ;;  %v1278_v31 = vrot.slane %v6430_v5, 5 }
  0xc0   : > { %v1239_v29 = vrot.slane %v6416_v45, 5  ;;  %v1250_v57 = vrot.slane %v6417_v14, 5  ;;  %v5085_v63 = vcombine.low %v1223_v60, %v1226_v55  ;;  %v5071_v14 = vrot.slane %v7191_v37, 9  ;;  %v6418_v55 = vld [vmem:[%s6606_s27 + $0x2c] sm:$0x1] }
  0xc1   : > { %v1245_v60 = vrot.slane %v1243_v59, 4  ;;  %v1253_v37 = vrot.slane %v6420_v18, 5  ;;  %v6425_v45 = vld [vmem:[%s6606_s27 + $0x58] sm:$0xf]  ;;  %v6428_v26 = vld [vmem:[%s6606_s27 + $0x54] sm:$0xf] }
  0xc2   : > { %v1252_v44 = vrot.slane %v1250_v57, 4  ;;  %v7460_v18 = vsel %vm6898_vm7, %v5071_v14, %v1243_v59  ;;  %v7477_v14 = vld [vmem:[%s6606_s27 + $0xb4] sm:$0xf]  ;;  %v5075_v30 = vrot.slane %v6428_v26, 9  ;;  %v8775_v5 = vshrl.u32 %v7231_v48, 16 }
  0xc5   : > { %5819 = vmatmul.mubr.msk.bf16.gmra.mrb[24].mxu1 %vm695_vm3, %v5049_v21  ;;  %5973 = vmatmul.mubr.msk.bf16.gmra.mrb[8].mxu0 %vm695_vm3, %v5334_v47  ;;  %v7434_v21 = vld [vmem:[%s6606_s27 + $0xa0] sm:$0xf]  ;;  %v1246_v47 = vrot.slane %v6418_v55, 5 }
  0xc6   : > { %5822 = vmatprep.mubr.msk.bf16.mxu1 %vm695_vm3, %v5050_v23  ;;  %5976 = vmatprep.mubr.msk.bf16.mxu0 %vm695_vm3, %v5335_v24  ;;  %v7425_v24 = vsel %vm6898_vm7, %v5070_v27, %v1236_v9  ;;  %v7438_v23 = vsel %vm6898_vm7, %v1238_v56, %v1239_v29  ;;  %v6419_v27 = vld [vmem:[%s6606_s27 + $0x30] sm:$0xf]  ;;  %v6424_v56 = vld [vmem:[%s6606_s27 + $0x44] sm:$0x1] }
  0xc7   : > { %v5072_v9 = vrot.slane %v6419_v27, 9  ;;  %v7468_v27 = vsel %vm6898_vm7, %v1245_v60, %v1246_v47  ;;  %v6423_v47 = vld [vmem:[%s6606_s27 + $0x3c] sm:$0xf]  ;;  %v1260_v59 = vrot.slane %v6424_v56, 5  ;;  %v7504_v56 = vld [vmem:[%s6606_s27 + $0xc0] sm:$0xf] }
  0xc8   : > { %v5073_v60 = vrot.slane %v6423_v47, 9  ;;  %v6426_v47 = vld [vmem:[%s6606_s27 + $0x48] sm:$0xf] }
  0xc9   : > { %v7472_v29 = vsel %vm6898_vm7, %v5072_v9, %v1250_v57  ;;  %v7490_v57 = vsel %vm6898_vm7, %v1252_v44, %v1253_v37  ;;  %v1259_v9 = vrot.slane %v1257_v28, 4  ;;  %v5074_v15 = vrot.slane %v6426_v47, 9 }
  0xca   : > { %v7516_v37 = vsel %vm6898_vm7, %v5073_v60, %v1257_v28  ;;  %v3488_v28 = vrot.slane %v8774_v52, 5  ;;  %v8777_v52 = vcombine.low %v7373_v25, %v7381_v33 }
  0xcb   : > { %v7520_v47 = vsel %vm6898_vm7, %v1259_v9, %v1260_v59  ;;  %v7536_v59 = vld [vmem:[%s6606_s27 + $0xcc] sm:$0xf]  ;;  %v3498_v9 = vrot.slane %v8775_v5, 4 }
  0xcd   : > { %5823 = vmatmul.mubr.msk.bf16.gmra.mrb[28].mxu1 %vm695_vm3, %v5051_v51  ;;  %5977 = vmatmul.mubr.msk.bf16.gmra.mrb[12].mxu0 %vm695_vm3, %v5336_v35  ;;  %v1264_v51 = vrot.slane %v6422_v42, 5  ;;  %v8772_v35 = vcombine.low %v7355_v4, %v7360_v22  ;;  %v3492_v42 = vshll.u32 %v7231_v48, 16  ;;  %v6427_v4 = vld [vmem:[%s6606_s27 + $0x50] sm:$0x1]  ;;  %v6429_v22 = vld [vmem:[%s6606_s27 + $0x5c] sm:$0x1] }
  0xce   : > { %5828 = vmatprep.mubr.msk.bf16.mxu1 %vm695_vm3, %v5085_v63  ;;  %v1267_v44 = vrot.slane %v6427_v4, 5  ;;  %v1274_v55 = vrot.slane %v6429_v22, 5  ;;  %v8773_v4 = vshrl.u32 %v7228_v40, 16  ;;  %v7557_v48 = vld [vmem:[%s6606_s27 + $0xd0] sm:$0xf] }
  0xcf   : > { %5980 = vmatprep.mubr.msk.bf16.mxu0 %vm695_vm3, %v8772_v35  ;;  %v1271_v35 = vrot.slane %v6425_v45, 5  ;;  %v1266_v45 = vrot.slane %v1264_v51, 4  ;;  %v7531_v60 = vsel %vm6898_vm7, %v5074_v15, %v1264_v51  ;;  %v7538_v22 = vrot.slane %v3492_v42, 5  ;;  %v7560_v51 = vld [vmem:[%s6606_s27 + $0x20] sm:$0x1] }
  0xd0   : > { %v3485_v50 = vrot.slane %v8773_v4, 4  ;;  %v8776_v4 = vcombine.low %v7387_v20, %v7391_v16  ;;  %8778 = vst [vmem:[#allocation15_spill] sm:$0xff] %v7560_v51  ;;  %v1285_v20 = vrot.slane %v6910_v38, 5  ;;  %v3516_v16 = vshll.u32 %v7247_v53, 16  ;;  %v6435_v15 = vld [vmem:[%s6606_s27 + $0x74] sm:$0x1] }
  0xd1   : > { %v1273_v63 = vrot.slane %v1271_v35, 4  ;;  %v7554_v40 = vsel %vm6898_vm7, %v1266_v45, %v1267_v44  ;;  %v8779_v42 = vcombine.low %v7425_v24, %v7438_v23  ;;  %v7571_v5 = vsel %vm6898_vm7, %v5075_v30, %v1271_v35  ;;  %v6431_v44 = vld [vmem:[%s6606_s27 + $0x60] sm:$0xf]  ;;  %v6432_v24 = vld [vmem:[%s6606_s27 + $0x68] sm:$0x1] }
  0xd2   : > { %v5076_v45 = vrot.slane %v6431_v44, 9  ;;  %v8781_v38 = vshll.u32 %v7244_v10, 16  ;;  %v1280_v23 = vrot.slane %v1278_v31, 4  ;;  %v1281_v35 = vrot.slane %v6432_v24, 5  ;;  %v7598_v24 = vld [vmem:[%s6606_s27 + $0x2c] sm:$0x1] }
  0xd3   : > { %v7584_v30 = vsel %vm6898_vm7, %v1273_v63, %v1274_v55  ;;  %v1287_v63 = vrot.slane %v1285_v20, 4 }
  0xd4   : > { %v3512_v26 = vrot.slane %v8781_v38, 5  ;;  %v3502_v38 = vshll.u32 %v7560_v51, 16  ;;  %v1292_v51 = vrot.slane %v6933_v43, 5 }
  0xd5   : > { %5829 = vmatmul.mubr.msk.bf16.vlgmr.msra.gmra.mrb[0].mxu1 %vm695_vm3, %v8776_v4  ;;  %5981 = vmatmul.mubr.msk.bf16.gmra.mrb[16].mxu0 %vm695_vm3, %v8777_v52  ;;  %v8780_v4 = vshrl.u32 %v7244_v10, 16  ;;  %v6433_v10 = vld [vmem:[%s8730_s1 + $0x8] sm:$0x3] }
  0xd6   : > { %5861 = vmatpush3.bf16.msra.mxu1 %v7413_v19  ;;  %5832 = vmatprep.mubr.msk.bf16.mxu1 %vm695_vm3, %v8779_v42  ;;  %v8782_v19 = vcombine.low %v7395_v17, %v7405_v0  ;;  %v3489_v42 = vor.u32 %v3488_v28, %v3485_v50  ;;  %v1288_v17 = vrot.slane %v6435_v15, 5  ;;  %v7600_v50 = vrot.slane %v3516_v16, 5 }
  0xd7   : > { %v3509_v52 = vrot.slane %v8780_v4, 4  ;;  %6327 = vmatprep.subr.msk.bf16.mxu1 %vm744_vm0, %v6433_v10  ;;  %v3499_v4 = vor.u32 %v3498_v9, %v7538_v22  ;;  %v8783_v28 = vshrl.u32 %v7247_v53, 16  ;;  %v5091_v10 = vcombine.low %v7531_v60, %v7554_v40  ;;  %v6441_v9 = vld [vmem:[%s6606_s27 + $0x90] sm:$0xf] }
  0xd8   : > { %5984 = vmatprep.mubr.msk.bf16.mxu0 %vm695_vm3, %v8782_v19  ;;  %v6434_v19 = vld [vmem:[%s6606_s27 + $0x6c] sm:$0xf]  ;;  %v7615_v15 = vsel %vm6898_vm7, %v1280_v23, %v1281_v35  ;;  %v7617_v53 = vrot.slane %v3489_v42, 4  ;;  %v3540_v16 = vshll.u32 %v7253_v6, 16  ;;  %v7622_v40 = vrot.slane %v3502_v38, 5 }
  0xd9   : > { %v5077_v55 = vrot.slane %v6434_v19, 9  ;;  %v3522_v25 = vrot.slane %v8783_v28, 4  ;;  %v3513_v44 = vor.u32 %v3512_v26, %v3509_v52  ;;  %v7611_v19 = vsel %vm6898_vm7, %v5076_v45, %v1278_v31  ;;  %v6436_v38 = vld [vmem:[%s6606_s27 + $0x78] sm:$0xf] }
  0xda   : > { %v7620_v60 = vrot.slane %v3499_v4, 4  ;;  %v3526_v31 = vshll.u32 %v7598_v24, 16  ;;  %v8784_v26 = vcombine.low %v7460_v18, %v7468_v27  ;;  %v8785_v45 = vcombine.low %v7431_v8, %v7434_v21 }
  0xdb   : > { %v7626_v43 = vsel %vm6898_vm7, %v5077_v55, %v1285_v20  ;;  %v7639_v52 = vsel %vm6898_vm7, %v1287_v63, %v1288_v17  ;;  %v3523_v20 = vor.u32 %v3522_v25, %v7600_v50  ;;  %v8786_v23 = vshrl.u32 %v7250_v61, 16  ;;  %v6437_v63 = vld [vmem:[%s6606_s27 + $0x80] sm:$0x1] }
  0xdc   : > { %v8787_v42 = vshll.u32 %v7250_v61, 16  ;;  %v8788_v27 = vcombine.low %v7472_v29, %v7490_v57  ;;  %v8789_v18 = vcombine.low %v7443_v54, %v7448_v2  ;;  %v3514_v17 = vrot.slane %v3513_v44, 4  ;;  %v7734_v61 = vld [vmem:[%s6606_s27 + $0x50] sm:$0x1] }
  0xdd   : > { %5833 = vmatmul.mubr.msk.bf16.gmra.mrb[4].mxu1 %vm695_vm3, %v8784_v26  ;;  %5985 = vmatmul.mubr.msk.bf16.gmra.mrb[20].mxu0 %vm695_vm3, %v8785_v45  ;;  %v3533_v35 = vrot.slane %v8786_v23, 4  ;;  %v5078_v55 = vrot.slane %v6436_v38, 9  ;;  %v1294_v25 = vrot.slane %v1292_v51, 4  ;;  %v1295_v28 = vrot.slane %v6437_v63, 5  ;;  %v7657_v26 = vld [vmem:[%s6606_s27 + $0x38] sm:$0x1] }
  0xde   : > { %v3536_v4 = vrot.slane %v8787_v42, 5  ;;  %5836 = vmatprep.mubr.msk.bf16.mxu1 %vm695_vm3, %v8788_v27  ;;  %5988 = vmatprep.mubr.msk.bf16.mxu0 %vm695_vm3, %v8789_v18  ;;  %8790 = vst [vmem:[#allocation16_spill] sm:$0xff] %v7657_v26  ;;  %v3495_v29 = vsel %vm6632_vm4, %v7617_v53, %v7538_v22  ;;  %v7665_v57 = vrot.slane %v3540_v16, 5  ;;  %v8791_v44 = vshrl.u32 %v7253_v6, 16 }
  0xdf   : > { %v3505_v23 = vsel %vm6632_vm4, %v7620_v60, %v7622_v40  ;;  %v7677_v27 = vsel %vm744_vm0, %v7268_v41, 0  ;;  %v3564_v22 = vshll.u32 %v7277_v58, 16  ;;  %v3524_v53 = vrot.slane %v3523_v20, 4 }
  0xe0   : > { %v3546_v45 = vrot.slane %v8791_v44, 4  ;;  %v3528_v16 = vrot.slane %v3526_v31, 5  ;;  %v3537_v6 = vor.u32 %v3536_v4, %v3533_v35  ;;  %v3550_v18 = vshll.u32 %v7657_v26, 16  ;;  %v6438_v31 = vld [vmem:[%s6606_s27 + $0x88] sm:$0xf] }
  0xe1   : > { %v3519_v60 = vsel %vm6632_vm4, %v3514_v17, %v7600_v50  ;;  %v7686_v40 = vsel %vm6898_vm7, %v5078_v55, %v1292_v51  ;;  %v7690_v41 = vsel %vm6898_vm7, %v1294_v25, %v1295_v28  ;;  %v3588_v38 = vshll.u32 %v7284_v13, 16  ;;  %v6439_v44 = vld [vmem:[%s6606_s27 + $0x84] sm:$0xf] }
  0xe2   : > { %v3547_v20 = vor.u32 %v3546_v45, %v7665_v57  ;;  %v1299_v35 = vrot.slane %v6438_v31, 5  ;;  %v8792_v4 = vshrl.u32 %v7274_v49, 16  ;;  %v8793_v50 = vshll.u32 %v7274_v49, 16  ;;  %v7701_v55 = vld [vmem:[%s6606_s27 + $0x44] sm:$0x1] }
  0xe3   : > { %v5079_v51 = vrot.slane %v6439_v44, 9  ;;  %v7703_v42 = vrot.slane %v3564_v22, 5  ;;  %v8794_v25 = vshrl.u32 %v7277_v58, 16  ;;  %v1306_v45 = vrot.slane %v6992_v11, 5 }
  0xe4   : > { %v3557_v63 = vrot.slane %v8792_v4, 4  ;;  %v3560_v17 = vrot.slane %v8793_v50, 5  ;;  %v8795_v31 = vcombine.low %v7516_v37, %v7520_v47  ;;  %v8796_v49 = vcombine.low %v7477_v14, %v7480_v3  ;;  %v6440_v50 = vld [vmem:[%s6606_s27 + $0x8c] sm:$0x1] }
  0xe5   : > { %v3570_v28 = vrot.slane %v8794_v25, 4  ;;  %v3529_v22 = vsel %vm6632_vm4, %v3524_v53, %v3528_v16  ;;  %v3538_v4 = vrot.slane %v3537_v6, 4  ;;  %v3552_v58 = vrot.slane %v3550_v18, 5 }
  0xe6   : > { %5837 = vmatmul.mubr.msk.bf16.gmra.mrb[8].mxu1 %vm695_vm3, %v8795_v31  ;;  %5989 = vmatmul.mubr.msk.bf16.gmra.mrb[24].mxu0 %vm695_vm3, %v8796_v49  ;;  %v1302_v44 = vrot.slane %v6440_v50, 5  ;;  %v8797_v11 = vcombine.low %v7504_v56, %v7512_v34  ;;  %v8798_v37 = vshrl.u32 %v7281_v46, 16  ;;  %v8799_v25 = vshll.u32 %v7281_v46, 16 }
  0xe7   : > { %5840 = vmatprep.mubr.msk.bf16.mxu1 %vm695_vm3, %v5091_v10  ;;  %v7728_v49 = vrot.slane %v3588_v38, 5  ;;  %v8800_v53 = vshrl.u32 %v7284_v13, 16  ;;  %v3548_v6 = vrot.slane %v3547_v20, 4  ;;  %v1301_v18 = vrot.slane %v1299_v35, 4 }
  0xe8   : > { %5992 = vmatprep.mubr.msk.bf16.mxu0 %vm695_vm3, %v8797_v11  ;;  %v3581_v47 = vrot.slane %v8798_v37, 4  ;;  %v3584_v31 = vrot.slane %v8799_v25, 5  ;;  %v3561_v50 = vor.u32 %v3560_v17, %v3557_v63  ;;  %v3574_v10 = vshll.u32 %v7701_v55, 16 }
  0xe9   : > { %v3594_v16 = vrot.slane %v8800_v53, 4  ;;  %v3571_v11 = vor.u32 %v3570_v28, %v7703_v42  ;;  %v5080_v26 = vrot.slane %v6441_v9, 9  ;;  %v1308_v37 = vrot.slane %v1306_v45, 4 }
  0xea   : > { %v1309_v46 = vrot.slane %v7000_v62, 5  ;;  %v5362_v25 = vcombine.low %v3495_v29, %v3505_v23  ;;  %v5363_v38 = vcombine.low %v3519_v60, %v3529_v22  ;;  %v5095_v13 = vcombine.low %v7686_v40, %v7690_v41 }
  0xeb   : > { %v3612_v20 = vshll.u32 %v7312_v7, 16  ;;  %v7744_v63 = vsel %vm6898_vm7, %v5079_v51, %v1299_v35  ;;  %v3585_v17 = vor.u32 %v3584_v31, %v3581_v47  ;;  %v3595_v28 = vor.u32 %v3594_v16, %v7728_v49 }
  0xec   : > { %v3598_v9 = vshll.u32 %v7734_v61, 16  ;;  %v3543_v62 = vsel %vm6632_vm4, %v3538_v4, %v7665_v57  ;;  %v3553_v29 = vsel %vm6632_vm4, %v3548_v6, %v3552_v58  ;;  %v7755_v23 = vsel %vm6898_vm7, %v1301_v18, %v1302_v44  ;;  %v7774_v4 = vld [vmem:[%s6606_s27 + $0x5c] sm:$0x1]  ;;  %v6442_v18 = vld [vmem:[%s6606_s27 + $0xa0] sm:$0xf] }
  0xed   : > { %v3562_v60 = vrot.slane %v3561_v50, 4  ;;  %v3572_v40 = vrot.slane %v3571_v11, 4  ;;  %v3576_v41 = vrot.slane %v3574_v10, 5  ;;  %v7759_v35 = vsel %vm6898_vm7, %v5080_v26, %v1306_v45 }
  0xee   : > { %v7763_v51 = vsel %vm6898_vm7, %v1308_v37, %v1309_v46  ;;  %v8801_v57 = vcombine.low %v7571_v5, %v7584_v30  ;;  %v8802_v22 = vcombine.low %v7536_v59, %v7557_v48  ;;  %v8803_v58 = vshrl.u32 %v7309_v39, 16  ;;  %v6443_v37 = vld [vmem:[%s6606_s27 + $0x9c] sm:$0xf] }
  0xef   : > { %v8804_v45 = vshll.u32 %v7309_v39, 16  ;;  %v7780_v47 = vrot.slane %v3612_v20, 5  ;;  %v8805_v5 = vshrl.u32 %v7312_v7, 16  ;;  %v8806_v31 = vcombine.low %v7611_v19, %v7615_v15  ;;  %v6444_v20 = vld [vmem:[%s6606_s27 + $0xa4] sm:$0x1] }
  0xf0   : > { %5841 = vmatmul.mubr.msk.bf16.gmra.mrb[12].mxu1 %vm695_vm3, %v8801_v57  ;;  %5993 = vmatmul.mubr.msk.bf16.gmra.mrb[28].mxu0 %vm695_vm3, %v8802_v22  ;;  %v3605_v26 = vrot.slane %v8803_v58, 4  ;;  %v3586_v53 = vrot.slane %v3585_v17, 4  ;;  %v3596_v16 = vrot.slane %v3595_v28, 4  ;;  %v3600_v6 = vrot.slane %v3598_v9, 5  ;;  %v8808_v57 = vld [vmem:[#allocation8_spill] sm:$0xff] }
  0xf1   : > { %v3608_v44 = vrot.slane %v8804_v45, 5  ;;  %v3618_v30 = vrot.slane %v8805_v5, 4  ;;  %5844 = vmatprep.mubr.msk.bf16.mxu1 %vm695_vm3, %v8806_v31  ;;  %5998 = vmatprep.mubr.msk.bf16.mxu0 %vm695_vm3, %v5362_v25  ;;  %v1313_v39 = vrot.slane %v6442_v18, 5  ;;  %v5364_v50 = vcombine.low %v3543_v62, %v3553_v29 }
  0xf2   : > { %v5096_v10 = vcombine.low %v7744_v63, %v7755_v23  ;;  %v3567_v7 = vsel %vm6632_vm4, %v3562_v60, %v7703_v42  ;;  %v3636_v19 = vshll.u32 %v7326_v36, 16  ;;  %v3577_v15 = vsel %vm6632_vm4, %v3572_v40, %v3576_v41  ;;  %v8807_v40 = vld [vmem:[#allocation3_spill] sm:$0xff] }
  0xf3   : > { %v5097_v11 = vcombine.low %v7759_v35, %v7763_v51  ;;  %v5081_v46 = vrot.slane %v6443_v37, 9  ;;  %v3622_v25 = vshll.u32 %v7774_v4, 16  ;;  %v1316_v17 = vrot.slane %v6444_v20, 5 }
  0xf4   : > { %v3609_v28 = vor.u32 %v3608_v44, %v3605_v26  ;;  %v3619_v9 = vor.u32 %v3618_v30, %v7780_v47  ;;  %v1320_v42 = vrot.slane %v7043_v1, 5  ;;  %v3591_v62 = vsel %vm6632_vm4, %v3586_v53, %v7728_v49  ;;  %v7824_v53 = vld [vmem:[%s6606_s27 + $0x68] sm:$0x1] }
  0xf5   : > { %v3601_v29 = vsel %vm6632_vm4, %v3596_v16, %v3600_v6  ;;  %v1315_v60 = vrot.slane %v1313_v39, 4  ;;  %v5082_v41 = vrot.slane %v8807_v40, 9  ;;  %v8809_v22 = vshrl.u32 %v8808_v57, 16  ;;  %v8812_v16 = vld [vmem:[#allocation10_spill] sm:$0xff] }
  0xf6   : > { %v8810_v45 = vshll.u32 %v8808_v57, 16  ;;  %v7815_v44 = vrot.slane %v3636_v19, 5  ;;  %v8811_v1 = vshrl.u32 %v7326_v36, 16  ;;  %v5365_v30 = vcombine.low %v3567_v7, %v3577_v15  ;;  %v8814_v7 = vld [vmem:[#allocation4_spill] sm:$0xff] }
  0xf7   : > { %v3629_v58 = vrot.slane %v8809_v22, 4  ;;  %v7821_v49 = vsel %vm6898_vm7, %v5081_v46, %v1313_v39  ;;  %v3624_v31 = vrot.slane %v3622_v25, 5  ;;  %v3660_v6 = vshll.u32 %v8812_v16, 16 }
  0xf8   : > { %v3632_v26 = vrot.slane %v8810_v45, 5  ;;  %v3642_v5 = vrot.slane %v8811_v1, 4  ;;  %v8813_v18 = vcombine.low %v7626_v43, %v7639_v52  ;;  %5999 = vmatmul.mubr.msk.bf16.vlgmr.msra.gmra.mrb[0].mxu0 %vm695_vm3, %v5363_v38  ;;  %v3610_v19 = vrot.slane %v3609_v28, 4  ;;  %v8815_v52 = vld [vmem:[#allocation12_spill] sm:$0xff]  ;;  %v8822_v1 = vld [vmem:[#allocation11_spill] sm:$0xff] }
  0xf9   : > { %v3620_v36 = vrot.slane %v3619_v9, 4  ;;  %v1322_v37 = vrot.slane %v1320_v42, 4  ;;  %v1323_v15 = vrot.slane %v8814_v7, 5  ;;  %6031 = vmatpush3.bf16.msra.mxu0 %v7677_v27  ;;  %v5366_v39 = vcombine.low %v3591_v62, %v3601_v29  ;;  %6002 = vmatprep.mubr.msk.bf16.mxu0 %vm695_vm3, %v5364_v50  ;;  %v8817_v9 = vld [vmem:[#allocation9_spill] sm:$0xff] }
  0xfa   : > { %5845 = vmatmul.mubr.msk.bf16.gmra.mrb[16].mxu1 %vm695_vm3, %v8813_v18  ;;  %v7837_v46 = vsel %vm6898_vm7, %v1315_v60, %v1316_v17  ;;  %v7841_v43 = vsel %vm6898_vm7, %v5082_v41, %v1320_v42  ;;  %v3684_v38 = vshll.u32 %v8815_v52, 16  ;;  %v3633_v25 = vor.u32 %v3632_v26, %v3629_v58  ;;  %v8821_v58 = vld [vmem:[#allocation5_spill] sm:$0xff]  ;;  %v7867_v26 = vld [vmem:[%s6606_s27 + $0x74] sm:$0x1] }
  0xfb   : > { %5848 = vmatprep.mubr.msk.bf16.mxu1 %vm695_vm3, %v5095_v13  ;;  %v3643_v20 = vor.u32 %v3642_v5, %v7815_v44  ;;  %v3646_v27 = vshll.u32 %v7824_v53, 16  ;;  %v8816_v13 = vld [vmem:[#allocation6_spill] sm:$0xff]  ;;  %v8818_v62 = vshrl.u32 %v8817_v9, 16  ;;  %v8819_v29 = vshll.u32 %v8817_v9, 16 }
  0xfc   : > { %v1327_v28 = vrot.slane %v8816_v13, 5  ;;  %v7852_v42 = vrot.slane %v3660_v6, 5  ;;  %v8820_v40 = vshrl.u32 %v8812_v16, 16  ;;  %v3615_v50 = vsel %vm6632_vm4, %v3610_v19, %v7780_v47  ;;  %v7879_v9 = vld [vmem:[%s6606_s27 + $0x80] sm:$0x1] }
  0xfd   : > { %v3653_v17 = vrot.slane %v8818_v62, 4  ;;  %v3656_v60 = vrot.slane %v8819_v29, 5  ;;  %v3625_v57 = vsel %vm6632_vm4, %v3620_v36, %v3624_v31  ;;  %v7863_v22 = vsel %vm6898_vm7, %v1322_v37, %v1323_v15  ;;  %v8826_v37 = vld [vmem:[#allocation7_spill] sm:$0xff] }
  0xfe   : > { %v3666_v41 = vrot.slane %v8820_v40, 4  ;;  %v5083_v45 = vrot.slane %v8821_v58, 9  ;;  %v8823_v5 = vshrl.u32 %v8822_v1, 16  ;;  %v8824_v16 = vshll.u32 %v8822_v1, 16 }
  0xff   : > { %v7873_v7 = vrot.slane %v3684_v38, 5  ;;  %v8825_v47 = vshrl.u32 %v8815_v52, 16  ;;  %v3634_v31 = vrot.slane %v3633_v25, 4  ;;  %v3644_v36 = vrot.slane %v3643_v20, 4 }
 0x100   : > { %v3677_v6 = vrot.slane %v8823_v5, 4  ;;  %v3680_v18 = vrot.slane %v8824_v16, 5  ;;  %v3648_v13 = vrot.slane %v3646_v27, 5  ;;  %v1330_v15 = vrot.slane %v8826_v37, 5  ;;  %6003 = vmatmul.mubr.msk.bf16.gmra.mrb[4].mxu0 %vm695_vm3, %v5365_v30  ;;  %v8827_v27 = vld [vmem:[#allocation13_spill] sm:$0xff] }
 0x101   : > { %v3690_v19 = vrot.slane %v8825_v47, 4  ;;  %v1329_v62 = vrot.slane %v1327_v28, 4  ;;  %v3657_v29 = vor.u32 %v3656_v60, %v3653_v17  ;;  %v3667_v40 = vor.u32 %v3666_v41, %v7852_v42  ;;  %6006 = vmatprep.mubr.msk.bf16.mxu0 %vm695_vm3, %v5366_v39  ;;  %v7924_v16 = vld [vmem:[%s6606_s27 + $0x8c] sm:$0x1] }
 0x102   : > { %v3670_v58 = vshll.u32 %v7867_v26, 16  ;;  %v3798_v1 = vshll.u32 %v7477_v14, 16  ;;  %5849 = vmatmul.mubr.msk.bf16.gmra.mrb[20].mxu1 %vm695_vm3, %v5096_v10  ;;  %v5098_v52 = vcombine.low %v7821_v49, %v7837_v46  ;;  %v5099_v38 = vcombine.low %v7841_v43, %v7863_v22 }
 0x103   : > { %v3708_v25 = vshll.u32 %v7381_v33, 16  ;;  %5852 = vmatprep.mubr.msk.bf16.mxu1 %vm695_vm3, %v5097_v11  ;;  %v5367_v63 = vcombine.low %v3615_v50, %v3625_v57  ;;  %v3681_v23 = vor.u32 %v3680_v18, %v3677_v6  ;;  %v3691_v10 = vor.u32 %v3690_v19, %v7873_v7  ;;  %v8831_v18 = vld [vmem:[#allocation14_spill] sm:$0xff] }
 0x104   : > { %v3694_v30 = vshll.u32 %v7879_v9, 16  ;;  %v3639_v49 = vsel %vm6632_vm4, %v3634_v31, %v7815_v44  ;;  %v3649_v46 = vsel %vm6632_vm4, %v3644_v36, %v3648_v13  ;;  %v7908_v35 = vsel %vm6898_vm7, %v5083_v45, %v1327_v28 }
 0x105   : > { %v3732_v51 = vshll.u32 %v7405_v0, 16  ;;  %v7913_v11 = vsel %vm6898_vm7, %v1329_v62, %v1330_v15  ;;  %v3658_v39 = vrot.slane %v3657_v29, 4  ;;  %v3668_v43 = vrot.slane %v3667_v40, 4  ;;  %v7941_v40 = vld [vmem:[%s6606_s27 + $0x98] sm:$0x1] }
 0x106   : > { %v3672_v20 = vrot.slane %v3670_v58, 5  ;;  %v8828_v17 = vshrl.u32 %v8827_v27, 16  ;;  %v8829_v60 = vshll.u32 %v8827_v27, 16  ;;  %v7919_v50 = vrot.slane %v3708_v25, 5  ;;  %v6445_v25 = vld [vmem:[%s6606_s27 + $0xc] sm:$0xf] }
 0x107   : > { %v8830_v28 = vshrl.u32 %v7381_v33, 16  ;;  %v5368_v22 = vcombine.low %v3639_v49, %v3649_v46  ;;  %v3682_v45 = vrot.slane %v3681_v23, 4  ;;  %v3692_v5 = vrot.slane %v3691_v10, 4 }
 0x108   : > { %v3701_v44 = vrot.slane %v8828_v17, 4  ;;  %v3704_v41 = vrot.slane %v8829_v60, 5  ;;  %v3696_v6 = vrot.slane %v3694_v30, 5  ;;  %v8832_v47 = vshrl.u32 %v8831_v18, 16  ;;  %6007 = vmatmul.mubr.msk.bf16.gmra.mrb[8].mxu0 %vm695_vm3, %v5367_v63 }
 0x109   : > { %v3714_v57 = vrot.slane %v8830_v28, 4  ;;  %v8833_v31 = vshll.u32 %v8831_v18, 16  ;;  %v7930_v13 = vrot.slane %v3732_v51, 5  ;;  %v8834_v37 = vshrl.u32 %v7405_v0, 16  ;;  %v6446_v0 = vld [vmem:[%s6606_s27 + $0x10] sm:$0xf]  ;;  %6010 = vmatprep.mubr.msk.bf16.mxu0 %vm695_vm3, %v5368_v22 }
 0x10a   : > { %v3725_v19 = vrot.slane %v8832_v47, 4  ;;  %v3808_v15 = vshrl.u32 %v7480_v3, 16  ;;  %v3663_v62 = vsel %vm6632_vm4, %v3658_v39, %v7852_v42  ;;  %v3673_v29 = vsel %vm6632_vm4, %v3668_v43, %v3672_v20  ;;  %5853 = vmatmul.mubr.msk.bf16.gmra.mrb[24].mxu1 %vm695_vm3, %v5098_v52  ;;  %v7971_v22 = vld [vmem:[%s6606_s27 + $0xa4] sm:$0x1] }
 0x10b   : > { %v3728_v36 = vrot.slane %v8833_v31, 5  ;;  %v3738_v33 = vrot.slane %v8834_v37, 4  ;;  %v3756_v58 = vshll.u32 %v7434_v21, 16  ;;  %v5166_v23 = vcombine.low %v6445_v25, %v6446_v0  ;;  %5856 = vmatprep.mubr.msk.bf16.mxu1 %vm695_vm3, %v5099_v38 }
 0x10c   : > { %v3705_v10 = vor.u32 %v3704_v41, %v3701_v44  ;;  %v3715_v30 = vor.u32 %v3714_v57, %v7919_v50  ;;  %v3718_v49 = vshll.u32 %v7924_v16, 16  ;;  %v5100_v42 = vcombine.low %v7908_v35, %v7913_v11 }
 0x10d   : > { %v3687_v52 = vsel %vm6632_vm4, %v3682_v45, %v7873_v7  ;;  %v3697_v63 = vsel %vm6632_vm4, %v3692_v5, %v3696_v6  ;;  %v3780_v46 = vshll.u32 %v7448_v2, 16  ;;  %v5369_v51 = vcombine.low %v3663_v62, %v3673_v29 }
 0x10e   : > { %v3729_v39 = vor.u32 %v3728_v36, %v3725_v19  ;;  %v3739_v43 = vor.u32 %v3738_v33, %v7930_v13  ;;  %v3742_v38 = vshll.u32 %v7941_v40, 16  ;;  %v8835_v20 = vshrl.u32 %v7431_v8, 16  ;;  %v7983_v33 = vld [vmem:[%s6606_s27 + $0xb0] sm:$0x1] }
 0x10f   : > { %v8836_v35 = vshll.u32 %v7431_v8, 16  ;;  %v7966_v17 = vrot.slane %v3756_v58, 5  ;;  %v8837_v7 = vshrl.u32 %v7434_v21, 16  ;;  %v5370_v60 = vcombine.low %v3687_v52, %v3697_v63 }
 0x110   : > { %v3749_v27 = vrot.slane %v8835_v20, 4  ;;  %v3706_v41 = vrot.slane %v3705_v10, 4  ;;  %v3716_v28 = vrot.slane %v3715_v30, 4  ;;  %v3720_v57 = vrot.slane %v3718_v49, 5  ;;  %6011 = vmatmul.mubr.msk.bf16.gmra.mrb[12].mxu0 %vm695_vm3, %v5369_v51  ;;  %v6447_v10 = vld [vmem:[%s6606_s27 + $0x18] sm:$0xf] }
 0x111   : > { %v3752_v11 = vrot.slane %v8836_v35, 5  ;;  %v3762_v44 = vrot.slane %v8837_v7, 4  ;;  %v8838_v45 = vshrl.u32 %v7443_v54, 16  ;;  %v8839_v6 = vshll.u32 %v7443_v54, 16  ;;  %6014 = vmatprep.mubr.msk.bf16.mxu0 %vm695_vm3, %v5370_v60  ;;  %v6448_v30 = vld [vmem:[%s6606_s27 + $0x1c] sm:$0xf] }
 0x112   : > { %v7977_v8 = vrot.slane %v3780_v46, 5  ;;  %v8840_v47 = vshrl.u32 %v7448_v2, 16  ;;  %v3819_v21 = vshrl.u32 %v7504_v56, 16  ;;  %v3730_v31 = vrot.slane %v3729_v39, 4  ;;  %5857 = vmatmul.mubr.msk.bf16.gmra.mrb[28].mxu1 %vm695_vm3, %v5100_v42  ;;  %v6449_v46 = vld [vmem:[%s6606_s27 + $0x24] sm:$0xf] }
 0x113   : > { %v3773_v5 = vrot.slane %v8838_v45, 4  ;;  %v3776_v18 = vrot.slane %v8839_v6, 5  ;;  %v3740_v36 = vrot.slane %v3739_v43, 4  ;;  %v3744_v37 = vrot.slane %v3742_v38, 5  ;;  %5862 = vmatprep.mubr.msk.bf16.mxu1 %vm695_vm3, %v5166_v23 }
 0x114   : > { %v3786_v19 = vrot.slane %v8840_v47, 4  ;;  %v3822_v62 = vshll.u32 %v7504_v56, 16  ;;  %v3753_v29 = vor.u32 %v3752_v11, %v3749_v27  ;;  %v3763_v54 = vor.u32 %v3762_v44, %v7966_v17  ;;  %v8012_v11 = vld [vmem:[%s6606_s27 + $0xbc] sm:$0x1] }
 0x115   : > { %v3766_v58 = vshll.u32 %v7971_v22, 16  ;;  %v3832_v2 = vshrl.u32 %v7512_v34, 16  ;;  %v3711_v25 = vsel %vm6632_vm4, %v3706_v41, %v7919_v50  ;;  %v3721_v56 = vsel %vm6632_vm4, %v3716_v28, %v3720_v57  ;;  %v6450_v50 = vld [vmem:[%s6606_s27 + $0x28] sm:$0xf] }
 0x116   : > { %v3804_v0 = vshll.u32 %v7480_v3, 16  ;;  %v5167_v49 = vcombine.low %v6447_v10, %v6448_v30  ;;  %v3777_v42 = vor.u32 %v3776_v18, %v3773_v5  ;;  %v3787_v52 = vor.u32 %v3786_v19, %v7977_v8 }
 0x117   : > { %v3790_v63 = vshll.u32 %v7983_v33, 16  ;;  %v5168_v51 = vcombine.low %v6449_v46, %v6450_v50  ;;  %v3735_v39 = vsel %vm6632_vm4, %v3730_v31, %v7930_v13  ;;  %v3745_v23 = vsel %vm6632_vm4, %v3740_v36, %v3744_v37  ;;  %v8030_v31 = vld [vmem:[%s6606_s27 + $0xc8] sm:$0x1]  ;;  %v8842_v37 = vld [vmem:[#allocation2_spill] sm:$0xff] }
 0x118   : > { %v3828_v43 = vshll.u32 %v7512_v34, 16  ;;  %v5371_v38 = vcombine.low %v3711_v25, %v3721_v56  ;;  %v3754_v20 = vrot.slane %v3753_v29, 4  ;;  %v3764_v27 = vrot.slane %v3763_v54, 4  ;;  %v6451_v25 = vld [vmem:[%s6606_s27 + $0x30] sm:$0xf] }
 0x119   : > { %v3768_v35 = vrot.slane %v3766_v58, 5  ;;  %v8841_v7 = vshrl.u32 %v7477_v14, 16  ;;  %v3800_v60 = vrot.slane %v3798_v1, 5  ;;  %v8018_v41 = vrot.slane %v3804_v0, 5  ;;  %v6452_v56 = vld [vmem:[%s6606_s27 + $0x34] sm:$0xf] }
 0x11a   : > { %v3810_v13 = vrot.slane %v3808_v15, 4  ;;  %v5372_v28 = vcombine.low %v3735_v39, %v3745_v23  ;;  %v3778_v34 = vrot.slane %v3777_v42, 4  ;;  %v3788_v57 = vrot.slane %v3787_v52, 4  ;;  %5863 = vmatmul.mubr.msk.bf16.vlgmr.msra.gmra.mrb[0].mxu1 %vm695_vm3, %v5167_v49  ;;  %6015 = vmatmul.mubr.msk.bf16.gmra.mrb[16].mxu0 %vm695_vm3, %v5371_v38  ;;  %v6453_v52 = vld [vmem:[%s6606_s27 + $0x3c] sm:$0xf] }
 0x11b   : > { %v3797_v44 = vrot.slane %v8841_v7, 4  ;;  %v3792_v45 = vrot.slane %v3790_v63, 5  ;;  %v3821_v5 = vrot.slane %v3819_v21, 4  ;;  %v3824_v6 = vrot.slane %v3822_v62, 5  ;;  %6065 = vmatpush3.bf16.msra.mxu1 %v8842_v37  ;;  %5866 = vmatprep.mubr.msk.bf16.mxu1 %vm695_vm3, %v5168_v51  ;;  %v6454_v63 = vld [vmem:[%s6606_s27 + $0x40] sm:$0xf] }
 0x11c   : > { %v8022_v18 = vrot.slane %v3828_v43, 5  ;;  %v3834_v47 = vrot.slane %v3832_v2, 4  ;;  %v3843_v19 = vshrl.u32 %v7536_v59, 16  ;;  %v3759_v14 = vsel %vm6632_vm4, %v3754_v20, %v7966_v17  ;;  %6018 = vmatprep.mubr.msk.bf16.mxu0 %vm695_vm3, %v5372_v28  ;;  %v8057_v20 = vld [vmem:[%s6606_s27 + $0xd4] sm:$0x1] }
 0x11d   : > { %v3814_v1 = vshll.u32 %v8012_v11, 16  ;;  %v3846_v3 = vshll.u32 %v7536_v59, 16  ;;  %v3769_v15 = vsel %vm6632_vm4, %v3764_v27, %v3768_v35  ;;  %v3801_v21 = vor.u32 %v3800_v60, %v3797_v44  ;;  %v6455_v44 = vld [vmem:[%s6606_s27 + $0x1c] sm:$0xf] }
 0x11e   : > { %v3811_v36 = vor.u32 %v3810_v13, %v8018_v41  ;;  %v3856_v17 = vshrl.u32 %v7557_v48, 16  ;;  %v3783_v59 = vsel %vm6632_vm4, %v3778_v34, %v7977_v8  ;;  %v3852_v62 = vshll.u32 %v7557_v48, 16  ;;  %v8068_v13 = vld [vmem:[%s6606_s27 + $0x78] sm:$0xf] }
 0x11f   : > { %v3793_v29 = vsel %vm6632_vm4, %v3788_v57, %v3792_v45  ;;  %v3825_v54 = vor.u32 %v3824_v6, %v3821_v5  ;;  %v3835_v58 = vor.u32 %v3834_v47, %v8022_v18  ;;  %v3838_v2 = vshll.u32 %v8030_v31, 16  ;;  %v8077_v45 = vld [vmem:[%s6606_s27 + $0x7c] sm:$0xf] }
 0x120   : > { %v5169_v0 = vcombine.low %v6451_v25, %v6452_v56  ;;  %v5373_v10 = vcombine.low %v3759_v14, %v3769_v15  ;;  %v3816_v8 = vrot.slane %v3814_v1, 5  ;;  %v3802_v30 = vrot.slane %v3801_v21, 4  ;;  %v6459_v14 = vld [vmem:[%s6606_s27 + $0x4c] sm:$0xf]  ;;  %v6460_v15 = vld [vmem:[%s6606_s27 + $0x54] sm:$0xf] }
 0x121   : > { %v3812_v49 = vrot.slane %v3811_v36, 4  ;;  %v3845_v48 = vrot.slane %v3843_v19, 4  ;;  %v3848_v42 = vrot.slane %v3846_v3, 5  ;;  %v5170_v46 = vcombine.low %v6453_v52, %v6454_v63  ;;  %v6458_v19 = vld [vmem:[%s6606_s27 + $0x48] sm:$0xf] }
 0x122   : > { %v5374_v50 = vcombine.low %v3783_v59, %v3793_v29  ;;  %v8054_v51 = vrot.slane %v3852_v62, 5  ;;  %v3858_v39 = vrot.slane %v3856_v17, 4  ;;  %v3826_v23 = vrot.slane %v3825_v54, 4  ;;  %5867 = vmatmul.mubr.msk.bf16.gmra.mrb[4].mxu1 %vm695_vm3, %v5169_v0  ;;  %6019 = vmatmul.mubr.msk.bf16.gmra.mrb[20].mxu0 %vm695_vm3, %v5373_v10  ;;  %v6461_v21 = vld [vmem:[%s6606_s27 + $0x58] sm:$0xf] }
 0x123   : > { %v3836_v43 = vrot.slane %v3835_v58, 4  ;;  %v3840_v38 = vrot.slane %v3838_v2, 5  ;;  %v3807_v27 = vsel %vm6632_vm4, %v3802_v30, %v8018_v41  ;;  %v3817_v35 = vsel %vm6632_vm4, %v3812_v49, %v3816_v8  ;;  %5870 = vmatprep.mubr.msk.bf16.mxu1 %vm695_vm3, %v5170_v46  ;;  %v6462_v17 = vld [vmem:[%s6606_s27 + $0x28] sm:$0xf]  ;;  %v6463_v62 = vld [vmem:[%s6606_s27 + $0x18] sm:$0xf] }
 0x124   : > { %v3849_v7 = vor.u32 %v3848_v42, %v3845_v48  ;;  %v4178_v60 = vrot.slane %v6455_v44, 5  ;;  %v2221_v28 = vshrl.u32 %v8068_v13, 16  ;;  %6022 = vmatprep.mubr.msk.bf16.mxu0 %vm695_vm3, %v5374_v50  ;;  %v3859_v41 = vor.u32 %v3858_v39, %v8054_v51  ;;  %v8843_v58 = vld [vmem:[#allocation15_spill] sm:$0xff]  ;;  %v6464_v0 = vld [vmem:[%s6606_s27 + $0x34] sm:$0xf] }
 0x125   : > { %v3862_v34 = vshll.u32 %v8057_v20, 16  ;;  %v2224_v57 = vshll.u32 %v8068_v13, 16  ;;  %v2230_v5 = vshll.u32 %v8077_v45, 16  ;;  %v3831_v6 = vsel %vm6632_vm4, %v3826_v23, %v8022_v18  ;;  %v6465_v42 = vld [vmem:[%s6606_s27 + $0x24] sm:$0xf] }
 0x126   : > { %v3841_v47 = vsel %vm6632_vm4, %v3836_v43, %v3840_v38  ;;  %v5171_v1 = vcombine.low %v6458_v19, %v6459_v14  ;;  %v5375_v3 = vcombine.low %v3807_v27, %v3817_v35  ;;  %v5172_v36 = vcombine.low %v6460_v15, %v6461_v21  ;;  %v6466_v43 = vld [vmem:[%s6606_s27 + $0x30] sm:$0xf]  ;;  %v8142_v15 = vld [vmem:[%s6606_s27 + $0x84] sm:$0xf]  ;;  %v8145_v21 = vld [vmem:[%s6606_s27 + $0x88] sm:$0xf] }
 0x127   : > { %v4185_v37 = vrot.slane %v6462_v17, 5  ;;  %v3850_v59 = vrot.slane %v3849_v7, 4  ;;  %v5394_v29 = vrot.slane %v6463_v62, 9  ;;  %v4180_v54 = vrot.slane %v4178_v60, 4  ;;  %v6467_v7 = vld [vmem:[%s6606_s27 + $0x40] sm:$0xf] }
 0x128   : > { %v4181_v18 = vrot.slane %v8843_v58, 5  ;;  %v5376_v2 = vcombine.low %v3831_v6, %v3841_v47  ;;  %v3860_v25 = vrot.slane %v3859_v41, 4  ;;  %v3864_v56 = vrot.slane %v3862_v34, 5  ;;  %v6469_v34 = vld [vmem:[%s6606_s27 + $0x60] sm:$0xf] }
 0x129   : > { %v4192_v10 = vrot.slane %v6464_v0, 5  ;;  %v8093_v8 = vrot.slane %v2221_v28, 4  ;;  %v8095_v30 = vrot.slane %v2224_v57, 5  ;;  %v2234_v49 = vshrl.u32 %v8077_v45, 16  ;;  %v8121_v28 = vld [vmem:[%s6606_s27 + $0x80] sm:$0x1] }
 0x12a   : > { %v8098_v48 = vrot.slane %v2230_v5, 5  ;;  %v5395_v52 = vrot.slane %v6465_v42, 9  ;;  %v4187_v63 = vrot.slane %v4185_v37, 4  ;;  %v4188_v46 = vrot.slane %v7598_v24, 5  ;;  %5871 = vmatmul.mubr.msk.bf16.gmra.mrb[8].mxu1 %vm695_vm3, %v5171_v1  ;;  %6023 = vmatmul.mubr.msk.bf16.gmra.mrb[24].mxu0 %vm695_vm3, %v5375_v3  ;;  %v6470_v57 = vld [vmem:[%s6606_s27 + $0x64] sm:$0xf] }
 0x12b   : > { %v3855_v50 = vsel %vm6632_vm4, %v3850_v59, %v8054_v51  ;;  %v4179_v39 = vsel %vm6898_vm7, %v5394_v29, %v4178_v60  ;;  %v4182_v23 = vsel %vm6898_vm7, %v4180_v54, %v4181_v18  ;;  %v5396_v24 = vrot.slane %v6466_v43, 9  ;;  %5874 = vmatprep.mubr.msk.bf16.mxu1 %vm695_vm3, %v5172_v36  ;;  %6026 = vmatprep.mubr.msk.bf16.mxu0 %vm695_vm3, %v5376_v2  ;;  %v8844_v51 = vld [vmem:[#allocation16_spill] sm:$0xff]  ;;  %v6471_v6 = vld [vmem:[%s6606_s27 + $0x6c] sm:$0xf]  ;;  %v6475_v62 = vld [vmem:[%s6606_s27 + $0x3c] sm:$0xf] }
 0x12c   : > { %v3865_v38 = vsel %vm6632_vm4, %v3860_v25, %v3864_v56  ;;  %v4194_v27 = vrot.slane %v4192_v10, 4  ;;  %v4195_v35 = vrot.slane %v8844_v51, 5  ;;  %v4199_v44 = vrot.slane %v6467_v7, 5  ;;  %v8128_v47 = vld [vmem:[%s6606_s27 + $0x70] sm:$0xf] }
 0x12d   : > { %v8118_v60 = vrot.slane %v2234_v49, 4  ;;  %v2240_v41 = vshll.u32 %v8121_v28, 16  ;;  %v5173_v5 = vcombine.low %v6469_v34, %v6470_v57  ;;  %v5174_v19 = vcombine.low %v6471_v6, %v8128_v47  ;;  %v8159_v58 = vld [vmem:[%s6606_s27 + $0x94] sm:$0xf]  ;;  %v8162_v18 = vld [vmem:[%s6606_s27 + $0x90] sm:$0xf] }
 0x12e   : > { %v5175_v14 = vcombine.low %v8068_v13, %v8077_v45  ;;  %v8135_v1 = vsel %vm6898_vm7, %v5395_v52, %v4185_v37  ;;  %v8139_v3 = vsel %vm6898_vm7, %v4187_v63, %v4188_v46  ;;  %v5176_v36 = vcombine.low %v8142_v15, %v8145_v21  ;;  %v8171_v63 = vld [vmem:[%s6606_s27 + $0x9c] sm:$0xf]  ;;  %v8174_v46 = vld [vmem:[%s6606_s27 + $0xa0] sm:$0xf]  ;;  %v6482_v43 = vld [vmem:[%s6606_s27 + $0x58] sm:$0xf] }
 0x12f   : > { %v5377_v17 = vcombine.low %v3855_v50, %v3865_v38  ;;  %v5411_v59 = vcombine.low %v4179_v39, %v4182_v23  ;;  %v8151_v37 = vsel %vm6898_vm7, %v5396_v24, %v4192_v10  ;;  %v5397_v29 = vrot.slane %v6475_v62, 9  ;;  %v6478_v10 = vld [vmem:[%s6606_s27 + $0x4c] sm:$0xf]  ;;  %v6481_v39 = vld [vmem:[%s6606_s27 + $0x48] sm:$0xf] }
 0x130   : > { %v8156_v54 = vsel %vm6898_vm7, %v4194_v27, %v4195_v35  ;;  %v5177_v2 = vcombine.low %v8162_v18, %v8159_v58  ;;  %v4201_v25 = vrot.slane %v4199_v44, 4  ;;  %v4202_v56 = vrot.slane %v7701_v55, 5  ;;  %v6483_v24 = vld [vmem:[%s6606_s27 + $0x64] sm:$0xf]  ;;  %v6484_v7 = vld [vmem:[%s6606_s27 + $0x70] sm:$0xf] }
 0x131   : > { %v5412_v0 = vcombine.low %v8135_v1, %v8139_v3  ;;  %v4206_v49 = vrot.slane %v6478_v10, 5  ;;  %v2197_v42 = vshrl.u32 %v6471_v6, 16  ;;  %v2200_v52 = vshll.u32 %v6471_v6, 16  ;;  %v6486_v62 = vld [vmem:[%s6606_s27 + $0x60] sm:$0xf] }
 0x132   : > { %v5178_v50 = vcombine.low %v8171_v63, %v8174_v46  ;;  %v5398_v23 = vrot.slane %v6481_v39, 9  ;;  %v4213_v55 = vrot.slane %v6482_v43, 5  ;;  %v4220_v38 = vrot.slane %v6483_v24, 5  ;;  %5875 = vmatmul.mubr.msk.bf16.gmra.mrb[12].mxu1 %vm695_vm3, %v5173_v5  ;;  %6027 = vmatmul.mubr.msk.bf16.gmra.mrb[28].mxu0 %vm695_vm3, %v5377_v17  ;;  %v6485_v5 = vld [vmem:[%s6606_s27 + $0x54] sm:$0xf] }
 0x133   : > { %v5413_v27 = vcombine.low %v8151_v37, %v8156_v54  ;;  %v8187_v51 = vsel %vm6898_vm7, %v5397_v29, %v4199_v44  ;;  %v4209_v35 = vrot.slane %v7734_v61, 5  ;;  %v4227_v34 = vrot.slane %v6484_v7, 5  ;;  %5878 = vmatprep.mubr.msk.bf16.mxu1 %vm695_vm3, %v5174_v19  ;;  %6032 = vmatprep.mubr.msk.bf16.mxu0 %vm695_vm3, %v5411_v59  ;;  %v6489_v10 = vld [vmem:[%s6606_s27 + $0x6c] sm:$0xf]  ;;  %v8274_v45 = vld [vmem:[%s6606_s27 + $0xc4] sm:$0xf] }
 0x134   : > { %v8195_v57 = vsel %vm6898_vm7, %v4201_v25, %v4202_v56  ;;  %v5399_v6 = vrot.slane %v6485_v5, 9  ;;  %v2206_v44 = vshll.u32 %v8128_v47, 16  ;;  %v2210_v1 = vshrl.u32 %v8128_v47, 16  ;;  %v8204_v25 = vld [vmem:[%s6606_s27 + $0xac] sm:$0xf] }
 0x135   : > { %v4208_v61 = vrot.slane %v4206_v49, 4  ;;  %v4216_v3 = vrot.slane %v7774_v4, 5  ;;  %v2199_v17 = vrot.slane %v2197_v42, 4  ;;  %v2202_v19 = vrot.slane %v2200_v52, 5  ;;  %v8207_v56 = vld [vmem:[%s6606_s27 + $0xa8] sm:$0xf] }
 0x136   : > { %v4215_v37 = vrot.slane %v4213_v55, 4  ;;  %v5400_v59 = vrot.slane %v6486_v62, 9  ;;  %v4222_v29 = vrot.slane %v4220_v38, 4  ;;  %v4223_v54 = vrot.slane %v7824_v53, 5  ;;  %v8231_v62 = vld [vmem:[%s6606_s27 + $0xb4] sm:$0xf] }
 0x137   : > { %v5179_v47 = vcombine.low %v8207_v56, %v8204_v25  ;;  %v5401_v39 = vrot.slane %v6489_v10, 9  ;;  %v4229_v4 = vrot.slane %v4227_v34, 4  ;;  %v4230_v42 = vrot.slane %v7867_v26, 5  ;;  %v8228_v26 = vld [vmem:[%s6606_s27 + $0xb8] sm:$0xf] }
 0x138   : > { %v5414_v52 = vcombine.low %v8187_v51, %v8195_v57  ;;  %v8217_v43 = vsel %vm6898_vm7, %v5398_v23, %v4206_v49  ;;  %v8219_v53 = vrot.slane %v2206_v44, 5  ;;  %v2212_v24 = vrot.slane %v2210_v1, 4  ;;  %v6492_v57 = vld [vmem:[%s6606_s27 + $0x7c] sm:$0xf]  ;;  %v6493_v1 = vld [vmem:[%s6606_s27 + $0x74] sm:$0x1] }
 0x139   : > { %v4210_v7 = vsel %vm6898_vm7, %v4208_v61, %v4209_v35  ;;  %v8225_v5 = vsel %vm6898_vm7, %v5399_v6, %v4213_v55  ;;  %v5180_v49 = vcombine.low %v8231_v62, %v8228_v26  ;;  %v2203_v23 = vor.u32 %v2202_v19, %v2199_v17 }
 0x13a   : > { %v8237_v51 = vsel %vm6898_vm7, %v4215_v37, %v4216_v3  ;;  %v8241_v35 = vsel %vm6898_vm7, %v5400_v59, %v4220_v38  ;;  %v8245_v55 = vsel %vm6898_vm7, %v4222_v29, %v4223_v54  ;;  %v4234_v6 = vrot.slane %v6492_v57, 5  ;;  %5879 = vmatmul.mubr.msk.bf16.gmra.mrb[16].mxu1 %vm695_vm3, %v5175_v14  ;;  %6033 = vmatmul.mubr.msk.bf16.vlgmr.msra.gmra.mrb[0].mxu0 %vm695_vm3, %v5412_v0  ;;  %v6494_v3 = vld [vmem:[%s6606_s27 + $0x78] sm:$0xf]  ;;  %v8277_v14 = vld [vmem:[%s6606_s27 + $0xc0] sm:$0xf] }
 0x13b   : > { %v8255_v44 = vsel %vm6898_vm7, %v5401_v39, %v4227_v34  ;;  %v8259_v38 = vsel %vm6898_vm7, %v4229_v4, %v4230_v42  ;;  %v2216_v61 = vshll.u32 %v6493_v1, 16  ;;  %v5402_v17 = vrot.slane %v6494_v3, 9  ;;  %5882 = vmatprep.mubr.msk.bf16.mxu1 %vm695_vm3, %v5176_v36  ;;  %6036 = vmatprep.mubr.msk.bf16.mxu0 %vm695_vm3, %v5413_v27  ;;  %v6497_v4 = vld [vmem:[%s6606_s27 + $0x84] sm:$0xf]  ;;  %v6498_v57 = vld [vmem:[%s6606_s27 + $0x88] sm:$0xf] }
 0x13c   : > { %v8265_v19 = vrot.slane %v2240_v41, 5  ;;  %v5415_v13 = vcombine.low %v8217_v43, %v4210_v7  ;;  %v5181_v0 = vcombine.low %v8277_v14, %v8274_v45  ;;  %v2213_v28 = vor.u32 %v2212_v24, %v8219_v53  ;;  %v6499_v1 = vld [vmem:[%s6606_s27 + $0x94] sm:$0xf] }
 0x13d   : > { %v5416_v41 = vcombine.low %v8225_v5, %v8237_v51  ;;  %v8284_v34 = vrot.slane %v2203_v23, 4  ;;  %v2227_v36 = vor.u32 %v8095_v30, %v8093_v8  ;;  %v2237_v27 = vor.u32 %v8118_v60, %v8098_v48 }
 0x13e   : > { %v5417_v37 = vcombine.low %v8241_v35, %v8245_v55  ;;  %v5418_v59 = vcombine.low %v8255_v44, %v8259_v38  ;;  %v4236_v29 = vrot.slane %v4234_v6, 4  ;;  %v4237_v54 = vrot.slane %v7879_v9, 5 }
 0x13f   : > { %v8295_v10 = vrot.slane %v2216_v61, 5  ;;  %v8299_v39 = vsel %vm6898_vm7, %v5402_v17, %v4234_v6  ;;  %v2245_v8 = vshrl.u32 %v8142_v15, 16  ;;  %v2248_v30 = vshll.u32 %v8142_v15, 16 }
 0x140   : > { %v8303_v60 = vrot.slane %v2213_v28, 4  ;;  %v5403_v42 = vrot.slane %v6497_v4, 9  ;;  %v2254_v43 = vshll.u32 %v8145_v21, 16  ;;  %v2258_v24 = vshrl.u32 %v8145_v21, 16 }
 0x141   : > { %v2209_v9 = vsel %vm6632_vm4, %v8284_v34, %v8219_v53  ;;  %v8312_v7 = vrot.slane %v2227_v36, 4  ;;  %v8314_v23 = vrot.slane %v2237_v27, 4  ;;  %v4241_v6 = vrot.slane %v6498_v57, 5 }
 0x142   : > { %v8319_v15 = vsel %vm6898_vm7, %v4236_v29, %v4237_v54  ;;  %v4248_v61 = vrot.slane %v6499_v1, 5  ;;  %v2269_v3 = vshrl.u32 %v8162_v18, 16  ;;  %v2272_v21 = vshll.u32 %v8162_v18, 16  ;;  %5883 = vmatmul.mubr.msk.bf16.gmra.mrb[20].mxu1 %vm695_vm3, %v5177_v2  ;;  %6037 = vmatmul.mubr.msk.bf16.gmra.mrb[4].mxu0 %vm695_vm3, %v5414_v52  ;;  %v6500_v54 = vld [vmem:[%s6606_s27 + $0x8c] sm:$0x1] }
 0x143   : > { %v2247_v17 = vrot.slane %v2245_v8, 4  ;;  %v2250_v28 = vrot.slane %v2248_v30, 5  ;;  %v2278_v36 = vshll.u32 %v8159_v58, 16  ;;  %v2282_v27 = vshrl.u32 %v8159_v58, 16  ;;  %5886 = vmatprep.mubr.msk.bf16.mxu1 %vm695_vm3, %v5178_v50  ;;  %6040 = vmatprep.mubr.msk.bf16.mxu0 %vm695_vm3, %v5415_v13  ;;  %v6501_v30 = vld [vmem:[%s6606_s27 + $0x90] sm:$0xf] }
 0x144   : > { %v2219_v18 = vsel %vm6632_vm4, %v8303_v60, %v8295_v10  ;;  %v4244_v2 = vrot.slane %v7924_v16, 5  ;;  %v8341_v52 = vrot.slane %v2254_v43, 5  ;;  %v2260_v29 = vrot.slane %v2258_v24, 4 }
 0x145   : > { %v5419_v58 = vcombine.low %v8299_v39, %v8319_v15  ;;  %v2233_v50 = vsel %vm6632_vm4, %v8312_v7, %v8098_v48  ;;  %v4243_v13 = vrot.slane %v4241_v6, 4  ;;  %v2264_v8 = vshll.u32 %v6500_v54, 16 }
 0x146   : > { %v5404_v4 = vrot.slane %v6501_v30, 9  ;;  %v4250_v10 = vrot.slane %v4248_v61, 4  ;;  %v2271_v60 = vrot.slane %v2269_v3, 4  ;;  %v2274_v16 = vrot.slane %v2272_v21, 5  ;;  %v6502_v3 = vld [vmem:[%s6606_s27 + $0xa0] sm:$0xf] }
 0x147   : > { %v2251_v43 = vor.u32 %v2250_v28, %v2247_v17  ;;  %v4251_v24 = vrot.slane %v7941_v40, 5  ;;  %v8352_v57 = vrot.slane %v2278_v36, 5  ;;  %v2284_v1 = vrot.slane %v2282_v27, 4 }
 0x148   : > { %v2243_v48 = vsel %vm6632_vm4, %v8314_v23, %v8265_v19  ;;  %v8360_v7 = vsel %vm6898_vm7, %v5403_v42, %v4241_v6  ;;  %v2261_v54 = vor.u32 %v2260_v29, %v8341_v52  ;;  %v4255_v21 = vrot.slane %v6502_v3, 5 }
 0x149   : > { %v8366_v40 = vsel %vm6898_vm7, %v4243_v13, %v4244_v2  ;;  %v2266_v17 = vrot.slane %v2264_v8, 5  ;;  %v2293_v28 = vshrl.u32 %v8171_v63, 16  ;;  %v2296_v36 = vshll.u32 %v8171_v63, 16  ;;  %v6503_v2 = vld [vmem:[%s6606_s27 + $0x98] sm:$0x1] }
 0x14a   : > { %v8372_v19 = vsel %vm6898_vm7, %v5404_v4, %v4248_v61  ;;  %v2275_v42 = vor.u32 %v2274_v16, %v2271_v60  ;;  %v2302_v23 = vshll.u32 %v8174_v46, 16  ;;  %v2306_v6 = vshrl.u32 %v8174_v46, 16  ;;  %5887 = vmatmul.mubr.msk.bf16.gmra.mrb[24].mxu1 %vm695_vm3, %v5179_v47  ;;  %6041 = vmatmul.mubr.msk.bf16.gmra.mrb[8].mxu0 %vm695_vm3, %v5416_v41  ;;  %v6504_v47 = vld [vmem:[%s6606_s27 + $0x9c] sm:$0xf]  ;;  %v6505_v60 = vld [vmem:[%s6606_s27 + $0xac] sm:$0xf] }
 0x14b   : > { %v2252_v63 = vrot.slane %v2251_v43, 4  ;;  %v8386_v61 = vsel %vm6898_vm7, %v4250_v10, %v4251_v24  ;;  %v2285_v27 = vor.u32 %v2284_v1, %v8352_v57  ;;  %v2288_v29 = vshll.u32 %v6503_v2, 16  ;;  %5890 = vmatprep.mubr.msk.bf16.mxu1 %vm695_vm3, %v5180_v49  ;;  %6044 = vmatprep.mubr.msk.bf16.mxu0 %vm695_vm3, %v5417_v37  ;;  %v6506_v43 = vld [vmem:[%s6606_s27 + $0xa4] sm:$0x1] }
 0x14c   : > { %v2262_v46 = vrot.slane %v2261_v54, 4  ;;  %v5405_v5 = vrot.slane %v6504_v47, 9  ;;  %v4257_v51 = vrot.slane %v4255_v21, 4  ;;  %v4258_v41 = vrot.slane %v7971_v22, 5 }
 0x14d   : > { %v5207_v13 = vcombine.low %v2209_v9, %v2219_v18  ;;  %v8405_v8 = vcombine.low %v2233_v50, %v2243_v48  ;;  %v2295_v49 = vrot.slane %v2293_v28, 4  ;;  %v2298_v35 = vrot.slane %v2296_v36, 5 }
 0x14e   : > { %v5420_v55 = vcombine.low %v8360_v7, %v8366_v40  ;;  %v2276_v37 = vrot.slane %v2275_v42, 4  ;;  %v8409_v30 = vrot.slane %v2302_v23, 5  ;;  %v2308_v4 = vrot.slane %v2306_v6, 4 }
 0x14f   : > { %v2257_v22 = vsel %vm6632_vm4, %v2252_v63, %v8341_v52  ;;  %v5421_v53 = vcombine.low %v8372_v19, %v8386_v61  ;;  %v2286_v34 = vrot.slane %v2285_v27, 4  ;;  %v2290_v9 = vrot.slane %v2288_v29, 5 }
 0x150   : > { %v2267_v18 = vsel %vm6632_vm4, %v2262_v46, %v2266_v17  ;;  %v8420_v50 = vsel %vm6898_vm7, %v5405_v5, %v4255_v21  ;;  %v8424_v10 = vsel %vm6898_vm7, %v4257_v51, %v4258_v41  ;;  %v4262_v16 = vrot.slane %v6505_v60, 5  ;;  %v6512_v60 = vld [vmem:[%s6606_s27 + $0xc4] sm:$0xf] }
 0x151   : > { %v2299_v52 = vor.u32 %v2298_v35, %v2295_v49  ;;  %v2312_v24 = vshll.u32 %v6506_v43, 16  ;;  %v2317_v1 = vshrl.u32 %v8207_v56, 16  ;;  %v2320_v48 = vshll.u32 %v8207_v56, 16  ;;  %v6509_v35 = vld [vmem:[%s6606_s27 + $0xb4] sm:$0xf] }
 0x152   : > { %v2281_v54 = vsel %vm6632_vm4, %v2276_v37, %v8352_v57  ;;  %v2309_v3 = vor.u32 %v2308_v4, %v8409_v30  ;;  %v2326_v21 = vshll.u32 %v8204_v25, 16  ;;  %v2330_v17 = vshrl.u32 %v8204_v25, 16  ;;  %5891 = vmatmul.mubr.msk.bf16.gmra.mrb[28].mxu1 %vm695_vm3, %v5181_v0  ;;  %6045 = vmatmul.mubr.msk.bf16.gmra.mrb[12].mxu0 %vm695_vm3, %v5418_v59  ;;  %v6507_v57 = vld [vmem:[%s6606_s27 + $0xa8] sm:$0xf] }
 0x153   : > { %v2291_v56 = vsel %vm6632_vm4, %v2286_v34, %v2290_v9  ;;  %v5406_v28 = vrot.slane %v6507_v57, 9  ;;  %v2341_v36 = vshrl.u32 %v8231_v62, 16  ;;  %v2344_v42 = vshll.u32 %v8231_v62, 16  ;;  %5912 = vmatprep.mubr.msk.bf16.mxu1 %vm695_vm3, %v5207_v13  ;;  %6048 = vmatprep.mubr.msk.bf16.mxu0 %vm695_vm3, %v5419_v58  ;;  %v6508_v13 = vld [vmem:[%s6606_s27 + $0xb0] sm:$0x1] }
 0x154   : > { %v4264_v25 = vrot.slane %v4262_v16, 4  ;;  %v4265_v44 = vrot.slane %v7983_v33, 5  ;;  %v2350_v38 = vshll.u32 %v8228_v26, 16  ;;  %v2354_v0 = vshrl.u32 %v8228_v26, 16  ;;  %v6510_v34 = vld [vmem:[%s6606_s27 + $0xb8] sm:$0xf] }
 0x155   : > { %v5209_v59 = vcombine.low %v2257_v22, %v2267_v18  ;;  %v2300_v23 = vrot.slane %v2299_v52, 4  ;;  %v2319_v6 = vrot.slane %v2317_v1, 4  ;;  %v2322_v63 = vrot.slane %v2320_v48, 5  ;;  %v6511_v18 = vld [vmem:[%s6606_s27 + $0xbc] sm:$0x1] }
 0x156   : > { %v2310_v62 = vrot.slane %v2309_v3, 4  ;;  %v2314_v27 = vrot.slane %v2312_v24, 5  ;;  %v8457_v2 = vrot.slane %v2326_v21, 5  ;;  %v2332_v39 = vrot.slane %v2330_v17, 4  ;;  %v6513_v17 = vld [vmem:[%s6606_s27 + $0xc0] sm:$0xf] }
 0x157   : > { %v5210_v15 = vcombine.low %v2281_v54, %v2291_v56  ;;  %v5422_v33 = vcombine.low %v8420_v50, %v8424_v10  ;;  %v2343_v58 = vrot.slane %v2341_v36, 4  ;;  %v2346_v29 = vrot.slane %v2344_v42, 5 }
 0x158   : > { %v4263_v26 = vsel %vm6898_vm7, %v5406_v28, %v4262_v16  ;;  %v4266_v46 = vsel %vm6898_vm7, %v4264_v25, %v4265_v44  ;;  %v8465_v47 = vrot.slane %v2350_v38, 5  ;;  %v2356_v5 = vrot.slane %v2354_v0, 4 }
 0x159   : > { %v2305_v51 = vsel %vm6632_vm4, %v2300_v23, %v8409_v30  ;;  %v2323_v41 = vor.u32 %v2322_v63, %v2319_v6  ;;  %v2336_v49 = vshll.u32 %v6508_v13, 16  ;;  %v5407_v37 = vrot.slane %v6509_v35, 9 }
 0x15a   : > { %v2315_v4 = vsel %vm6632_vm4, %v2310_v62, %v2314_v27  ;;  %v2333_v22 = vor.u32 %v2332_v39, %v8457_v2  ;;  %v4269_v9 = vrot.slane %v6510_v34, 5  ;;  %v2360_v50 = vshll.u32 %v6511_v18, 16  ;;  %5913 = vmatmul.mubr.msk.bf16.vlgmr.msra.gmra.mrb[16].mxu1 %vm695_vm3, %v8405_v8  ;;  %6049 = vmatmul.mubr.msk.bf16.gmra.mrb[16].mxu0 %vm695_vm3, %v5420_v55  ;;  %v6515_v27 = vld [vmem:[%s6606_s27 + $0xd0] sm:$0xf] }
 0x15b   : > { %v5423_v30 = vcombine.low %v4263_v26, %v4266_v46  ;;  %v2347_v10 = vor.u32 %v2346_v29, %v2343_v58  ;;  %v4276_v16 = vrot.slane %v6512_v60, 5  ;;  %v2365_v52 = vshrl.u32 %v8277_v14, 16  ;;  %5916 = vmatprep.mubr.msk.bf16.mxu1 %vm695_vm3, %v5209_v59  ;;  %6052 = vmatprep.mubr.msk.bf16.mxu0 %vm695_vm3, %v5421_v53  ;;  %v6514_v59 = vld [vmem:[%s6606_s27 + $0xc8] sm:$0x1]  ;;  %v6516_v26 = vld [vmem:[%s6606_s27 + $0xcc] sm:$0xf] }
 0x15c   : > { %v2357_v8 = vor.u32 %v2356_v5, %v8465_v47  ;;  %v2368_v7 = vshll.u32 %v8277_v14, 16  ;;  %v2374_v40 = vshll.u32 %v8274_v45, 16  ;;  %v2378_v55 = vshrl.u32 %v8274_v45, 16 }
 0x15d   : > { %v5211_v43 = vcombine.low %v2305_v51, %v2315_v4  ;;  %v2324_v24 = vrot.slane %v2323_v41, 4  ;;  %v2338_v1 = vrot.slane %v2336_v49, 5  ;;  %v4272_v48 = vrot.slane %v8012_v11, 5 }
 0x15e   : > { %v2334_v54 = vrot.slane %v2333_v22, 4  ;;  %v4271_v3 = vrot.slane %v4269_v9, 4  ;;  %v2362_v21 = vrot.slane %v2360_v50, 5  ;;  %v5408_v19 = vrot.slane %v6513_v17, 9 }
 0x15f   : > { %v2348_v61 = vrot.slane %v2347_v10, 4  ;;  %v4278_v53 = vrot.slane %v4276_v16, 4  ;;  %v4279_v56 = vrot.slane %v8030_v31, 5  ;;  %v2367_v14 = vrot.slane %v2365_v52, 4 }
 0x160   : > { %v2358_v57 = vrot.slane %v2357_v8, 4  ;;  %v2370_v28 = vrot.slane %v2368_v7, 5  ;;  %v2376_v36 = vrot.slane %v2374_v40, 5  ;;  %v2380_v45 = vrot.slane %v2378_v55, 4 }
 0x161   : > { %v2329_v42 = vsel %vm6632_vm4, %v2324_v24, %v8457_v2  ;;  %v2339_v11 = vsel %vm6632_vm4, %v2334_v54, %v2338_v1  ;;  %v4270_v25 = vsel %vm6898_vm7, %v5407_v37, %v4269_v9  ;;  %v4273_v44 = vsel %vm6898_vm7, %v4271_v3, %v4272_v48 }
 0x162   : > { %5917 = vmatmul.mubr.msk.bf16.gmra.mrb[20].mxu1 %vm695_vm3, %v5210_v15  ;;  %6053 = vmatmul.mubr.msk.bf16.gmra.mrb[20].mxu0 %vm695_vm3, %v5422_v33  ;;  %v2353_v31 = vsel %vm6632_vm4, %v2348_v61, %v8465_v47  ;;  %v4277_v38 = vsel %vm6898_vm7, %v5408_v19, %v4276_v16  ;;  %v4280_v0 = vsel %vm6898_vm7, %v4278_v53, %v4279_v56  ;;  %v2384_v23 = vshll.u32 %v6514_v59, 16 }
 0x163   : > { %5920 = vmatprep.mubr.msk.bf16.mxu1 %vm695_vm3, %v5211_v43  ;;  %6056 = vmatprep.mubr.msk.bf16.mxu0 %vm695_vm3, %v5423_v30  ;;  %v2363_v6 = vsel %vm6632_vm4, %v2358_v57, %v2362_v21  ;;  %v2371_v63 = vor.u32 %v2370_v28, %v2367_v14  ;;  %v2381_v62 = vor.u32 %v2380_v45, %v2376_v36  ;;  %v4283_v2 = vrot.slane %v6515_v27, 5 }
 0x164   : > { %v5212_v39 = vcombine.low %v2329_v42, %v2339_v11  ;;  %v5424_v15 = vcombine.low %v4270_v25, %v4273_v44  ;;  %v5213_v33 = vcombine.low %v2353_v31, %v2363_v6  ;;  %v5425_v58 = vcombine.low %v4277_v38, %v4280_v0 }
 0x165   : > { %v2386_v29 = vrot.slane %v2384_v23, 5  ;;  %v5409_v46 = vrot.slane %v6516_v26, 9  ;;  %v2372_v47 = vrot.slane %v2371_v63, 4  ;;  %v2382_v5 = vrot.slane %v2381_v62, 4 }
 0x166   : > { %v4285_v51 = vrot.slane %v4283_v2, 4  ;;  %v4286_v41 = vrot.slane %v8057_v20, 5 }
 0x167   : > { %v4284_v13 = vsel %vm6898_vm7, %v5409_v46, %v4283_v2  ;;  %v2377_v49 = vsel %vm6632_vm4, %v2372_v47, %v2376_v36  ;;  %v2387_v35 = vsel %vm6632_vm4, %v2382_v5, %v2386_v29 }
 0x168   : > { %v4287_v20 = vsel %vm6898_vm7, %v4285_v51, %v4286_v41  ;;  %v5214_v37 = vcombine.low %v2377_v49, %v2387_v35 }
 0x169   : > { %v5426_v4 = vcombine.low %v4284_v13, %v4287_v20 }
 0x16a   : > { %5921 = vmatmul.mubr.msk.bf16.gmra.mrb[24].mxu1 %vm695_vm3, %v5212_v39  ;;  %6057 = vmatmul.mubr.msk.bf16.gmra.mrb[24].mxu0 %vm695_vm3, %v5424_v15 }
 0x16b   : > { %5924 = vmatprep.mubr.msk.bf16.mxu1 %vm695_vm3, %v5213_v33  ;;  %6060 = vmatprep.mubr.msk.bf16.mxu0 %vm695_vm3, %v5425_v58 }
 0x172   : > { %5925 = vmatmul.mubr.msk.bf16.gmra.mrb[28].mxu1 %vm695_vm3, %v5214_v37  ;;  %6061 = vmatmul.mubr.msk.bf16.gmra.mrb[28].mxu0 %vm695_vm3, %v5426_v4 }
 0x1ed   : > { %v5864_v22 = vpop.f32.mrb[0].mxu1 }
 0x1ee   : > { %v1845_v34 = vpop.f32.mrb[1].mxu1 }
 0x1ef   : > { %v5865_v9 = vpop.f32.mrb[2].mxu1 }
 0x1f0   : > { %v1848_v18 = vpop.f32.mrb[3].mxu1 }
 0x1f5   : > { %v5868_v50 = vpop.f32.mrb[4].mxu1 }
 0x1f6   : > { %v1861_v30 = vpop.f32.mrb[5].mxu1 }
 0x1f7   : > { %v5869_v10 = vpop.f32.mrb[6].mxu1 }
 0x1f8   : > { %v1864_v60 = vpop.f32.mrb[7].mxu1 }
 0x1fd   : > { %v5872_v32 = vpop.f32.mrb[8].mxu1 }
 0x1fe   : > { %v1877_v16 = vpop.f32.mrb[9].mxu1 }
 0x1ff   : > { %v5873_v52 = vpop.f32.mrb[10].mxu1 }
 0x200   : > { %v1880_v12 = vpop.f32.mrb[11].mxu1 }
 0x205   : > { %v5876_v8 = vpop.f32.mrb[12].mxu1 }
 0x206   : > { %v1893_v7 = vpop.f32.mrb[13].mxu1 }
 0x207   : > { %v5877_v40 = vpop.f32.mrb[14].mxu1 }
 0x208   : > { %v1896_v55 = vpop.f32.mrb[15].mxu1 }
 0x20d   : > { %v6034_v43 = vpop.f32.mrb[0].mxu0 }
 0x20e   : > { %v8537_v24 = vadd.f32 %v6034_v43, %v5864_v22  ;;  %v4423_v1 = vpop.f32.mrb[1].mxu0 }
 0x20f   : > { %v8540_v48 = vadd.f32 %v4423_v1, %v1845_v34  ;;  %v6035_v54 = vpop.f32.mrb[2].mxu0 }
 0x210   : > { %v8542_v3 = vadd.f32 %v6035_v54, %v5865_v9  ;;  %v4426_v21 = vpop.f32.mrb[3].mxu0 }
 0x211   : > { %v8549_v17 = vadd.f32 %v4426_v21, %v1848_v18 }
 0x212   : > { %v5518_v19 = vpack.c.bf16 %v8542_v3, %v8537_v24 }
 0x213   : > { %v5513_v61 = vpack.c.bf16 %v8549_v17, %v8540_v48  ;;  %v4742_v53 = vadd.f32 %v8549_v17, %v8540_v48 }
 0x214   : > { %5590 = vst [vmem:[%s8547_s22 + $0x8] sm:$0xff] %v5518_v19  }
 0x215   : > { %5514 = vst [vmem:[%s8547_s22] sm:$0xff] %v5513_v61   ;;  %v4743_v56 = vadd.f32 %v8537_v24, %v4742_v53  ;;  %v6038_v14 = vpop.f32.mrb[4].mxu0 }
 0x216   : > { %v8560_v57 = vadd.f32 %v6038_v14, %v5868_v50  ;;  %v4439_v28 = vpop.f32.mrb[5].mxu0 }
 0x217   : > { %v8562_v36 = vadd.f32 %v4439_v28, %v1861_v30  ;;  %v4744_v45 = vadd.f32 %v8542_v3, %v4743_v56  ;;  %v6039_v42 = vpop.f32.mrb[6].mxu0 }
 0x218   : > { %v8565_v11 = vadd.f32 %v6039_v42, %v5869_v10  ;;  %v4442_v25 = vpop.f32.mrb[7].mxu0 }
 0x219   : > { %v4745_v44 = vadd.f32 %v8562_v36, %v4744_v45  ;;  %v8568_v31 = vadd.f32 %v4442_v25, %v1864_v60 }
 0x21a   : > { %v5528_v38 = vpack.c.bf16 %v8565_v11, %v8560_v57 }
 0x21b   : > { %v5523_v0 = vpack.c.bf16 %v8568_v31, %v8562_v36  ;;  %v4746_v59 = vadd.f32 %v8568_v31, %v4745_v44 }
 0x21c   : > { %5592 = vst [vmem:[%s8547_s22 + $0x18] sm:$0xff] %v5528_v38  }
 0x21d   : > { %5591 = vst [vmem:[%s8547_s22 + $0x10] sm:$0xff] %v5523_v0   ;;  %v4747_v23 = vadd.f32 %v8560_v57, %v4746_v59  ;;  %v6042_v6 = vpop.f32.mrb[8].mxu0 }
 0x21e   : > { %v8578_v63 = vadd.f32 %v6042_v6, %v5872_v32  ;;  %v4455_v62 = vpop.f32.mrb[9].mxu0 }
 0x21f   : > { %v8580_v27 = vadd.f32 %v4455_v62, %v1877_v16  ;;  %v4748_v2 = vadd.f32 %v8565_v11, %v4747_v23  ;;  %v6043_v39 = vpop.f32.mrb[10].mxu0 }
 0x220   : > { %v8583_v15 = vadd.f32 %v6043_v39, %v5873_v52  ;;  %v4458_v33 = vpop.f32.mrb[11].mxu0 }
 0x221   : > { %v4749_v58 = vadd.f32 %v8580_v27, %v4748_v2  ;;  %v8586_v29 = vadd.f32 %v4458_v33, %v1880_v12 }
 0x222   : > { %v5538_v26 = vpack.c.bf16 %v8583_v15, %v8578_v63 }
 0x223   : > { %v5533_v46 = vpack.c.bf16 %v8586_v29, %v8580_v27  ;;  %v4750_v47 = vadd.f32 %v8586_v29, %v4749_v58 }
 0x224   : > { %5594 = vst [vmem:[%s8547_s22 + $0x28] sm:$0xff] %v5538_v26  }
 0x225   : > { %5593 = vst [vmem:[%s8547_s22 + $0x20] sm:$0xff] %v5533_v46   ;;  %v4751_v5 = vadd.f32 %v8578_v63, %v4750_v47  ;;  %v6046_v51 = vpop.f32.mrb[12].mxu0 }
 0x226   : > { %v8596_v41 = vadd.f32 %v6046_v51, %v5876_v8  ;;  %v4471_v13 = vpop.f32.mrb[13].mxu0 }
 0x227   : > { %v8598_v49 = vadd.f32 %v4471_v13, %v1893_v7  ;;  %v4752_v35 = vadd.f32 %v8583_v15, %v4751_v5  ;;  %v6047_v20 = vpop.f32.mrb[14].mxu0 }
 0x228   : > { %v8601_v37 = vadd.f32 %v6047_v20, %v5877_v40  ;;  %v4474_v4 = vpop.f32.mrb[15].mxu0 }
 0x229   : > { %v4753_v22 = vadd.f32 %v8598_v49, %v4752_v35  ;;  %v8604_v34 = vadd.f32 %v4474_v4, %v1896_v55 }
 0x22a   : > { %v5548_v9 = vpack.c.bf16 %v8601_v37, %v8596_v41 }
 0x22b   : > { %v5543_v18 = vpack.c.bf16 %v8604_v34, %v8598_v49  ;;  %v4754_v50 = vadd.f32 %v8604_v34, %v4753_v22 }
 0x22c   : > { %5596 = vst [vmem:[%s8547_s22 + $0x38] sm:$0xff] %v5548_v9  }
 0x22d   : > { %5595 = vst [vmem:[%s8547_s22 + $0x30] sm:$0xff] %v5543_v18   ;;  %v4755_v30 = vadd.f32 %v8596_v41, %v4754_v50  ;;  %v5914_v10 = vpop.f32.mrb[16].mxu1  ;;  %v6050_v60 = vpop.f32.mrb[16].mxu0 }
 0x22e   : > { %v8614_v32 = vadd.f32 %v6050_v60, %v5914_v10  ;;  %v2587_v16 = vpop.f32.mrb[17].mxu1  ;;  %v4487_v52 = vpop.f32.mrb[17].mxu0 }
 0x22f   : > { %v8616_v12 = vadd.f32 %v4487_v52, %v2587_v16  ;;  %v4756_v8 = vadd.f32 %v8601_v37, %v4755_v30  ;;  %v5915_v7 = vpop.f32.mrb[18].mxu1  ;;  %v6051_v40 = vpop.f32.mrb[18].mxu0 }
 0x230   : > { %v8619_v55 = vadd.f32 %v6051_v40, %v5915_v7  ;;  %v2590_v43 = vpop.f32.mrb[19].mxu1  ;;  %v4490_v1 = vpop.f32.mrb[19].mxu0 }
 0x231   : > { %v4757_v54 = vadd.f32 %v8616_v12, %v4756_v8  ;;  %v8622_v21 = vadd.f32 %v4490_v1, %v2590_v43 }
 0x232   : > { %v5558_v19 = vpack.c.bf16 %v8619_v55, %v8614_v32 }
 0x233   : > { %v5553_v61 = vpack.c.bf16 %v8622_v21, %v8616_v12  ;;  %v4758_v53 = vadd.f32 %v8622_v21, %v4757_v54 }
 0x234   : > { %5598 = vst [vmem:[%s8547_s22 + $0x48] sm:$0xff] %v5558_v19  }
 0x235   : > { %5597 = vst [vmem:[%s8547_s22 + $0x40] sm:$0xff] %v5553_v61   ;;  %v4759_v56 = vadd.f32 %v8614_v32, %v4758_v53  ;;  %v5918_v14 = vpop.f32.mrb[20].mxu1  ;;  %v6054_v28 = vpop.f32.mrb[20].mxu0 }
 0x236   : > { %v8632_v45 = vadd.f32 %v6054_v28, %v5918_v14  ;;  %v2603_v42 = vpop.f32.mrb[21].mxu1  ;;  %v4503_v25 = vpop.f32.mrb[21].mxu0 }
 0x237   : > { %v8634_v44 = vadd.f32 %v4503_v25, %v2603_v42  ;;  %v4760_v38 = vadd.f32 %v8619_v55, %v4759_v56  ;;  %v5919_v0 = vpop.f32.mrb[22].mxu1  ;;  %v6055_v59 = vpop.f32.mrb[22].mxu0 }
 0x238   : > { %v8637_v23 = vadd.f32 %v6055_v59, %v5919_v0  ;;  %v2606_v6 = vpop.f32.mrb[23].mxu1  ;;  %v4506_v62 = vpop.f32.mrb[23].mxu0 }
 0x239   : > { %v4761_v2 = vadd.f32 %v8634_v44, %v4760_v38  ;;  %v8640_v39 = vadd.f32 %v4506_v62, %v2606_v6 }
 0x23a   : > { %v5568_v33 = vpack.c.bf16 %v8637_v23, %v8632_v45 }
 0x23b   : > { %v5563_v58 = vpack.c.bf16 %v8640_v39, %v8634_v44  ;;  %v4762_v26 = vadd.f32 %v8640_v39, %v4761_v2 }
 0x23c   : > { %5600 = vst [vmem:[%s8547_s22 + $0x58] sm:$0xff] %v5568_v33  }
 0x23d   : > { %5599 = vst [vmem:[%s8547_s22 + $0x50] sm:$0xff] %v5563_v58   ;;  %v4763_v46 = vadd.f32 %v8632_v45, %v4762_v26  ;;  %v5922_v47 = vpop.f32.mrb[24].mxu1  ;;  %v6058_v5 = vpop.f32.mrb[24].mxu0 }
 0x23e   : > { %v8650_v51 = vadd.f32 %v6058_v5, %v5922_v47  ;;  %v2619_v13 = vpop.f32.mrb[25].mxu1  ;;  %v4519_v35 = vpop.f32.mrb[25].mxu0 }
 0x23f   : > { %v6091_v20 = vadd.f32 %v4519_v35, %v2619_v13  ;;  %v4764_v4 = vadd.f32 %v8637_v23, %v4763_v46  ;;  %v5923_v22 = vpop.f32.mrb[26].mxu1  ;;  %v6059_v9 = vpop.f32.mrb[26].mxu0 }
 0x240   : > { %v6092_v18 = vadd.f32 %v6059_v9, %v5923_v22  ;;  %v2622_v50 = vpop.f32.mrb[27].mxu1  ;;  %v4522_v30 = vpop.f32.mrb[27].mxu0 }
 0x241   : > { %v4765_v10 = vadd.f32 %v6091_v20, %v4764_v4  ;;  %v6093_v60 = vadd.f32 %v4522_v30, %v2622_v50 }
 0x242   : > { %v5578_v16 = vpack.c.bf16 %v6092_v18, %v8650_v51 }
 0x243   : > { %v5573_v52 = vpack.c.bf16 %v6093_v60, %v6091_v20  ;;  %v4766_v8 = vadd.f32 %v6093_v60, %v4765_v10 }
 0x244   : > { %5602 = vst [vmem:[%s8547_s22 + $0x68] sm:$0xff] %v5578_v16  }
 0x245   : > { %5601 = vst [vmem:[%s8547_s22 + $0x60] sm:$0xff] %v5573_v52   ;;  %v4767_v7 = vadd.f32 %v8650_v51, %v4766_v8  ;;  %v5926_v40 = vpop.f32.mrb[28].mxu1  ;;  %v6062_v43 = vpop.f32.mrb[28].mxu0 }
 0x246   : > { %v6094_v1 = vadd.f32 %v6062_v43, %v5926_v40  ;;  %v2635_v54 = vpop.f32.mrb[29].mxu1  ;;  %v4535_v19 = vpop.f32.mrb[29].mxu0 }
 0x247   : > { %v6095_v61 = vadd.f32 %v4535_v19, %v2635_v54  ;;  %v4768_v53 = vadd.f32 %v6092_v18, %v4767_v7  ;;  %v5927_v56 = vpop.f32.mrb[30].mxu1  ;;  %v6063_v14 = vpop.f32.mrb[30].mxu0 }
 0x248   : > { %v6096_v28 = vadd.f32 %v6063_v14, %v5927_v56  ;;  %v2638_v42 = vpop.f32.mrb[31].mxu1  ;;  %v4538_v25 = vpop.f32.mrb[31].mxu0 }
 0x249   : > { %v4769_v38 = vadd.f32 %v6095_v61, %v4768_v53  ;;  %v6097_v0 = vadd.f32 %v4538_v25, %v2638_v42 }
 0x24a   : > { %v5588_v59 = vpack.c.bf16 %v6096_v28, %v6094_v1 }
 0x24b   : > { %v5583_v6 = vpack.c.bf16 %v6097_v0, %v6095_v61  ;;  %v4770_v62 = vadd.f32 %v6097_v0, %v4769_v38 }
 0x24c   : > { %5604 = vst [vmem:[%s8547_s22 + $0x78] sm:$0xff] %v5588_v59  }
 0x24d   : > { %5603 = vst [vmem:[%s8547_s22 + $0x70] sm:$0xff] %v5583_v6   ;;  %v4771_v2 = vadd.f32 %v6094_v1, %v4770_v62 }
 0x24f   : > { %v4772_v33 = vadd.f32 %v6096_v28, %v4771_v2 }
 0x251   : > { %v4773_v58 = vrot.slane %v4772_v33, 4 }
 0x253   : > { %v4774_v26 = vadd.f32 %v4773_v58, %v4772_v33 }
 0x255   : > { %v4775_v46 = vrot.slane %v4774_v26, 2 }
 0x257   : > { %v4776_v47 = vadd.f32 %v4775_v46, %v4774_v26 }
 0x259   : > { %v4777_v5 = vrot.slane %v4776_v47, 1 }
 0x25b   : > { %v4778_v13 = vadd.f32 %v4777_v5, %v4776_v47 }
 0x25d   : > { %v4779_v35 = vmul.f32 0.00390625, %v4778_v13  ;;  %4881 = vst [vmem:[%s8663_s26] sm:$0x1] %v4778_v13 }
 0x25f   : > { %v4788_v4 = vsub.f32 %v8580_v27, %v4779_v35  ;;  %v4789_v22 = vsub.f32 %v8586_v29, %v4779_v35  ;;  %v4790_v9 = vsub.f32 %v8578_v63, %v4779_v35  ;;  %v4791_v50 = vsub.f32 %v8583_v15, %v4779_v35 }
 0x260   : > { %v4792_v30 = vsub.f32 %v8598_v49, %v4779_v35  ;;  %v4793_v10 = vsub.f32 %v8604_v34, %v4779_v35  ;;  %v4794_v16 = vsub.f32 %v8596_v41, %v4779_v35  ;;  %v4795_v52 = vsub.f32 %v8601_v37, %v4779_v35 }
 0x261   : > { %v4796_v8 = vsub.f32 %v8616_v12, %v4779_v35  ;;  %v4797_v7 = vsub.f32 %v8622_v21, %v4779_v35  ;;  %v4798_v27 = vsub.f32 %v8614_v32, %v4779_v35  ;;  %v4799_v29 = vsub.f32 %v8619_v55, %v4779_v35 }
 0x262   : > { %v4800_v63 = vsub.f32 %v8634_v44, %v4779_v35  ;;  %v4801_v15 = vsub.f32 %v8640_v39, %v4779_v35  ;;  %v4802_v49 = vsub.f32 %v8632_v45, %v4779_v35  ;;  %v4803_v34 = vsub.f32 %v8637_v23, %v4779_v35 }
 0x263   : > { %v4804_v40 = vsub.f32 %v6091_v20, %v4779_v35  ;;  %v8682_v41 = vsub.f32 %v6093_v60, %v4779_v35  ;;  %v8685_v37 = vsub.f32 %v8650_v51, %v4779_v35  ;;  %v8687_v12 = vsub.f32 %v6092_v18, %v4779_v35 }
 0x264   : > { %v8689_v21 = vsub.f32 %v6095_v61, %v4779_v35  ;;  %v8691_v32 = vsub.f32 %v6097_v0, %v4779_v35  ;;  %v8693_v55 = vsub.f32 %v6094_v1, %v4779_v35  ;;  %v8695_v44 = vsub.f32 %v6096_v28, %v4779_v35 }
 0x265   : > { %v4780_v45 = vsub.f32 %v8540_v48, %v4779_v35  ;;  %v4781_v23 = vsub.f32 %v8549_v17, %v4779_v35  ;;  %v4782_v39 = vsub.f32 %v8537_v24, %v4779_v35  ;;  %v4783_v51 = vsub.f32 %v8542_v3, %v4779_v35 }
 0x266   : > { %v4784_v18 = vsub.f32 %v8562_v36, %v4779_v35  ;;  %v4785_v19 = vsub.f32 %v8568_v31, %v4779_v35  ;;  %v4786_v53 = vsub.f32 %v8560_v57, %v4779_v35  ;;  %v4787_v17 = vsub.f32 %v8565_v11, %v4779_v35 }
 0x267   : > { %v4812_v20 = vmul.f32 %v4780_v45, %v4780_v45  ;;  %v4813_v60 = vmul.f32 %v4781_v23, %v4781_v23  ;;  %v4814_v43 = vmul.f32 %v4782_v39, %v4782_v39  ;;  %v4815_v1 = vmul.f32 %v4783_v51, %v4783_v51 }
 0x268   : > { %v4816_v56 = vmul.f32 %v4784_v18, %v4784_v18  ;;  %v4817_v14 = vmul.f32 %v4785_v19, %v4785_v19  ;;  %v4818_v28 = vmul.f32 %v4786_v53, %v4786_v53  ;;  %v4819_v25 = vmul.f32 %v4787_v17, %v4787_v17 }
 0x269   : > { %v4844_v54 = vadd.f32 %v4813_v60, %v4812_v20  ;;  %v4820_v38 = vmul.f32 %v4788_v4, %v4788_v4  ;;  %v4821_v0 = vmul.f32 %v4789_v22, %v4789_v22  ;;  %v4822_v6 = vmul.f32 %v4790_v9, %v4790_v9 }
 0x26a   : > { %v4823_v62 = vmul.f32 %v4791_v50, %v4791_v50  ;;  %v4824_v33 = vmul.f32 %v4792_v30, %v4792_v30  ;;  %v4825_v58 = vmul.f32 %v4793_v10, %v4793_v10  ;;  %v4826_v46 = vmul.f32 %v4794_v16, %v4794_v16 }
 0x26b   : > { %v4845_v61 = vadd.f32 %v4844_v54, %v4814_v43  ;;  %v4827_v47 = vmul.f32 %v4795_v52, %v4795_v52  ;;  %v4828_v13 = vmul.f32 %v4796_v8, %v4796_v8  ;;  %v4829_v45 = vmul.f32 %v4797_v7, %v4797_v7 }
 0x26c   : > { %v4830_v4 = vmul.f32 %v4798_v27, %v4798_v27  ;;  %v4831_v22 = vmul.f32 %v4799_v29, %v4799_v29  ;;  %v4832_v9 = vmul.f32 %v4800_v63, %v4800_v63  ;;  %v4833_v50 = vmul.f32 %v4801_v15, %v4801_v15 }
 0x26d   : > { %v4846_v48 = vadd.f32 %v4845_v61, %v4815_v1  ;;  %v4834_v30 = vmul.f32 %v4802_v49, %v4802_v49  ;;  %v4835_v10 = vmul.f32 %v4803_v34, %v4803_v34  ;;  %v4836_v16 = vmul.f32 %v4804_v40, %v4804_v40 }
 0x26e   : > { %v4837_v52 = vmul.f32 %v8682_v41, %v8682_v41  ;;  %v4838_v7 = vmul.f32 %v8685_v37, %v8685_v37  ;;  %v4839_v29 = vmul.f32 %v8687_v12, %v8687_v12  ;;  %v4840_v15 = vmul.f32 %v8689_v21, %v8689_v21 }
 0x26f   : > { %v4847_v24 = vadd.f32 %v4846_v48, %v4816_v56  ;;  %v4841_v34 = vmul.f32 %v8691_v32, %v8691_v32  ;;  %v4842_v41 = vmul.f32 %v8693_v55, %v8693_v55  ;;  %v4843_v37 = vmul.f32 %v8695_v44, %v8695_v44 }
 0x271   : > { %v4848_v42 = vadd.f32 %v4847_v24, %v4817_v14 }
 0x273   : > { %v4849_v3 = vadd.f32 %v4848_v42, %v4818_v28 }
 0x275   : > { %v4850_v36 = vadd.f32 %v4849_v3, %v4819_v25 }
 0x277   : > { %v4851_v59 = vadd.f32 %v4850_v36, %v4820_v38 }
 0x279   : > { %v4852_v31 = vadd.f32 %v4851_v59, %v4821_v0 }
 0x27b   : > { %v4853_v2 = vadd.f32 %v4852_v31, %v4822_v6 }
 0x27d   : > { %v4854_v57 = vadd.f32 %v4853_v2, %v4823_v62 }
 0x27f   : > { %v4855_v26 = vadd.f32 %v4854_v57, %v4824_v33 }
 0x281   : > { %v4856_v11 = vadd.f32 %v4855_v26, %v4825_v58 }
 0x283   : > { %v4857_v5 = vadd.f32 %v4856_v11, %v4826_v46 }
 0x285   : > { %v4858_v35 = vadd.f32 %v4857_v5, %v4827_v47 }
 0x287   : > { %v4859_v23 = vadd.f32 %v4858_v35, %v4828_v13 }
 0x289   : > { %v4860_v39 = vadd.f32 %v4859_v23, %v4829_v45 }
 0x28b   : > { %v4861_v20 = vadd.f32 %v4860_v39, %v4830_v4 }
 0x28d   : > { %v4862_v60 = vadd.f32 %v4861_v20, %v4831_v22 }
 0x28f   : > { %v4863_v51 = vadd.f32 %v4862_v60, %v4832_v9 }
 0x291   : > { %v4864_v18 = vadd.f32 %v4863_v51, %v4833_v50 }
 0x293   : > { %v4865_v43 = vadd.f32 %v4864_v18, %v4834_v30 }
 0x295   : > { %v4866_v54 = vadd.f32 %v4865_v43, %v4835_v10 }
 0x297   : > { %v4867_v8 = vadd.f32 %v4866_v54, %v4836_v16 }
 0x299   : > { %v4868_v27 = vadd.f32 %v4867_v8, %v4837_v52 }
 0x29b   : > { %v4869_v63 = vadd.f32 %v4868_v27, %v4838_v7 }
 0x29d   : > { %v4870_v49 = vadd.f32 %v4869_v63, %v4839_v29 }
 0x29f   : > { %v4871_v40 = vadd.f32 %v4870_v49, %v4840_v15 }
 0x2a1   : > { %v4872_v19 = vadd.f32 %v4871_v40, %v4841_v34 }
 0x2a3   : > { %v4873_v1 = vadd.f32 %v4872_v19, %v4842_v41 }
 0x2a5   : > { %v4874_v61 = vadd.f32 %v4873_v1, %v4843_v37 }
 0x2a7   : > { %v4875_v12 = vrot.slane %v4874_v61, 4 }
 0x2a9   : > { %v4876_v53 = vadd.f32 %v4875_v12, %v4874_v61 }
 0x2ab   : > { %v4877_v56 = vrot.slane %v4876_v53, 2 }
 0x2ad   : > { %v4878_v48 = vadd.f32 %v4877_v56, %v4876_v53 }
 0x2af   : > { %v4879_v17 = vrot.slane %v4878_v48, 1 }
 0x2b1   : > { %v4880_v21 = vadd.f32 %v4879_v17, %v4878_v48 }
 0x2b3   : > { %4882 = vst [vmem:[%s8663_s26 + $0x1] sm:$0x1] %v4880_v21 }
 0x2b4 PF: > { %s14_s14 = sadd.s32 1, %s6539_s14   ;;  %s8845_s12 = smov %s6535_s13 }
 0x2b5   : > { %p11_p5 = scmp.ge.s32.totalorder %s14_s14, 4   ;;  %s8846_s13 = smov %s8848_s15 }
 0x2b7   :  { %13 = sbr.rel (!%p11_p5) target bundleno = 2 (0x2), region = 81 }

</bundles_post_ra>
